<compile_context>
chip_gen: v7x
topology: tpu7x:2x2x1
jax: 0.10.0
libtpu: 0.0.40
codegen_flags: <defaults>
</compile_context>

<pallas_src>
import jax
import jax.numpy as jnp
from jax.experimental import pallas as pl
from jax.experimental.pallas import tpu as pltpu

EPS = 1e-5
LANE = 128                       # lane width / channel padding multiple
VMEM_LIMIT = 48 * 1024 * 1024    # <= 64 MiB (v7x per-TC VMEM); v5e/v6e have 128 MiB
TAPS = tuple((di, dj) for di in range(3) for dj in range(3))   # kh-major, kw-minor


# ----------------------------- Pallas kernels -------------------------------

def _make_conv3x3_kernel(Ho, Wo, Cp, Pp, stride):
    """9-tap shift-and-accumulate 3x3 conv over a spatially pre-padded NHWC
    image block (bf16 in, f32 MXU accumulation) + per-channel (sum, sum_sq)."""
    def kernel(x_ref, w_ref, o_ref, st_ref, acc_ref):
        acc_ref[...] = jnp.zeros_like(acc_ref)
        for t, (di, dj) in enumerate(TAPS):
            if stride == 1:
                sl = x_ref[0, di:di + Ho, dj:dj + Wo, :]
            else:
                sl = x_ref[0, pl.ds(di, Ho, stride), pl.ds(dj, Wo, stride), :]
            acc_ref[...] += jnp.dot(sl.reshape(Ho * Wo, Cp), w_ref[t],
                                    preferred_element_type=jnp.float32)
        conv = acc_ref[...]
        o_ref[0] = conv.reshape(Ho, Wo, Pp).astype(o_ref.dtype)
        st_ref[0, 0:1, :] = jnp.sum(conv, axis=0, keepdims=True)
        st_ref[0, 1:2, :] = jnp.sum(conv * conv, axis=0, keepdims=True)
    return kernel


def _make_conv2_fused_kernel(Ho, Wo, Pp):
    """bn1-affine (+gate1) + ReLU prologue fused with the conv2 (3x3, stride 1)
    shift-and-accumulate; also emits per-channel (sum, sum_sq) partials."""
    def kernel(h_ref, s1_ref, b1_ref, w_ref, o_ref, st_ref, hp_ref, acc_ref):
        s1 = s1_ref[...].reshape(1, 1, Pp)
        b1 = b1_ref[...].reshape(1, 1, Pp)
        y = h_ref[0].astype(jnp.float32) * s1 + b1
        hp_ref[...] = jnp.zeros_like(hp_ref)              # 1-pixel halo = conv pad
        hp_ref[1:Ho + 1, 1:Wo + 1, :] = jnp.maximum(y, 0.0).astype(hp_ref.dtype)
        acc_ref[...] = jnp.zeros_like(acc_ref)
        for t, (di, dj) in enumerate(TAPS):
            sl = hp_ref[di:di + Ho, dj:dj + Wo, :]
            acc_ref[...] += jnp.dot(sl.reshape(Ho * Wo, Pp), w_ref[t],
                                    preferred_element_type=jnp.float32)
        conv = acc_ref[...]
        o_ref[0] = conv.reshape(Ho, Wo, Pp).astype(o_ref.dtype)
        st_ref[0, 0:1, :] = jnp.sum(conv, axis=0, keepdims=True)
        st_ref[0, 1:2, :] = jnp.sum(conv * conv, axis=0, keepdims=True)
    return kernel


def _make_conv1x1_kernel(H, W, Ho, Wo, Cp, Pp, stride):
    """1x1 shortcut conv (reads the interior of the padded input, optionally
    strided) + per-channel (sum, sum_sq) partials."""
    def kernel(x_ref, w_ref, o_ref, st_ref):
        if stride == 1:
            xs = x_ref[0, 1:H + 1, 1:W + 1, :]
        else:
            xs = x_ref[0, pl.ds(1, Ho, stride), pl.ds(1, Wo, stride), :]
        conv = jnp.dot(xs.reshape(Ho * Wo, Cp), w_ref[...],
                       preferred_element_type=jnp.float32)
        o_ref[0] = conv.reshape(Ho, Wo, Pp).astype(o_ref.dtype)
        st_ref[0, 0:1, :] = jnp.sum(conv, axis=0, keepdims=True)
        st_ref[0, 1:2, :] = jnp.sum(conv * conv, axis=0, keepdims=True)
    return kernel


def _make_epilogue_kernel(Ho, Wo, Pp, identity, H=None, W=None):
    """out = relu(bn2(conv2) + shortcut) with the gc2 gate folded into the
    scale/bias (valid because gc2 > 0)."""
    if identity:
        def kernel(c2_ref, x_ref, s2_ref, b2_ref, g2_ref, o_ref):
            s2 = s2_ref[...].reshape(1, 1, Pp)
            b2 = b2_ref[...].reshape(1, 1, Pp)
            g2 = g2_ref[...].reshape(1, 1, Pp)
            y = c2_ref[0].astype(jnp.float32) * s2 + b2
            sc = x_ref[0, 1:H + 1, 1:W + 1, :].astype(jnp.float32) * g2
            o_ref[0] = jnp.maximum(y + sc, 0.0).astype(o_ref.dtype)
    else:
        def kernel(c2_ref, sc_ref, s2_ref, b2_ref, ssc_ref, bsc_ref, o_ref):
            s2 = s2_ref[...].reshape(1, 1, Pp)
            b2 = b2_ref[...].reshape(1, 1, Pp)
            ssc = ssc_ref[...].reshape(1, 1, Pp)
            bsc = bsc_ref[...].reshape(1, 1, Pp)
            y = c2_ref[0].astype(jnp.float32) * s2 + b2
            sc = sc_ref[0].astype(jnp.float32) * ssc + bsc
            o_ref[0] = jnp.maximum(y + sc, 0.0).astype(o_ref.dtype)
    return kernel


# --------------------------- pallas_call wrappers ----------------------------

def _cparams():
    return pltpu.CompilerParams(dimension_semantics=("parallel",),
                                vmem_limit_bytes=VMEM_LIMIT)


def _conv3x3_stats(xpad, w_taps, Ho, Wo, stride):
    """xpad: (N, H+2, W+2, Cp) bf16, w_taps: (9, Cp, Pp) bf16."""
    N, Hp2, Wp2, Cp = xpad.shape
    Pp = w_taps.shape[-1]
    ce = pl.CostEstimate(flops=2 * N * Ho * Wo * 9 * Cp * Pp, transcendentals=0,
                         bytes_accessed=(xpad.size * 2 + w_taps.size * 2
                                         + N * Ho * Wo * Pp * 2 + N * 2 * Pp * 4))
    return pl.pallas_call(
        _make_conv3x3_kernel(Ho, Wo, Cp, Pp, stride),
        grid=(N,),
        in_specs=[pl.BlockSpec((1, Hp2, Wp2, Cp), lambda n: (n, 0, 0, 0)),
                  pl.BlockSpec((9, Cp, Pp), lambda n: (0, 0, 0))],
        out_specs=[pl.BlockSpec((1, Ho, Wo, Pp), lambda n: (n, 0, 0, 0)),
                   pl.BlockSpec((1, 2, Pp), lambda n: (n, 0, 0))],
        out_shape=[jax.ShapeDtypeStruct((N, Ho, Wo, Pp), jnp.bfloat16),
                   jax.ShapeDtypeStruct((N, 2, Pp), jnp.float32)],
        scratch_shapes=[pltpu.VMEM((Ho * Wo, Pp), jnp.float32)],
        compiler_params=_cparams(),
        cost_estimate=ce,
    )(xpad, w_taps)


def _conv2_fused_stats(conv1, scale1, bias1, w_taps):
    N, Ho, Wo, Pp = conv1.shape
    ce = pl.CostEstimate(flops=2 * N * Ho * Wo * 9 * Pp * Pp, transcendentals=0,
                         bytes_accessed=(conv1.size * 2 + w_taps.size * 2
                                         + N * Ho * Wo * Pp * 2 + N * 2 * Pp * 4))
    return pl.pallas_call(
        _make_conv2_fused_kernel(Ho, Wo, Pp),
        grid=(N,),
        in_specs=[pl.BlockSpec((1, Ho, Wo, Pp), lambda n: (n, 0, 0, 0)),
                  pl.BlockSpec((1, Pp), lambda n: (0, 0)),
                  pl.BlockSpec((1, Pp), lambda n: (0, 0)),
                  pl.BlockSpec((9, Pp, Pp), lambda n: (0, 0, 0))],
        out_specs=[pl.BlockSpec((1, Ho, Wo, Pp), lambda n: (n, 0, 0, 0)),
                   pl.BlockSpec((1, 2, Pp), lambda n: (n, 0, 0))],
        out_shape=[jax.ShapeDtypeStruct((N, Ho, Wo, Pp), jnp.bfloat16),
                   jax.ShapeDtypeStruct((N, 2, Pp), jnp.float32)],
        scratch_shapes=[pltpu.VMEM((Ho + 2, Wo + 2, Pp), jnp.bfloat16),
                        pltpu.VMEM((Ho * Wo, Pp), jnp.float32)],
        compiler_params=_cparams(),
        cost_estimate=ce,
    )(conv1, scale1, bias1, w_taps)


def _conv1x1_stats(xpad, w, H, W, Ho, Wo, stride):
    N, Hp2, Wp2, Cp = xpad.shape
    Pp = w.shape[-1]
    return pl.pallas_call(
        _make_conv1x1_kernel(H, W, Ho, Wo, Cp, Pp, stride),
        grid=(N,),
        in_specs=[pl.BlockSpec((1, Hp2, Wp2, Cp), lambda n: (n, 0, 0, 0)),
                  pl.BlockSpec((Cp, Pp), lambda n: (0, 0))],
        out_specs=[pl.BlockSpec((1, Ho, Wo, Pp), lambda n: (n, 0, 0, 0)),
                   pl.BlockSpec((1, 2, Pp), lambda n: (n, 0, 0))],
        out_shape=[jax.ShapeDtypeStruct((N, Ho, Wo, Pp), jnp.bfloat16),
                   jax.ShapeDtypeStruct((N, 2, Pp), jnp.float32)],
        compiler_params=_cparams(),
    )(xpad, w)


def _epilogue_identity(conv2, xpad, scale2, bias2, gate2):
    N, Ho, Wo, Pp = conv2.shape
    _, Hp2, Wp2, _ = xpad.shape
    H, W = Hp2 - 2, Wp2 - 2
    return pl.pallas_call(
        _make_epilogue_kernel(Ho, Wo, Pp, identity=True, H=H, W=W),
        grid=(N,),
        in_specs=[pl.BlockSpec((1, Ho, Wo, Pp), lambda n: (n, 0, 0, 0)),
                  pl.BlockSpec((1, Hp2, Wp2, Pp), lambda n: (n, 0, 0, 0)),
                  pl.BlockSpec((1, Pp), lambda n: (0, 0)),
                  pl.BlockSpec((1, Pp), lambda n: (0, 0)),
                  pl.BlockSpec((1, Pp), lambda n: (0, 0))],
        out_specs=pl.BlockSpec((1, Ho, Wo, Pp), lambda n: (n, 0, 0, 0)),
        out_shape=jax.ShapeDtypeStruct((N, Ho, Wo, Pp), jnp.float32),
        compiler_params=_cparams(),
    )(conv2, xpad, scale2, bias2, gate2)


def _epilogue_conv_sc(conv2, sc, scale2, bias2, scale_sc, bias_sc):
    N, Ho, Wo, Pp = conv2.shape
    return pl.pallas_call(
        _make_epilogue_kernel(Ho, Wo, Pp, identity=False),
        grid=(N,),
        in_specs=[pl.BlockSpec((1, Ho, Wo, Pp), lambda n: (n, 0, 0, 0)),
                  pl.BlockSpec((1, Ho, Wo, Pp), lambda n: (n, 0, 0, 0)),
                  pl.BlockSpec((1, Pp), lambda n: (0, 0)),
                  pl.BlockSpec((1, Pp), lambda n: (0, 0)),
                  pl.BlockSpec((1, Pp), lambda n: (0, 0)),
                  pl.BlockSpec((1, Pp), lambda n: (0, 0))],
        out_specs=pl.BlockSpec((1, Ho, Wo, Pp), lambda n: (n, 0, 0, 0)),
        out_shape=jax.ShapeDtypeStruct((N, Ho, Wo, Pp), jnp.float32),
        compiler_params=_cparams(),
    )(conv2, sc, scale2, bias2, scale_sc, bias_sc)


# ------------------------------ JAX glue -------------------------------------

def _round_up(x, m):
    return ((x + m - 1) // m) * m


def _pad_axis(x, axis, target):
    if target <= x.shape[axis]:
        return x
    pad = [(0, 0)] * x.ndim
    pad[axis] = (0, target - x.shape[axis])
    return jnp.pad(x, pad)


def _bn_scale_bias(stats, m_real, gamma_p, beta_p, gate_p):
    """Reduce per-image (sum, sum_sq) partials -> training-mode BN (biased var)
    scale/bias with the sigmoid channel gate folded in.
    NOTE: var = E[x^2] - E[x]^2 in f32 (no padded rows enter the stats).
    TODO(synk): use centered/Welford partials for very large N*H*W reductions."""
    tot = jnp.sum(stats[:, 0, :], axis=0)
    tot_sq = jnp.sum(stats[:, 1, :], axis=0)
    mean = tot / m_real
    var = jnp.maximum(tot_sq / m_real - mean * mean, 0.0)
    inv = jax.lax.rsqrt(var + EPS)
    scale = gamma_p * inv * gate_p
    bias = (beta_p - mean * gamma_p * inv) * gate_p
    return scale.reshape(1, -1), bias.reshape(1, -1)


class BasicBlockPallas:
    expansion = 1

    def __init__(self, in_planes, planes, stride=1, pooling=False,
                 total_task=3, key=None):
        self.in_planes = in_planes
        self.planes = planes
        self.stride = stride
        self.pooling = pooling
        self.total_task = total_task
        self.identity_shortcut = (stride == 1 and in_planes == self.expansion * planes)

        P, Cin = planes, in_planes
        self.cin_pad = Cp = _round_up(Cin, LANE)
        self.planes_pad = Pp = _round_up(P, LANE)

        keys = jax.random.split(key, 12)
        # conv weights in PyTorch layout (Cout, Cin, kh, kw), deterministic init
        w1 = 0.1 * jax.random.normal(keys[0], (P, Cin, 3, 3), jnp.float32)
        w2 = 0.1 * jax.random.normal(keys[1], (P, P, 3, 3), jnp.float32)
        # per-tap (9, Cin, Cout) bf16 weights (kh-major tap order, matching TAPS)
        w1t = jnp.transpose(w1, (2, 3, 1, 0)).reshape(9, Cin, P)
        self.w1_taps = _pad_axis(_pad_axis(w1t, 1, Cp), 2, Pp).astype(jnp.bfloat16)
        w2p = jnp.pad(w2, ((0, Pp - P), (0, Pp - P), (0, 0), (0, 0)))
        self.w2_taps = jnp.transpose(w2p, (2, 3, 1, 0)).reshape(9, Pp, Pp).astype(jnp.bfloat16)

        # per-task BN affine params (T, P) and zero-padded (T, Pp) versions
        self.gamma1 = 1.0 + 0.1 * jax.random.normal(keys[2], (total_task, P), jnp.float32)
        self.beta1 = 0.1 * jax.random.normal(keys[3], (total_task, P), jnp.float32)
        self.gamma2 = 1.0 + 0.1 * jax.random.normal(keys[4], (total_task, P), jnp.float32)
        self.beta2 = 0.1 * jax.random.normal(keys[5], (total_task, P), jnp.float32)
        self.gamma1p = _pad_axis(self.gamma1, 1, Pp)
        self.beta1p = _pad_axis(self.beta1, 1, Pp)
        self.gamma2p = _pad_axis(self.gamma2, 1, Pp)
        self.beta2p = _pad_axis(self.beta2, 1, Pp)
        # per-task gate embeddings ec1/ec2 ~ randn(1, planes)
        self.ec1 = jax.random.normal(keys[6], (total_task, 1, P), jnp.float32)
        self.ec2 = jax.random.normal(keys[7], (total_task, 1, P), jnp.float32)

        if not self.identity_shortcut:
            wsc = 0.1 * jax.random.normal(keys[8], (P * self.expansion, Cin, 1, 1), jnp.float32)
            wscf = jnp.transpose(wsc[:, :, 0, 0])                  # (Cin, P)
            self.wsc = _pad_axis(_pad_axis(wscf, 0, Cp), 1, Pp).astype(jnp.bfloat16)
            self.gammasc = 1.0 + 0.1 * jax.random.normal(keys[9], (total_task, P), jnp.float32)
            self.betasc = 0.1 * jax.random.normal(keys[10], (total_task, P), jnp.float32)
            self.gammascp = _pad_axis(self.gammasc, 1, Pp)
            self.betascp = _pad_axis(self.betasc, 1, Pp)

    def mask(self, t, s=1.0):
        gc1 = jax.nn.sigmoid(s * self.ec1[t])
        gc2 = jax.nn.sigmoid(s * self.ec2[t])
        return [gc1, gc2]

    def forward(self, t, x_nchw, msk, s):
        gc1, gc2 = self.mask(t, s=s)
        msk.append([gc1, gc2])

        P, Pp, Cp = self.planes, self.planes_pad, self.cin_pad
        stride = self.stride
        N, Cin, H, W = x_nchw.shape
        Ho = (H + 2 - 3) // stride + 1
        Wo = (W + 2 - 3) // stride + 1
        M = N * Ho * Wo

        gate1_p = _pad_axis(gc1.reshape(-1), 0, Pp)
        gate2_p = _pad_axis(gc2.reshape(-1), 0, Pp)

        # NCHW -> NHWC, cast to bf16 BEFORE padding; pad channels to a lane
        # multiple and spatial dims by the 3x3-conv halo (single small XLA copy).
        x = jnp.transpose(x_nchw, (0, 2, 3, 1)).astype(jnp.bfloat16)
        xpad = jnp.pad(x, ((0, 0), (1, 1), (1, 1), (0, Cp - Cin)))

        # ---- conv1 (3x3, stride) + per-channel stats (in-kernel halo) ----
        conv1, stats1 = _conv3x3_stats(xpad, self.w1_taps, Ho, Wo, stride)
        scale1, bias1 = _bn_scale_bias(stats1, M, self.gamma1p[t], self.beta1p[t], gate1_p)

        # ---- conv2 (3x3, stride 1) with bn1 + ReLU + gc1 fused as prologue ----
        conv2, stats2 = _conv2_fused_stats(conv1, scale1, bias1, self.w2_taps)
        scale2, bias2 = _bn_scale_bias(stats2, M, self.gamma2p[t], self.beta2p[t], gate2_p)

        # ---- shortcut + bn2 + ReLU epilogue (gc2 folded into scale/bias) ----
        if self.identity_shortcut:
            out = _epilogue_identity(conv2, xpad, scale2, bias2,
                                     gate2_p.reshape(1, Pp))
        else:
            sc, stats_sc = _conv1x1_stats(xpad, self.wsc, H, W, Ho, Wo, stride)
            scale_sc, bias_sc = _bn_scale_bias(stats_sc, M, self.gammascp[t],
                                               self.betascp[t], gate2_p)
            out = _epilogue_conv_sc(conv2, sc, scale2, bias2, scale_sc, bias_sc)

        if self.pooling:
            # F.avg_pool2d(out, 4); the per-channel gate (already folded) commutes
            # with average pooling.  TODO(synk): fuse into the epilogue kernel.
            out = jax.lax.reduce_window(out, 0.0, jax.lax.add,
                                        (1, 4, 4, 1), (1, 4, 4, 1), 'VALID') / 16.0

        out_nchw = jnp.transpose(out[:, :, :, :P], (0, 3, 1, 2))   # NHWC -> NCHW
        return (t, out_nchw, msk, s)


# --------------------------------- demo --------------------------------------

if __name__ == "__main__":
    key = jax.random.PRNGKey(0)
    kx, kp1, kp2 = jax.random.split(key, 3)

    # small shapes: batch=2, in_planes=4, planes=8, spatial=16, 3 tasks
    N, CIN, H, W = 2, 4, 16, 16
    PLANES, TOTAL_TASK = 8, 3
    x = jax.random.normal(kx, (N, CIN, H, W), jnp.float32)   # PyTorch-style NCHW

    # conv-shortcut path (in_planes != planes)
    block = BasicBlockPallas(in_planes=CIN, planes=PLANES, stride=1,
                             pooling=False, total_task=TOTAL_TASK, key=kp1)
    t, s = 1, 4.0
    msk = []
    t_out, out, msk, s_out = block.forward(t, x, msk, s)
    out = jax.block_until_ready(out)
    assert out.shape == (N, PLANES, H, W), out.shape
    assert len(msk) == 1 and msk[0][0].shape == (1, PLANES)
    assert bool(jnp.all(jnp.isfinite(out)))
    assert bool(jnp.all(out >= 0.0))          # output of a gated ReLU

    # identity-shortcut path (in_planes == planes, stride 1)
    x2 = jax.random.normal(kx, (N, PLANES, H, W), jnp.float32)
    block2 = BasicBlockPallas(in_planes=PLANES, planes=PLANES, stride=1,
                              pooling=False, total_task=TOTAL_TASK, key=kp2)
    msk2 = []
    _, out2, msk2, _ = block2.forward(0, x2, msk2, 2.0)
    out2 = jax.block_until_ready(out2)
    assert out2.shape == (N, PLANES, H, W), out2.shape
    assert bool(jnp.all(jnp.isfinite(out2)))

    print("KERNEL_OK")
</pallas_src>

<mosaic_0001>
module attributes {stable_mosaic.version = 11 : i64} {
  func.func @kernel(%arg0: i32, %arg1: memref<1x18x18x128xbf16, #tpu.memory_space<vmem>>, %arg2: memref<9x128x128xbf16, #tpu.memory_space<vmem>>, %arg3: memref<1x16x16x128xbf16, #tpu.memory_space<vmem>>, %arg4: memref<1x2x128xf32, #tpu.memory_space<vmem>>, %arg5: memref<256x128xf32, #tpu.memory_space<vmem>>) attributes {dimension_semantics = [#tpu.dimension_semantics<parallel>], iteration_bounds = array<i64: 2>, scalar_prefetch = 0 : i64, scratch_operands = 1 : i64, tpu.core_type = #tpu.core_type<tc>, window_params = [{transform_indices = @transform_0, window_bounds = array<i64: 1, 18, 18, 128>}, {pipeline_mode = #tpu.pipeline_mode<synchronous>, transform_indices = @transform_1, window_bounds = array<i64: 9, 128, 128>}, {transform_indices = @transform_2, window_bounds = array<i64: 1, 16, 16, 128>}, {transform_indices = @transform_3, window_bounds = array<i64: 1, 2, 128>}]} {
    %cst = arith.constant 0.000000e+00 : f32
    %0 = vector.broadcast %cst : f32 to vector<256x128xf32>
    %c0 = arith.constant 0 : index
    %c0_0 = arith.constant 0 : index
    %1 = vector.load %arg5[%c0, %c0_0] : memref<256x128xf32, #tpu.memory_space<vmem>>, vector<256x128xf32>
    tpu.vector_store %arg5[%c0, %c0_0], %0 {strides = array<i32>} : memref<256x128xf32, #tpu.memory_space<vmem>>, vector<256x128xf32>,
    %c0_1 = arith.constant 0 : index
    %c0_2 = arith.constant 0 : index
    %c0_3 = arith.constant 0 : index
    %c0_4 = arith.constant 0 : index
    %2 = vector.load %arg1[%c0_1, %c0_2, %c0_3, %c0_4] : memref<1x18x18x128xbf16, #tpu.memory_space<vmem>>, vector<1x16x16x128xbf16>
    %3 = vector.shape_cast %2 : vector<1x16x16x128xbf16> to vector<16x16x128xbf16>
    %c0_5 = arith.constant 0 : index
    %c0_6 = arith.constant 0 : index
    %4 = vector.load %arg5[%c0_5, %c0_6] : memref<256x128xf32, #tpu.memory_space<vmem>>, vector<256x128xf32>
    %5 = vector.shape_cast %3 : vector<16x16x128xbf16> to vector<256x128xbf16>
    %c0_7 = arith.constant 0 : index
    %c0_8 = arith.constant 0 : index
    %c0_9 = arith.constant 0 : index
    %6 = vector.load %arg2[%c0_7, %c0_8, %c0_9] : memref<9x128x128xbf16, #tpu.memory_space<vmem>>, vector<1x128x128xbf16>
    %7 = vector.shape_cast %6 : vector<1x128x128xbf16> to vector<128x128xbf16>
    %cst_10 = arith.constant dense<0.000000e+00> : vector<256x128xf32>
    %8 = tpu.matmul %5, %7, %cst_10 {dimension_numbers = #tpu.dot_dimension_numbers<[1], [0], [0], [1], [0, 0, 1, 1], [], []>} : vector<256x128xbf16>, vector<128x128xbf16>, vector<256x128xf32> -> vector<256x128xf32>
    %9 = arith.addf %4, %8 : vector<256x128xf32>
    %c0_11 = arith.constant 0 : index
    %c0_12 = arith.constant 0 : index
    %10 = vector.load %arg5[%c0_11, %c0_12] : memref<256x128xf32, #tpu.memory_space<vmem>>, vector<256x128xf32>
    tpu.vector_store %arg5[%c0_11, %c0_12], %9 {strides = array<i32>} : memref<256x128xf32, #tpu.memory_space<vmem>>, vector<256x128xf32>,
    %c0_13 = arith.constant 0 : index
    %c0_14 = arith.constant 0 : index
    %c1 = arith.constant 1 : index
    %c0_15 = arith.constant 0 : index
    %11 = vector.load %arg1[%c0_13, %c0_14, %c1, %c0_15] : memref<1x18x18x128xbf16, #tpu.memory_space<vmem>>, vector<1x16x16x128xbf16>
    %12 = vector.shape_cast %11 : vector<1x16x16x128xbf16> to vector<16x16x128xbf16>
    %c0_16 = arith.constant 0 : index
    %c0_17 = arith.constant 0 : index
    %13 = vector.load %arg5[%c0_16, %c0_17] : memref<256x128xf32, #tpu.memory_space<vmem>>, vector<256x128xf32>
    %14 = vector.shape_cast %12 : vector<16x16x128xbf16> to vector<256x128xbf16>
    %c1_18 = arith.constant 1 : index
    %c0_19 = arith.constant 0 : index
    %c0_20 = arith.constant 0 : index
    %15 = vector.load %arg2[%c1_18, %c0_19, %c0_20] : memref<9x128x128xbf16, #tpu.memory_space<vmem>>, vector<1x128x128xbf16>
    %16 = vector.shape_cast %15 : vector<1x128x128xbf16> to vector<128x128xbf16>
    %cst_21 = arith.constant dense<0.000000e+00> : vector<256x128xf32>
    %17 = tpu.matmul %14, %16, %cst_21 {dimension_numbers = #tpu.dot_dimension_numbers<[1], [0], [0], [1], [0, 0, 1, 1], [], []>} : vector<256x128xbf16>, vector<128x128xbf16>, vector<256x128xf32> -> vector<256x128xf32>
    %18 = arith.addf %13, %17 : vector<256x128xf32>
    %c0_22 = arith.constant 0 : index
    %c0_23 = arith.constant 0 : index
    %19 = vector.load %arg5[%c0_22, %c0_23] : memref<256x128xf32, #tpu.memory_space<vmem>>, vector<256x128xf32>
    tpu.vector_store %arg5[%c0_22, %c0_23], %18 {strides = array<i32>} : memref<256x128xf32, #tpu.memory_space<vmem>>, vector<256x128xf32>,
    %c0_24 = arith.constant 0 : index
    %c0_25 = arith.constant 0 : index
    %c2 = arith.constant 2 : index
    %c0_26 = arith.constant 0 : index
    %20 = vector.load %arg1[%c0_24, %c0_25, %c2, %c0_26] : memref<1x18x18x128xbf16, #tpu.memory_space<vmem>>, vector<1x16x16x128xbf16>
    %21 = vector.shape_cast %20 : vector<1x16x16x128xbf16> to vector<16x16x128xbf16>
    %c0_27 = arith.constant 0 : index
    %c0_28 = arith.constant 0 : index
    %22 = vector.load %arg5[%c0_27, %c0_28] : memref<256x128xf32, #tpu.memory_space<vmem>>, vector<256x128xf32>
    %23 = vector.shape_cast %21 : vector<16x16x128xbf16> to vector<256x128xbf16>
    %c2_29 = arith.constant 2 : index
    %c0_30 = arith.constant 0 : index
    %c0_31 = arith.constant 0 : index
    %24 = vector.load %arg2[%c2_29, %c0_30, %c0_31] : memref<9x128x128xbf16, #tpu.memory_space<vmem>>, vector<1x128x128xbf16>
    %25 = vector.shape_cast %24 : vector<1x128x128xbf16> to vector<128x128xbf16>
    %cst_32 = arith.constant dense<0.000000e+00> : vector<256x128xf32>
    %26 = tpu.matmul %23, %25, %cst_32 {dimension_numbers = #tpu.dot_dimension_numbers<[1], [0], [0], [1], [0, 0, 1, 1], [], []>} : vector<256x128xbf16>, vector<128x128xbf16>, vector<256x128xf32> -> vector<256x128xf32>
    %27 = arith.addf %22, %26 : vector<256x128xf32>
    %c0_33 = arith.constant 0 : index
    %c0_34 = arith.constant 0 : index
    %28 = vector.load %arg5[%c0_33, %c0_34] : memref<256x128xf32, #tpu.memory_space<vmem>>, vector<256x128xf32>
    tpu.vector_store %arg5[%c0_33, %c0_34], %27 {strides = array<i32>} : memref<256x128xf32, #tpu.memory_space<vmem>>, vector<256x128xf32>,
    %c0_35 = arith.constant 0 : index
    %c1_36 = arith.constant 1 : index
    %c0_37 = arith.constant 0 : index
    %c0_38 = arith.constant 0 : index
    %29 = vector.load %arg1[%c0_35, %c1_36, %c0_37, %c0_38] : memref<1x18x18x128xbf16, #tpu.memory_space<vmem>>, vector<1x16x16x128xbf16>
    %30 = vector.shape_cast %29 : vector<1x16x16x128xbf16> to vector<16x16x128xbf16>
    %c0_39 = arith.constant 0 : index
    %c0_40 = arith.constant 0 : index
    %31 = vector.load %arg5[%c0_39, %c0_40] : memref<256x128xf32, #tpu.memory_space<vmem>>, vector<256x128xf32>
    %32 = vector.shape_cast %30 : vector<16x16x128xbf16> to vector<256x128xbf16>
    %c3 = arith.constant 3 : index
    %c0_41 = arith.constant 0 : index
    %c0_42 = arith.constant 0 : index
    %33 = vector.load %arg2[%c3, %c0_41, %c0_42] : memref<9x128x128xbf16, #tpu.memory_space<vmem>>, vector<1x128x128xbf16>
    %34 = vector.shape_cast %33 : vector<1x128x128xbf16> to vector<128x128xbf16>
    %cst_43 = arith.constant dense<0.000000e+00> : vector<256x128xf32>
    %35 = tpu.matmul %32, %34, %cst_43 {dimension_numbers = #tpu.dot_dimension_numbers<[1], [0], [0], [1], [0, 0, 1, 1], [], []>} : vector<256x128xbf16>, vector<128x128xbf16>, vector<256x128xf32> -> vector<256x128xf32>
    %36 = arith.addf %31, %35 : vector<256x128xf32>
    %c0_44 = arith.constant 0 : index
    %c0_45 = arith.constant 0 : index
    %37 = vector.load %arg5[%c0_44, %c0_45] : memref<256x128xf32, #tpu.memory_space<vmem>>, vector<256x128xf32>
    tpu.vector_store %arg5[%c0_44, %c0_45], %36 {strides = array<i32>} : memref<256x128xf32, #tpu.memory_space<vmem>>, vector<256x128xf32>,
    %c0_46 = arith.constant 0 : index
    %c1_47 = arith.constant 1 : index
    %c1_48 = arith.constant 1 : index
    %c0_49 = arith.constant 0 : index
    %38 = vector.load %arg1[%c0_46, %c1_47, %c1_48, %c0_49] : memref<1x18x18x128xbf16, #tpu.memory_space<vmem>>, vector<1x16x16x128xbf16>
    %39 = vector.shape_cast %38 : vector<1x16x16x128xbf16> to vector<16x16x128xbf16>
    %c0_50 = arith.constant 0 : index
    %c0_51 = arith.constant 0 : index
    %40 = vector.load %arg5[%c0_50, %c0_51] : memref<256x128xf32, #tpu.memory_space<vmem>>, vector<256x128xf32>
    %41 = vector.shape_cast %39 : vector<16x16x128xbf16> to vector<256x128xbf16>
    %c4 = arith.constant 4 : index
    %c0_52 = arith.constant 0 : index
    %c0_53 = arith.constant 0 : index
    %42 = vector.load %arg2[%c4, %c0_52, %c0_53] : memref<9x128x128xbf16, #tpu.memory_space<vmem>>, vector<1x128x128xbf16>
    %43 = vector.shape_cast %42 : vector<1x128x128xbf16> to vector<128x128xbf16>
    %cst_54 = arith.constant dense<0.000000e+00> : vector<256x128xf32>
    %44 = tpu.matmul %41, %43, %cst_54 {dimension_numbers = #tpu.dot_dimension_numbers<[1], [0], [0], [1], [0, 0, 1, 1], [], []>} : vector<256x128xbf16>, vector<128x128xbf16>, vector<256x128xf32> -> vector<256x128xf32>
    %45 = arith.addf %40, %44 : vector<256x128xf32>
    %c0_55 = arith.constant 0 : index
    %c0_56 = arith.constant 0 : index
    %46 = vector.load %arg5[%c0_55, %c0_56] : memref<256x128xf32, #tpu.memory_space<vmem>>, vector<256x128xf32>
    tpu.vector_store %arg5[%c0_55, %c0_56], %45 {strides = array<i32>} : memref<256x128xf32, #tpu.memory_space<vmem>>, vector<256x128xf32>,
    %c0_57 = arith.constant 0 : index
    %c1_58 = arith.constant 1 : index
    %c2_59 = arith.constant 2 : index
    %c0_60 = arith.constant 0 : index
    %47 = vector.load %arg1[%c0_57, %c1_58, %c2_59, %c0_60] : memref<1x18x18x128xbf16, #tpu.memory_space<vmem>>, vector<1x16x16x128xbf16>
    %48 = vector.shape_cast %47 : vector<1x16x16x128xbf16> to vector<16x16x128xbf16>
    %c0_61 = arith.constant 0 : index
    %c0_62 = arith.constant 0 : index
    %49 = vector.load %arg5[%c0_61, %c0_62] : memref<256x128xf32, #tpu.memory_space<vmem>>, vector<256x128xf32>
    %50 = vector.shape_cast %48 : vector<16x16x128xbf16> to vector<256x128xbf16>
    %c5 = arith.constant 5 : index
    %c0_63 = arith.constant 0 : index
    %c0_64 = arith.constant 0 : index
    %51 = vector.load %arg2[%c5, %c0_63, %c0_64] : memref<9x128x128xbf16, #tpu.memory_space<vmem>>, vector<1x128x128xbf16>
    %52 = vector.shape_cast %51 : vector<1x128x128xbf16> to vector<128x128xbf16>
    %cst_65 = arith.constant dense<0.000000e+00> : vector<256x128xf32>
    %53 = tpu.matmul %50, %52, %cst_65 {dimension_numbers = #tpu.dot_dimension_numbers<[1], [0], [0], [1], [0, 0, 1, 1], [], []>} : vector<256x128xbf16>, vector<128x128xbf16>, vector<256x128xf32> -> vector<256x128xf32>
    %54 = arith.addf %49, %53 : vector<256x128xf32>
    %c0_66 = arith.constant 0 : index
    %c0_67 = arith.constant 0 : index
    %55 = vector.load %arg5[%c0_66, %c0_67] : memref<256x128xf32, #tpu.memory_space<vmem>>, vector<256x128xf32>
    tpu.vector_store %arg5[%c0_66, %c0_67], %54 {strides = array<i32>} : memref<256x128xf32, #tpu.memory_space<vmem>>, vector<256x128xf32>,
    %c0_68 = arith.constant 0 : index
    %c2_69 = arith.constant 2 : index
    %c0_70 = arith.constant 0 : index
    %c0_71 = arith.constant 0 : index
    %56 = vector.load %arg1[%c0_68, %c2_69, %c0_70, %c0_71] : memref<1x18x18x128xbf16, #tpu.memory_space<vmem>>, vector<1x16x16x128xbf16>
    %57 = vector.shape_cast %56 : vector<1x16x16x128xbf16> to vector<16x16x128xbf16>
    %c0_72 = arith.constant 0 : index
    %c0_73 = arith.constant 0 : index
    %58 = vector.load %arg5[%c0_72, %c0_73] : memref<256x128xf32, #tpu.memory_space<vmem>>, vector<256x128xf32>
    %59 = vector.shape_cast %57 : vector<16x16x128xbf16> to vector<256x128xbf16>
    %c6 = arith.constant 6 : index
    %c0_74 = arith.constant 0 : index
    %c0_75 = arith.constant 0 : index
    %60 = vector.load %arg2[%c6, %c0_74, %c0_75] : memref<9x128x128xbf16, #tpu.memory_space<vmem>>, vector<1x128x128xbf16>
    %61 = vector.shape_cast %60 : vector<1x128x128xbf16> to vector<128x128xbf16>
    %cst_76 = arith.constant dense<0.000000e+00> : vector<256x128xf32>
    %62 = tpu.matmul %59, %61, %cst_76 {dimension_numbers = #tpu.dot_dimension_numbers<[1], [0], [0], [1], [0, 0, 1, 1], [], []>} : vector<256x128xbf16>, vector<128x128xbf16>, vector<256x128xf32> -> vector<256x128xf32>
    %63 = arith.addf %58, %62 : vector<256x128xf32>
    %c0_77 = arith.constant 0 : index
    %c0_78 = arith.constant 0 : index
    %64 = vector.load %arg5[%c0_77, %c0_78] : memref<256x128xf32, #tpu.memory_space<vmem>>, vector<256x128xf32>
    tpu.vector_store %arg5[%c0_77, %c0_78], %63 {strides = array<i32>} : memref<256x128xf32, #tpu.memory_space<vmem>>, vector<256x128xf32>,
    %c0_79 = arith.constant 0 : index
    %c2_80 = arith.constant 2 : index
    %c1_81 = arith.constant 1 : index
    %c0_82 = arith.constant 0 : index
    %65 = vector.load %arg1[%c0_79, %c2_80, %c1_81, %c0_82] : memref<1x18x18x128xbf16, #tpu.memory_space<vmem>>, vector<1x16x16x128xbf16>
    %66 = vector.shape_cast %65 : vector<1x16x16x128xbf16> to vector<16x16x128xbf16>
    %c0_83 = arith.constant 0 : index
    %c0_84 = arith.constant 0 : index
    %67 = vector.load %arg5[%c0_83, %c0_84] : memref<256x128xf32, #tpu.memory_space<vmem>>, vector<256x128xf32>
    %68 = vector.shape_cast %66 : vector<16x16x128xbf16> to vector<256x128xbf16>
    %c7 = arith.constant 7 : index
    %c0_85 = arith.constant 0 : index
    %c0_86 = arith.constant 0 : index
    %69 = vector.load %arg2[%c7, %c0_85, %c0_86] : memref<9x128x128xbf16, #tpu.memory_space<vmem>>, vector<1x128x128xbf16>
    %70 = vector.shape_cast %69 : vector<1x128x128xbf16> to vector<128x128xbf16>
    %cst_87 = arith.constant dense<0.000000e+00> : vector<256x128xf32>
    %71 = tpu.matmul %68, %70, %cst_87 {dimension_numbers = #tpu.dot_dimension_numbers<[1], [0], [0], [1], [0, 0, 1, 1], [], []>} : vector<256x128xbf16>, vector<128x128xbf16>, vector<256x128xf32> -> vector<256x128xf32>
    %72 = arith.addf %67, %71 : vector<256x128xf32>
    %c0_88 = arith.constant 0 : index
    %c0_89 = arith.constant 0 : index
    %73 = vector.load %arg5[%c0_88, %c0_89] : memref<256x128xf32, #tpu.memory_space<vmem>>, vector<256x128xf32>
    tpu.vector_store %arg5[%c0_88, %c0_89], %72 {strides = array<i32>} : memref<256x128xf32, #tpu.memory_space<vmem>>, vector<256x128xf32>,
    %c0_90 = arith.constant 0 : index
    %c2_91 = arith.constant 2 : index
    %c2_92 = arith.constant 2 : index
    %c0_93 = arith.constant 0 : index
    %74 = vector.load %arg1[%c0_90, %c2_91, %c2_92, %c0_93] : memref<1x18x18x128xbf16, #tpu.memory_space<vmem>>, vector<1x16x16x128xbf16>
    %75 = vector.shape_cast %74 : vector<1x16x16x128xbf16> to vector<16x16x128xbf16>
    %c0_94 = arith.constant 0 : index
    %c0_95 = arith.constant 0 : index
    %76 = vector.load %arg5[%c0_94, %c0_95] : memref<256x128xf32, #tpu.memory_space<vmem>>, vector<256x128xf32>
    %77 = vector.shape_cast %75 : vector<16x16x128xbf16> to vector<256x128xbf16>
    %c8 = arith.constant 8 : index
    %c0_96 = arith.constant 0 : index
    %c0_97 = arith.constant 0 : index
    %78 = vector.load %arg2[%c8, %c0_96, %c0_97] : memref<9x128x128xbf16, #tpu.memory_space<vmem>>, vector<1x128x128xbf16>
    %79 = vector.shape_cast %78 : vector<1x128x128xbf16> to vector<128x128xbf16>
    %cst_98 = arith.constant dense<0.000000e+00> : vector<256x128xf32>
    %80 = tpu.matmul %77, %79, %cst_98 {dimension_numbers = #tpu.dot_dimension_numbers<[1], [0], [0], [1], [0, 0, 1, 1], [], []>} : vector<256x128xbf16>, vector<128x128xbf16>, vector<256x128xf32> -> vector<256x128xf32>
    %81 = arith.addf %76, %80 : vector<256x128xf32>
    %c0_99 = arith.constant 0 : index
    %c0_100 = arith.constant 0 : index
    %82 = vector.load %arg5[%c0_99, %c0_100] : memref<256x128xf32, #tpu.memory_space<vmem>>, vector<256x128xf32>
    tpu.vector_store %arg5[%c0_99, %c0_100], %81 {strides = array<i32>} : memref<256x128xf32, #tpu.memory_space<vmem>>, vector<256x128xf32>,
    %c0_101 = arith.constant 0 : index
    %c0_102 = arith.constant 0 : index
    %83 = vector.load %arg5[%c0_101, %c0_102] : memref<256x128xf32, #tpu.memory_space<vmem>>, vector<256x128xf32>
    %84 = vector.shape_cast %83 : vector<256x128xf32> to vector<16x16x128xf32>
    %85 = arith.truncf %84 : vector<16x16x128xf32> to vector<16x16x128xbf16>
    %c0_103 = arith.constant 0 : index
    %c0_104 = arith.constant 0 : index
    %c0_105 = arith.constant 0 : index
    %c0_106 = arith.constant 0 : index
    %86 = vector.load %arg3[%c0_103, %c0_104, %c0_105, %c0_106] : memref<1x16x16x128xbf16, #tpu.memory_space<vmem>>, vector<1x16x16x128xbf16>
    %87 = vector.shape_cast %86 : vector<1x16x16x128xbf16> to vector<16x16x128xbf16>
    %88 = vector.shape_cast %85 : vector<16x16x128xbf16> to vector<1x16x16x128xbf16>
    tpu.vector_store %arg3[%c0_103, %c0_104, %c0_105, %c0_106], %88 {strides = array<i32>} : memref<1x16x16x128xbf16, #tpu.memory_space<vmem>>, vector<1x16x16x128xbf16>,
    %cst_107 = arith.constant dense<0.000000e+00> : vector<128xf32>
    %89 = vector.multi_reduction <add>, %83, %cst_107 [0] : vector<256x128xf32> to vector<128xf32>
    %90 = vector.shape_cast %89 : vector<128xf32> to vector<1x128xf32>
    %c0_108 = arith.constant 0 : index
    %c0_109 = arith.constant 0 : index
    %c0_110 = arith.constant 0 : index
    %91 = vector.load %arg4[%c0_108, %c0_109, %c0_110] : memref<1x2x128xf32, #tpu.memory_space<vmem>>, vector<1x1x128xf32>
    %92 = vector.shape_cast %91 : vector<1x1x128xf32> to vector<1x128xf32>
    %93 = vector.shape_cast %90 : vector<1x128xf32> to vector<1x1x128xf32>
    tpu.vector_store %arg4[%c0_108, %c0_109, %c0_110], %93 {strides = array<i32>} : memref<1x2x128xf32, #tpu.memory_space<vmem>>, vector<1x1x128xf32>,
    %94 = arith.mulf %83, %83 : vector<256x128xf32>
    %cst_111 = arith.constant dense<0.000000e+00> : vector<128xf32>
    %95 = vector.multi_reduction <add>, %94, %cst_111 [0] : vector<256x128xf32> to vector<128xf32>
    %96 = vector.shape_cast %95 : vector<128xf32> to vector<1x128xf32>
    %c0_112 = arith.constant 0 : index
    %c1_113 = arith.constant 1 : index
    %c0_114 = arith.constant 0 : index
    %97 = vector.load %arg4[%c0_112, %c1_113, %c0_114] : memref<1x2x128xf32, #tpu.memory_space<vmem>>, vector<1x1x128xf32>
    %98 = vector.shape_cast %97 : vector<1x1x128xf32> to vector<1x128xf32>
    %99 = vector.shape_cast %96 : vector<1x128xf32> to vector<1x1x128xf32>
    tpu.vector_store %arg4[%c0_112, %c1_113, %c0_114], %99 {strides = array<i32>} : memref<1x2x128xf32, #tpu.memory_space<vmem>>, vector<1x1x128xf32>,
    return
  }
  func.func @transform_0(%arg0: i32) -> (i32, i32, i32, i32) {
    %c0_i32 = arith.constant 0 : i32
    %c0_i32_0 = arith.constant 0 : i32
    %c0_i32_1 = arith.constant 0 : i32
    %c0_i32_2 = arith.constant 0 : i32
    return %arg0, %c0_i32, %c0_i32_0, %c0_i32_1 : i32, i32, i32, i32
  }
  func.func @transform_1(%arg0: i32) -> (i32, i32, i32) {
    %c0_i32 = arith.constant 0 : i32
    %c0_i32_0 = arith.constant 0 : i32
    %c0_i32_1 = arith.constant 0 : i32
    %c0_i32_2 = arith.constant 0 : i32
    return %c0_i32, %c0_i32_0, %c0_i32_1 : i32, i32, i32
  }
  func.func @transform_2(%arg0: i32) -> (i32, i32, i32, i32) {
    %c0_i32 = arith.constant 0 : i32
    %c0_i32_0 = arith.constant 0 : i32
    %c0_i32_1 = arith.constant 0 : i32
    %c0_i32_2 = arith.constant 0 : i32
    return %arg0, %c0_i32, %c0_i32_0, %c0_i32_1 : i32, i32, i32, i32
  }
  func.func @transform_3(%arg0: i32) -> (i32, i32, i32) {
    %c0_i32 = arith.constant 0 : i32
    %c0_i32_0 = arith.constant 0 : i32
    %c0_i32_1 = arith.constant 0 : i32
    return %arg0, %c0_i32, %c0_i32_0 : i32, i32, i32
  }
}

</mosaic_0001>

<bundles_post_ra>
// kernel: tpu_custom_call.1
= control target key start
LH: loop header
LB: loop body
LE: loop exit
PB: predicated region body
PF: predicated region fallthrough
CT: control target
= control target key end

     0   :  { %9 = vsyncpa [#allocation4], 0  ;;  %s9515_s0 = inlined_call_operand.vmem [shape: bf16[2,18,18,128], index: 0, kind: input, shape index: {}]   ;;  %s9516_s1 = inlined_call_operand.vmem [shape: bf16[9,128,128], index: 1, kind: input, shape index: {}]   ;;  %s9517_s2 = inlined_call_operand.hbm [shape: bf16[2,16,16,128], index: 2, kind: output, shape index: {0}]   ;;  %s9518_s3 = inlined_call_operand.hbm [shape: f32[2,2,128], index: 3, kind: output, shape index: {1}]  }
   0x1   :  { %11 = vsyncpa [#allocation4 + $0x1], 0 }
   0x2   :  { %12 = vsyncpa [#allocation6], 0 }
   0x3   :  { %14 = vsyncpa [#allocation6 + $0x1], 0  ;;  %s8269_s12 = smov 0   ;;  %s8271_s13 = smov 0  }
   0x4   :  { %s8273_s14 = smov 0   ;;  %s8275_s15 = smov 0  }
   0x5 LB: > { %s8290_s16 = sadd.s32 4294967295, %s8243_s15   ;;  %s6232_s17 = sadd.s32 4294967294, %s8243_s15   ;;  %s8243_s15 = sphi %s8275_s15, %s9528_s15   ;;  %s8239_s14 = sphi %s8273_s14, %s9527_s14   ;;  %s8235_s13 = sphi %s8271_s13, %s9526_s13   ;;  %s8231_s12 = sphi %s8269_s12, %s9525_s12  }
   0x6   : > { %s8294_s18 = sadd.s32 1, %s8243_s15   ;;  %s74_s19 = sadd.s32 1, %s8239_s14 }
   0x7   : > { %s71_s20 = ssub.s32 %s8243_s15, %s8294_s18  ;;  %p84_p0 = scmp.ne.s32.totalorder %s8239_s14, %s8235_s13 }
   0x8   : > { %p72_p1 = scmp.eq.s32.totalorder %s71_s20, 0  ;;  %p85_p2 = scmp.eq.s32.totalorder %s8290_s16, 1 }
   0x9   : > { %p90_p3 = scmp.ne.s32.totalorder %s8235_s13, %s8231_s12  ;;  %p91_p4 = scmp.eq.s32.totalorder %s6232_s17, 1 }
   0xa   : > { %s8305_s21 = scalar_select %p72_p1, %s8239_s14, %s74_s19  }
   0xb   : > { %p8307_p5 = por %p85_p2, %p84_p0  ;;  %p8311_p6 = por %p91_p4, %p90_p3 }
   0xc   : > { %p6235_p7 = scmp.ge.s32.totalorder %s8243_s15, 1  ;;  %p146_p8 = scmp.lt.s32.totalorder %s8243_s15, 3 }
   0xe   : > { %p147_p9 = pnand %p6235_p7, %p146_p8 }
   0xf   : > { %v8021_v0 = vld [vmem:[%s9516_s1] sm:$0xff] (!%p147_p9)   ;;  %v8023_v2 = vld [vmem:[%s9516_s1 + $0x8] sm:$0xff] (!%p147_p9)   ;;  %p175_p10 = scmp.lt.s32.totalorder (!%p147_p9), %s8290_s16, 1  ;;  %v8025_v4 = vld [vmem:[%s9516_s1 + $0x10] sm:$0xff] (!%p147_p9)   ;;  %vm742_vm0 = vsmask.f32 (!%p147_p9), 3328 }
  0x10   : > { %150 = sbr.rel (%p147_p9) target bundleno = 605 (0x25d), region = 28  ;;  %v8022_v1 = vld [vmem:[%s9516_s1 + $0x100] sm:$0xff] (!%p147_p9)   ;;  %7270 = vmatprep.subr.bf16.mxu1 (!%p147_p9), %v8021_v0  ;;  %v8024_v3 = vld [vmem:[%s9516_s1 + $0x108] sm:$0xff] (!%p147_p9)   ;;  %v8026_v5 = vld [vmem:[%s9516_s1 + $0x110] sm:$0xff] (!%p147_p9)   ;;  %vm743_vm1 = vsmask.f32 (!%p147_p9), 7440 }
  0x11   : > { %7462 = vmatprep.subr.bf16.mxu0 (!%p147_p9), %v8022_v1  ;;  %7271 = vmatpush3.bf16.msra.mxu1 (!%p147_p9), %v8021_v0  ;;  %v8027_v6 = vld [vmem:[%s9516_s1 + $0x18] sm:$0xff] (!%p147_p9)   ;;  %v8029_v8 = vld [vmem:[%s9516_s1 + $0x20] sm:$0xff] (!%p147_p9)   ;;  %v8031_v10 = vld [vmem:[%s9516_s1 + $0x28] sm:$0xff] (!%p147_p9)   ;;  %vm1611_vm3 = vcmask (!%p147_p9), 1042432   ;;  %vm1612_vm4 = vcmask (!%p147_p9), 1046532   ;;  %s6958_s10 = sshll.u32 (!%p147_p9), %s8290_s16, 11 }
  0x12   : > { %7463 = vmatpush3.bf16.msra.mxu0 (!%p147_p9), %v8022_v1  ;;  %7272 = vmatprep.subr.bf16.mxu1 (!%p147_p9), %v8023_v2  ;;  %v8028_v7 = vld [vmem:[%s9516_s1 + $0x118] sm:$0xff] (!%p147_p9)   ;;  %v8030_v9 = vld [vmem:[%s9516_s1 + $0x120] sm:$0xff] (!%p147_p9)   ;;  %v8032_v11 = vld [vmem:[%s9516_s1 + $0x128] sm:$0xff] (!%p147_p9)   ;;  %s8245_s26 = smov (!%p147_p9), [#allocation3]  }
  0x13   : > { %7464 = vmatprep.subr.bf16.mxu0 (!%p147_p9), %v8024_v3  ;;  %v8033_v18 = vld [vmem:[%s9516_s1 + $0x30] sm:$0xff] (!%p147_p9)   ;;  %v8035_v32 = vld [vmem:[%s9516_s1 + $0x38] sm:$0xff] (!%p147_p9)   ;;  %vm8378_vm2 = vmor (!%p147_p9), %vm742_vm0, %vm743_vm1  ;;  %s8153_s27 = sshll.u32 (!%p147_p9), %s8245_s26, 4  ;;  %s8154_s27 = int_to_ptr.vmem [resolvable:$false] %s8153_s27 }
  0x14   : > { %v8034_v24 = vld [vmem:[%s9516_s1 + $0x130] sm:$0xff] (!%p147_p9)   ;;  %v8036_v38 = vld [vmem:[%s9516_s1 + $0x138] sm:$0xff] (!%p147_p9)   ;;  %v8039_v47 = vld [vmem:[%s9516_s1 + $0x40] sm:$0xff] (!%p147_p9)   ;;  %s8155_s28 = scalar_lea.vmem (!%p147_p9), %s8154_s27, 4096 }
  0x15   : > { %7273 = vmatpush3.bf16.msra.mxu1 (!%p147_p9), %v8023_v2  ;;  %v8040_v52 = vld [vmem:[%s9516_s1 + $0x140] sm:$0xff] (!%p147_p9)   ;;  %vm8478_vm5 = vmor (!%p147_p9), %vm1611_vm3, %vm1612_vm4 }
  0x16   : > { %7465 = vmatpush3.bf16.msra.mxu0 (!%p147_p9), %v8024_v3  ;;  %7274 = vmatprep.subr.bf16.mxu1 (!%p147_p9), %v8025_v4 }
  0x17   : > { %s176_s9 = scalar_select %p175_p10, %s8290_s16, 1  ;;  %7466 = vmatprep.subr.bf16.mxu0 %v8026_v5 }
  0x19   : > { %s7974_s20 = smul.u32 216, %s176_s9  ;;  %7275 = vmatpush3.bf16.msra.mxu1 %v8025_v4 }
  0x1a   : > { %7467 = vmatpush3.bf16.msra.mxu0 %v8026_v5  ;;  %7276 = vmatprep.subr.bf16.mxu1 %v8027_v6 }
  0x1b   : > { %7468 = vmatprep.subr.bf16.mxu0 %v8028_v7  ;;  %s8355_s5 = scalar_lea.vmem %s9515_s0, %s7974_s20  ;;  %s9437_s20 = scalar_lea.hbm %s9517_s2, %s6958_s10 }
  0x1c   : > { %v8037_v12 = vld [vmem:[%s8355_s5] sm:$0xff]   ;;  %v6431_v13 = vld [vmem:[%s8355_s5 + $0xc] sm:$0xf]  ;;  %v6432_v14 = vld [vmem:[%s8355_s5 + $0x10] sm:$0xf] }
  0x1d   : > { %7277 = vmatpush3.bf16.msra.mxu1 %v8027_v6  ;;  %7286 = vmatprep.mubr.bf16.mxu1 %v8037_v12  ;;  %v6433_v15 = vld [vmem:[%s8355_s5 + $0x14] sm:$0x1]  ;;  %v2612_v16 = vshrl.u32 %v6431_v13, 16  ;;  %v2615_v17 = vshll.u32 %v6431_v13, 16  ;;  %v2621_v19 = vshll.u32 %v6432_v14, 16  ;;  %v2625_v20 = vshrl.u32 %v6432_v14, 16 }
  0x1e   : > { %7469 = vmatpush3.bf16.msra.mxu0 %v8028_v7  ;;  %7278 = vmatprep.subr.bf16.mxu1 %v8029_v8  ;;  %v2631_v21 = vshll.u32 %v6433_v15, 16  ;;  %v6434_v29 = vld [vmem:[%s8355_s5 + $0x18] sm:$0xf]  ;;  %v6435_v30 = vld [vmem:[%s8355_s5 + $0x1c] sm:$0xf]  ;;  %v8038_v55 = vld [vmem:[%s8355_s5 + $0xc] sm:$0xff]  }
  0x1f   : > { %7470 = vmatprep.subr.bf16.mxu0 %v8030_v9  ;;  %v2614_v22 = vrot.slane %v2612_v16, 4  ;;  %v2617_v23 = vrot.slane %v2615_v17, 5  ;;  %v2623_v25 = vrot.slane %v2621_v19, 5  ;;  %v2627_v26 = vrot.slane %v2625_v20, 4  ;;  %v6436_v31 = vld [vmem:[%s8355_s5 + $0x20] sm:$0x1] }
  0x20   : > { %v2633_v27 = vrot.slane %v2631_v21, 5  ;;  %v2636_v35 = vshrl.u32 %v6434_v29, 16  ;;  %v2639_v36 = vshll.u32 %v6434_v29, 16  ;;  %v2645_v37 = vshll.u32 %v6435_v30, 16  ;;  %v6437_v53 = vld [vmem:[%s8355_s5 + $0x24] sm:$0xf] }
  0x21   : > { %7279 = vmatpush3.bf16.msra.mxu1 %v8029_v8  ;;  %v2618_v28 = vor.u32 %v2617_v23, %v2614_v22  ;;  %v2628_v34 = vor.u32 %v2627_v26, %v2623_v25  ;;  %v2649_v40 = vshrl.u32 %v6435_v30, 16  ;;  %v2655_v41 = vshll.u32 %v6436_v31, 16  ;;  %v6438_v57 = vld [vmem:[%s8355_s5 + $0x28] sm:$0xf]  ;;  %v6439_v58 = vld [vmem:[%s8355_s5 + $0x2c] sm:$0x1] }
  0x22   : > { %7471 = vmatpush3.bf16.msra.mxu0 %v8030_v9  ;;  %7280 = vmatprep.subr.bf16.mxu1 %v8031_v10  ;;  %v2638_v43 = vrot.slane %v2636_v35, 4  ;;  %v2641_v44 = vrot.slane %v2639_v36, 5  ;;  %v2647_v45 = vrot.slane %v2645_v37, 5  ;;  %v2660_v59 = vshrl.u32 %v6437_v53, 16  ;;  %v8042_v2 = vld [vmem:[%s8355_s5 + $0x18] sm:$0xff]   ;;  %v8041_v6 = vld [vmem:[%s9516_s1 + $0x148] sm:$0xff]  }
  0x23   : > { %7472 = vmatprep.subr.bf16.mxu0 %v8032_v11  ;;  %v2619_v39 = vrot.slane %v2618_v28, 4  ;;  %v2629_v42 = vrot.slane %v2628_v34, 4  ;;  %v2651_v48 = vrot.slane %v2649_v40, 4  ;;  %v2657_v51 = vrot.slane %v2655_v41, 5  ;;  %v6440_v13 = vld [vmem:[%s8355_s5 + $0x30] sm:$0xf] }
  0x24   : > { %v2642_v50 = vor.u32 %v2641_v44, %v2638_v43  ;;  %v2663_v60 = vshll.u32 %v6437_v53, 16  ;;  %v2669_v62 = vshll.u32 %v6438_v57, 16  ;;  %v2673_v63 = vshrl.u32 %v6438_v57, 16  ;;  %v6441_v14 = vld [vmem:[%s8355_s5 + $0x34] sm:$0xf]  ;;  %v8043_v28 = vld [vmem:[%s8355_s5 + $0x24] sm:$0xff]  }
  0x25   : > { %7281 = vmatpush3.bf16.msra.mxu1 %v8031_v10  ;;  %v2624_v46 = vsel %vm8378_vm2, %v2619_v39, %v2623_v25  ;;  %v2634_v49 = vsel %vm8378_vm2, %v2629_v42, %v2633_v27  ;;  %v2652_v56 = vor.u32 %v2651_v48, %v2647_v45  ;;  %v2679_v0 = vshll.u32 %v6439_v58, 16  ;;  %v8044_v10 = vld [vmem:[%s9516_s1 + $0x48] sm:$0xff]   ;;  %v6442_v17 = vld [vmem:[%s8355_s5 + $0x38] sm:$0x1]  ;;  %v8045_v31 = vld [vmem:[%s9516_s1 + $0x150] sm:$0xff]  }
  0x26   : > { %7473 = vmatpush3.bf16.msra.mxu0 %v8032_v11  ;;  %7282 = vmatprep.subr.bf16.mxu1 %v8033_v18  ;;  %v6495_v54 = vcombine.low %v2624_v46, %v2634_v49  ;;  %v2643_v61 = vrot.slane %v2642_v50, 4  ;;  %v2662_v3 = vrot.slane %v2660_v59, 4  ;;  %v2665_v4 = vrot.slane %v2663_v60, 5  ;;  %v8047_v36 = vld [vmem:[%s8355_s5 + $0x30] sm:$0xff]   ;;  %v6443_v39 = vld [vmem:[%s8355_s5 + $0x3c] sm:$0xf] }
  0x27   : > { %7474 = vmatprep.subr.bf16.mxu0 %v8034_v24  ;;  %v2653_v1 = vrot.slane %v2652_v56, 4  ;;  %v2671_v7 = vrot.slane %v2669_v62, 5  ;;  %v2675_v8 = vrot.slane %v2673_v63, 4  ;;  %v2681_v9 = vrot.slane %v2679_v0, 5  ;;  %v6444_v40 = vld [vmem:[%s8355_s5 + $0x40] sm:$0xf] }
  0x28   : > { %7478 = vmatprep.mubr.bf16.mxu0 %v6495_v54  ;;  %v2648_v5 = vsel %vm8378_vm2, %v2643_v61, %v2647_v45  ;;  %v2666_v12 = vor.u32 %v2665_v4, %v2662_v3  ;;  %v2687_v19 = vshll.u32 %v6440_v13, 16  ;;  %v2693_v21 = vshll.u32 %v6441_v14, 16  ;;  %v6445_v41 = vld [vmem:[%s8355_s5 + $0x44] sm:$0x1]  ;;  %v8049_v54 = vld [vmem:[%s9516_s1 + $0x50] sm:$0xff]  }
  0x29   : > { %7283 = vmatpush3.bf16.msra.mxu1 %v8033_v18  ;;  %v2658_v11 = vsel %vm8378_vm2, %v2653_v1, %v2657_v51  ;;  %v2676_v16 = vor.u32 %v2675_v8, %v2671_v7  ;;  %v2684_v18 = vshrl.u32 %v6440_v13, 16  ;;  %v2697_v22 = vshrl.u32 %v6441_v14, 16  ;;  %v6446_v58 = vld [vmem:[%s8355_s5 + $0x48] sm:$0xf]  ;;  %v6447_v61 = vld [vmem:[%s8355_s5 + $0x4c] sm:$0xf] }
  0x2a   : > { %7475 = vmatpush3.bf16.msra.mxu0 %v8034_v24  ;;  %7284 = vmatprep.subr.bf16.mxu1 %v8035_v32  ;;  %v6496_v15 = vcombine.low %v2648_v5, %v2658_v11  ;;  %v2667_v20 = vrot.slane %v2666_v12, 4  ;;  %v2703_v23 = vshll.u32 %v6442_v17, 16  ;;  %v2689_v26 = vrot.slane %v2687_v19, 5  ;;  %v6448_v62 = vld [vmem:[%s8355_s5 + $0x50] sm:$0x1]  ;;  %v8050_v8 = vld [vmem:[%s9516_s1 + $0x160] sm:$0xff]  }
  0x2b   : > { %7476 = vmatprep.subr.bf16.mxu0 %v8036_v38  ;;  %v2677_v24 = vrot.slane %v2676_v16, 4  ;;  %v2686_v25 = vrot.slane %v2684_v18, 4  ;;  %v2695_v29 = vrot.slane %v2693_v21, 5  ;;  %v2699_v30 = vrot.slane %v2697_v22, 4  ;;  %v8052_v18 = vld [vmem:[%s8355_s5 + $0x48] sm:$0xff]  }
  0x2c   : > { %v2672_v27 = vsel %vm8378_vm2, %v2667_v20, %v2671_v7  ;;  %v2705_v35 = vrot.slane %v2703_v23, 5  ;;  %v2708_v43 = vshrl.u32 %v6443_v39, 16  ;;  %v2711_v44 = vshll.u32 %v6443_v39, 16  ;;  %v6449_v19 = vld [vmem:[%s8355_s5 + $0x54] sm:$0xf]  ;;  %v8051_v23 = vld [vmem:[%s9516_s1 + $0x168] sm:$0xff]  }
  0x2d   : > { %7285 = vmatpush3.bf16.msra.mxu1 %v8035_v32  ;;  %v2682_v32 = vsel %vm8378_vm2, %v2677_v24, %v2681_v9  ;;  %v2690_v34 = vor.u32 %v2689_v26, %v2686_v25  ;;  %v2717_v45 = vshll.u32 %v6444_v40, 16  ;;  %v2721_v48 = vshrl.u32 %v6444_v40, 16  ;;  %v6450_v20 = vld [vmem:[%s8355_s5 + $0x58] sm:$0xf]  ;;  %v6451_v24 = vld [vmem:[%s8355_s5 + $0x5c] sm:$0x1] }
  0x2e   : > { %7477 = vmatpush3.bf16.msra.mxu0 %v8036_v38  ;;  %7318 = vmatprep.subr.bf16.mxu1 %v8039_v47  ;;  %v6497_v37 = vcombine.low %v2672_v27, %v2682_v32  ;;  %v2700_v38 = vor.u32 %v2699_v30, %v2695_v29  ;;  %v2727_v49 = vshll.u32 %v6445_v41, 16  ;;  %v2710_v51 = vrot.slane %v2708_v43, 4  ;;  %v8053_v39 = vld [vmem:[%s8355_s5 + $0x54] sm:$0xff]   ;;  %v6452_v43 = vld [vmem:[%s8355_s5 + $0x60] sm:$0xf] }
  0x2f   : > { %7510 = vmatprep.subr.bf16.mxu0 %v8040_v52  ;;  %v2691_v42 = vrot.slane %v2690_v34, 4  ;;  %v2719_v53 = vrot.slane %v2717_v45, 5  ;;  %v2723_v56 = vrot.slane %v2721_v48, 4  ;;  %v2732_v63 = vshrl.u32 %v6446_v58, 16  ;;  %v8054_v40 = vld [vmem:[%s9516_s1 + $0x58] sm:$0xff]  }
  0x30   : > { %7287 = vmatmul.mubr.bf16.vlgmr.msra.gmra.mrb[0].mxu1 %v8038_v55  ;;  %v2701_v46 = vrot.slane %v2700_v38, 4  ;;  %v2729_v57 = vrot.slane %v2727_v49, 5  ;;  %v2735_v0 = vshll.u32 %v6446_v58, 16  ;;  %v2745_v3 = vshrl.u32 %v6447_v61, 16  ;;  %v6454_v45 = vld [vmem:[%s8355_s5 + $0x68] sm:$0x1] }
  0x31   : > { %7479 = vmatmul.mubr.bf16.vlgmr.msra.gmra.mrb[0].mxu0 %v6496_v15  ;;  %7319 = vmatpush3.bf16.msra.mxu1 %v8039_v47  ;;  %v8046_v47 = vld [vmem:[%s9516_s1 + $0x158] sm:$0xff]   ;;  %v2696_v50 = vsel %vm8378_vm2, %v2691_v42, %v2695_v29  ;;  %v2724_v1 = vor.u32 %v2723_v56, %v2719_v53  ;;  %v2751_v4 = vshll.u32 %v6448_v62, 16  ;;  %v2756_v25 = vshrl.u32 %v6449_v19, 16 }
  0x32   : > { %7511 = vmatpush3.bf16.msra.mxu0 %v8040_v52  ;;  %7290 = vmatprep.mubr.bf16.mxu1 %v8042_v2  ;;  %v2713_v52 = vrot.slane %v2711_v44, 5  ;;  %v2706_v55 = vsel %vm8378_vm2, %v2701_v46, %v2705_v35  ;;  %v2741_v2 = vshll.u32 %v6447_v61, 16  ;;  %v2737_v7 = vrot.slane %v2735_v0, 5  ;;  %v6453_v44 = vld [vmem:[%s8355_s5 + $0x64] sm:$0xf] }
  0x33   : > { %7512 = vmatprep.subr.bf16.mxu0 %v8041_v6  ;;  %7320 = vmatprep.subr.bf16.mxu1 %v8044_v10  ;;  %v6498_v59 = vcombine.low %v2696_v50, %v2706_v55  ;;  %v2725_v9 = vrot.slane %v2724_v1, 4  ;;  %v2747_v12 = vrot.slane %v2745_v3, 4  ;;  %v2753_v17 = vrot.slane %v2751_v4, 5  ;;  %v8055_v50 = vld [vmem:[%s9516_s1 + $0x170] sm:$0xff]   ;;  %v6519_v0 = vld [vmem:[%s8355_s5 + $0xc] sm:$0xe] }
  0x34   : > { %7482 = vmatprep.mubr.bf16.mxu0 %v6497_v37  ;;  %v2714_v60 = vor.u32 %v2713_v52, %v2710_v51  ;;  %v2743_v11 = vrot.slane %v2741_v2, 5  ;;  %v2759_v26 = vshll.u32 %v6449_v19, 16  ;;  %v2769_v29 = vshrl.u32 %v6450_v20, 16 }
  0x35   : > { %7321 = vmatpush3.bf16.msra.mxu1 %v8044_v10  ;;  %v8048_v10 = vld [vmem:[%s8355_s5 + $0x3c] sm:$0xff]   ;;  %v2730_v15 = vsel %vm8378_vm2, %v2725_v9, %v2729_v57  ;;  %v2775_v30 = vshll.u32 %v6451_v24, 16  ;;  %v2758_v32 = vrot.slane %v2756_v25, 4  ;;  %v2783_v48 = vshll.u32 %v6452_v43, 16 }
  0x36   : > { %7513 = vmatpush3.bf16.msra.mxu0 %v8041_v6  ;;  %7322 = vmatprep.subr.bf16.mxu1 %v8049_v54  ;;  %v2715_v5 = vrot.slane %v2714_v60, 4  ;;  %v2734_v6 = vrot.slane %v2732_v63, 4  ;;  %v2748_v16 = vor.u32 %v2747_v12, %v2743_v11  ;;  %v2761_v34 = vrot.slane %v2759_v26, 5  ;;  %v8056_v60 = vld [vmem:[%s9516_s1 + $0x178] sm:$0xff]   ;;  %v8057_v63 = vld [vmem:[%s8355_s5 + $0x60] sm:$0xff]  }
  0x37   : > { %7514 = vmatprep.subr.bf16.mxu0 %v8045_v31  ;;  %v2771_v37 = vrot.slane %v2769_v29, 4  ;;  %v2777_v38 = vrot.slane %v2775_v30, 5  ;;  %v2789_v49 = vshll.u32 %v6453_v44, 16  ;;  %v2793_v52 = vshrl.u32 %v6453_v44, 16  ;;  %v6525_v29 = vld [vmem:[%s8355_s5 + $0x24] sm:$0xe] }
  0x38   : > { %7291 = vmatmul.mubr.bf16.gmra.mrb[4].mxu1 %v8043_v28  ;;  %v2720_v13 = vsel %vm8378_vm2, %v2715_v5, %v2719_v53  ;;  %v2738_v14 = vor.u32 %v2737_v7, %v2734_v6  ;;  %v2749_v27 = vrot.slane %v2748_v16, 4  ;;  %v2765_v28 = vshll.u32 %v6450_v20, 16  ;;  %v6520_v5 = vld [vmem:[%s8355_s5 + $0x10] sm:$0xf]  ;;  %v6521_v6 = vld [vmem:[%s8355_s5 + $0x14] sm:$0x1] }
  0x39   : > { %7294 = vmatprep.mubr.bf16.mxu1 %v8047_v36  ;;  %7323 = vmatpush3.bf16.msra.mxu1 %v8049_v54  ;;  %v6499_v21 = vcombine.low %v2720_v13, %v2730_v15  ;;  %v2762_v42 = vor.u32 %v2761_v34, %v2758_v32  ;;  %v2799_v53 = vshll.u32 %v6454_v45, 16  ;;  %v2785_v56 = vrot.slane %v2783_v48, 5  ;;  %v8060_v13 = vld [vmem:[%s9516_s1 + $0x180] sm:$0xff]   ;;  %v6523_v20 = vld [vmem:[%s8355_s5 + $0x1c] sm:$0xf]  ;;  %v8064_v48 = vld [vmem:[%s9516_s1 + $0x188] sm:$0xff]  }
  0x3a   : > { %7515 = vmatpush3.bf16.msra.mxu0 %v8045_v31  ;;  %v2739_v22 = vrot.slane %v2738_v14, 4  ;;  %v2754_v35 = vsel %vm8378_vm2, %v2749_v27, %v2753_v17  ;;  %v2767_v36 = vrot.slane %v2765_v28, 5  ;;  %7324 = vmatprep.subr.bf16.mxu1 %v8054_v40  ;;  %v2791_v57 = vrot.slane %v2789_v49, 5  ;;  %v8058_v17 = vld [vmem:[%s8355_s5 + $0x6c] sm:$0xff]   ;;  %v6529_v44 = vld [vmem:[%s8355_s5 + $0x34] sm:$0xf] }
  0x3b   : > { %7483 = vmatmul.mubr.bf16.gmra.mrb[4].mxu0 %v6498_v59  ;;  %7516 = vmatprep.subr.bf16.mxu0 %v8046_v47  ;;  %v2763_v51 = vrot.slane %v2762_v42, 4  ;;  %v2795_v59 = vrot.slane %v2793_v52, 4  ;;  %v2801_v3 = vrot.slane %v2799_v53, 5  ;;  %v6567_v7 = vrot.slane %v6519_v0, 9  ;;  %v6527_v32 = vld [vmem:[%s8355_s5 + $0x2c] sm:$0x1] }
  0x3c   : > { %7486 = vmatprep.mubr.bf16.mxu0 %v6499_v21  ;;  %v2744_v31 = vsel %vm8378_vm2, %v2739_v22, %v2743_v11  ;;  %v2772_v46 = vor.u32 %v2771_v37, %v2767_v36  ;;  %v3479_v9 = vrot.slane %v6520_v5, 5  ;;  %v8059_v11 = vld [vmem:[%s9516_s1 + $0x60] sm:$0xff]   ;;  %v3486_v26 = vrot.slane %v6523_v20, 5  ;;  %v6534_v0 = vld [vmem:[%s8355_s5 + $0x48] sm:$0xe] }
  0x3d   : > { %v6500_v41 = vcombine.low %v2744_v31, %v2754_v35  ;;  %7325 = vmatpush3.bf16.msra.mxu1 %v8054_v40  ;;  %v2768_v58 = vsel %vm8378_vm2, %v2763_v51, %v2767_v36  ;;  %v2796_v2 = vor.u32 %v2795_v59, %v2791_v57  ;;  %v6524_v21 = vld [vmem:[%s8355_s5 + $0x20] sm:$0x1]  ;;  %v6526_v31 = vld [vmem:[%s8355_s5 + $0x28] sm:$0xf]  ;;  %v6569_v34 = vrot.slane %v6525_v29, 9  ;;  %v8067_v59 = vld [vmem:[%s9516_s1 + $0x70] sm:$0xff]  }
  0x3e   : > { %7517 = vmatpush3.bf16.msra.mxu0 %v8046_v47  ;;  %v2780_v47 = vshrl.u32 %v6452_v43, 16  ;;  %v2773_v54 = vrot.slane %v2772_v46, 4  ;;  %v3480_v15 = vsel %vm8478_vm5, %v6567_v7, %v3479_v9  ;;  %v3481_v16 = vrot.slane %v3479_v9, 4  ;;  %7326 = vmatprep.subr.bf16.mxu1 %v8059_v11  ;;  %v8062_v42 = vld [vmem:[%s8355_s5 + $0x84] sm:$0xff]   ;;  %v6528_v43 = vld [vmem:[%s8355_s5 + $0x30] sm:$0xe] }
  0x3f   : > { %7518 = vmatprep.subr.bf16.mxu0 %v8050_v8  ;;  %v2797_v12 = vrot.slane %v2796_v2, 4  ;;  %v3489_v27 = vrot.slane %v6524_v21, 5  ;;  %v3488_v30 = vrot.slane %v3486_v26, 4  ;;  %v3493_v36 = vrot.slane %v6526_v31, 5  ;;  %v6530_v46 = vld [vmem:[%s8355_s5 + $0x38] sm:$0x1] }
  0x40   : > { %7295 = vmatmul.mubr.bf16.gmra.mrb[8].mxu1 %v8048_v10  ;;  %v2782_v55 = vrot.slane %v2780_v47, 4  ;;  %v2778_v61 = vsel %vm8378_vm2, %v2773_v54, %v2777_v38  ;;  %v3482_v10 = vrot.slane %v6521_v6, 5  ;;  %v3496_v37 = vrot.slane %v6527_v32, 5  ;;  %v8065_v54 = vld [vmem:[%s8355_s5 + $0x90] sm:$0xff]   ;;  %v6535_v5 = vld [vmem:[%s8355_s5 + $0x4c] sm:$0xf] }
  0x41   : > { %7298 = vmatprep.mubr.bf16.mxu1 %v8052_v18  ;;  %v6501_v1 = vcombine.low %v2768_v58, %v2778_v61  ;;  %v6522_v18 = vld [vmem:[%s8355_s5 + $0x18] sm:$0xe]  ;;  %v2802_v19 = vsel %vm8378_vm2, %v2797_v12, %v2801_v3  ;;  %7327 = vmatpush3.bf16.msra.mxu1 %v8059_v11  ;;  %v3490_v38 = vsel %vm8478_vm5, %v3488_v30, %v3489_v27  ;;  %v3500_v47 = vrot.slane %v6529_v44, 5  ;;  %v8066_v3 = vld [vmem:[%s8355_s5 + $0x9c] sm:$0xff]   ;;  %v6536_v6 = vld [vmem:[%s8355_s5 + $0x50] sm:$0x1] }
  0x42   : > { %7519 = vmatpush3.bf16.msra.mxu0 %v8050_v8  ;;  %v2786_v62 = vor.u32 %v2785_v56, %v2782_v55  ;;  %v6568_v22 = vrot.slane %v6522_v18, 9  ;;  %v3483_v25 = vsel %vm8478_vm5, %v3481_v16, %v3482_v10  ;;  %v3494_v40 = vsel %vm8478_vm5, %v6569_v34, %v3493_v36  ;;  %v6531_v55 = vld [vmem:[%s8355_s5 + $0x3c] sm:$0xe]  ;;  %v6532_v56 = vld [vmem:[%s8355_s5 + $0x40] sm:$0xf]  ;;  %v8068_v12 = vld [vmem:[%s9516_s1 + $0x190] sm:$0xff]  }
  0x43   : > { %7520 = vmatprep.subr.bf16.mxu0 %v8051_v23  ;;  %7487 = vmatmul.mubr.bf16.gmra.mrb[8].mxu0 %v6500_v41  ;;  %v6599_v28 = vcombine.low %v3480_v15, %v3483_v25  ;;  %v3495_v41 = vrot.slane %v3493_v36, 4  ;;  %v3503_v51 = vrot.slane %v6530_v46, 5  ;;  %v3502_v53 = vrot.slane %v3500_v47, 4  ;;  %v8069_v15 = vld [vmem:[%s8355_s5 + $0xa8] sm:$0xff]   ;;  %v6537_v16 = vld [vmem:[%s8355_s5 + $0x54] sm:$0xe] }
  0x44   : > { %v2787_v8 = vrot.slane %v2786_v62, 4  ;;  %7490 = vmatprep.mubr.bf16.mxu0 %v6501_v1  ;;  %v3487_v35 = vsel %vm8478_vm5, %v6568_v22, %v3486_v26  ;;  %v6571_v58 = vrot.slane %v6531_v55, 9  ;;  %v6572_v7 = vrot.slane %v6534_v0, 9  ;;  %v6539_v18 = vld [vmem:[%s8355_s5 + $0x5c] sm:$0x1]  ;;  %v8070_v34 = vld [vmem:[%s8355_s5 + $0xb4] sm:$0xff]  }
  0x45   : > { %v6600_v45 = vcombine.low %v3487_v35, %v3490_v38  ;;  %v3497_v49 = vsel %vm8478_vm5, %v3495_v41, %v3496_v37  ;;  %v3517_v11 = vrot.slane %v6536_v6, 5  ;;  %v3524_v21 = vrot.slane %v6539_v18, 5  ;;  %v8071_v26 = vld [vmem:[%s9516_s1 + $0x78] sm:$0xff]   ;;  %v6540_v27 = vld [vmem:[%s8355_s5 + $0x60] sm:$0xe] }
  0x46   : > { %7521 = vmatpush3.bf16.msra.mxu0 %v8051_v23  ;;  %v2792_v14 = vsel %vm8378_vm2, %v2787_v8, %v2791_v57  ;;  %v8061_v23 = vld [vmem:[%s8355_s5 + $0x78] sm:$0xff]   ;;  %v6601_v52 = vcombine.low %v3494_v40, %v3497_v49  ;;  %v6533_v57 = vld [vmem:[%s8355_s5 + $0x44] sm:$0x1]  ;;  %v3514_v8 = vrot.slane %v6535_v5, 5  ;;  %v6542_v29 = vld [vmem:[%s8355_s5 + $0x68] sm:$0x1] }
  0x47   : > { %7522 = vmatprep.subr.bf16.mxu0 %v8055_v50  ;;  %v6502_v24 = vcombine.low %v2792_v14, %v2802_v19  ;;  %v3510_v61 = vrot.slane %v6533_v57, 5  ;;  %v6573_v19 = vrot.slane %v6537_v16, 9  ;;  %v6574_v30 = vrot.slane %v6540_v27, 9  ;;  %v8072_v31 = vld [vmem:[%s9516_s1 + $0x198] sm:$0xff]   ;;  %v663_v40 = vld [vmem:[%s8355_s5 + $0x4] sm:$0xf] }
  0x48   : > { %7299 = vmatmul.mubr.bf16.gmra.mrb[12].mxu1 %v8053_v39  ;;  %v8063_v39 = vld [vmem:[%s9516_s1 + $0x68] sm:$0xff]   ;;  %v3516_v14 = vrot.slane %v3514_v8, 4  ;;  %v3515_v22 = vsel %vm8478_vm5, %v6572_v7, %v3514_v8  ;;  %v3531_v36 = vrot.slane %v6542_v29, 5  ;;  %v759_v49 = vshrl.u32 %v663_v40, 16  ;;  %v666_v5 = vld [vmem:[%s8355_s5 + $0x10] sm:$0xf] }
  0x49   : > { %7302 = vmatprep.mubr.bf16.mxu1 %v8057_v63  ;;  %7328 = vmatprep.subr.bf16.mxu1 %v8063_v39  ;;  %v3504_v63 = vsel %vm8478_vm5, %v3502_v53, %v3503_v51  ;;  %v664_v41 = vld [vmem:[%s8355_s5 + $0x8] sm:$0x1]  ;;  %v6543_v46 = vld [vmem:[%s8355_s5 + $0x6c] sm:$0xe]  ;;  %v6544_v51 = vld [vmem:[%s8355_s5 + $0x70] sm:$0xf] }
  0x4a   : > { %7523 = vmatpush3.bf16.msra.mxu0 %v8055_v50  ;;  %v6570_v50 = vrot.slane %v6528_v43, 9  ;;  %7329 = vmatpush3.bf16.msra.mxu1 %v8063_v39  ;;  %v662_v39 = vld [vmem:[%s8355_s5] sm:$0xf]  ;;  %v3535_v57 = vrot.slane %v6544_v51, 5  ;;  %v667_v6 = vld [vmem:[%s8355_s5 + $0x14] sm:$0x1] }
  0x4b   : > { %7524 = vmatprep.subr.bf16.mxu0 %v8056_v60  ;;  %7491 = vmatmul.mubr.bf16.gmra.mrb[12].mxu0 %v6502_v24  ;;  %v746_v44 = vshrl.u32 %v662_v39, 16  ;;  %v6548_v29 = vld [vmem:[%s8355_s5 + $0x80] sm:$0x1] }
  0x4c   : > { %7526 = vmatprep.mubr.bf16.mxu0 %v6599_v28  ;;  %v3501_v62 = vsel %vm8478_vm5, %v6570_v50, %v3500_v47  ;;  %7330 = vmatprep.subr.bf16.mxu1 %v8067_v59  ;;  %v6541_v28 = vld [vmem:[%s8355_s5 + $0x64] sm:$0xf]  ;;  %v765_v50 = vshll.u32 %v664_v41, 16  ;;  %v669_v41 = vld [vmem:[%s8355_s5 + $0x1c] sm:$0xf] }
  0x4d   : > { %v6602_v9 = vcombine.low %v3501_v62, %v3504_v63  ;;  %v3528_v35 = vrot.slane %v6541_v28, 5  ;;  %v8579_v47 = vld [vmem:[%s9516_s1 + $0x80] sm:$0xff]   ;;  %v665_v63 = vld [vmem:[%s8355_s5 + $0xc] sm:$0xf]  ;;  %v807_v51 = vshrl.u32 %v669_v41, 16 }
  0x4e   : > { %7525 = vmatpush3.bf16.msra.mxu0 %v8056_v60  ;;  %v3507_v60 = vrot.slane %v6532_v56, 5  ;;  %7331 = vmatpush3.bf16.msra.mxu1 %v8067_v59  ;;  %v6545_v56 = vld [vmem:[%s8355_s5 + $0x74] sm:$0x1]  ;;  %v767_v62 = vrot.slane %v765_v50, 5  ;;  %v770_v8 = vshrl.u32 %v665_v63, 16 }
  0x4f   : > { %7558 = vmatprep.subr.bf16.mxu0 %v8060_v13  ;;  %7332 = vmatprep.subr.bf16.mxu1 %v8071_v26  ;;  %v3530_v43 = vrot.slane %v3528_v35, 4 }
  0x50   : > { %7303 = vmatmul.mubr.bf16.gmra.mrb[16].mxu1 %v8058_v17  ;;  %v3508_v1 = vsel %vm8478_vm5, %v6571_v58, %v3507_v60  ;;  %v3509_v2 = vrot.slane %v3507_v60, 4  ;;  %v6538_v17 = vld [vmem:[%s8355_s5 + $0x58] sm:$0xf]  ;;  %v8074_v58 = vld [vmem:[%s9516_s1 + $0x1a0] sm:$0xff]   ;;  %v772_v18 = vrot.slane %v770_v8, 4 }
  0x51   : > { %7306 = vmatprep.mubr.bf16.mxu1 %v8061_v23  ;;  %v3521_v20 = vrot.slane %v6538_v17, 5  ;;  %v3518_v23 = vsel %vm8478_vm5, %v3516_v14, %v3517_v11  ;;  %v3532_v53 = vsel %vm8478_vm5, %v3530_v43, %v3531_v36  ;;  %v8076_v11 = vld [vmem:[%s9516_s1 + $0x1a8] sm:$0xff]   ;;  %v783_v14 = vshrl.u32 %v666_v5, 16  ;;  %v668_v36 = vld [vmem:[%s8355_s5 + $0x18] sm:$0xf] }
  0x52   : > { %v3511_v10 = vsel %vm8478_vm5, %v3509_v2, %v3510_v61  ;;  %v6604_v37 = vcombine.low %v3515_v22, %v3518_v23  ;;  %7333 = vmatpush3.bf16.msra.mxu1 %v8071_v26  ;;  %v761_v61 = vrot.slane %v759_v49, 4  ;;  %v3537_v2 = vrot.slane %v3535_v57, 4  ;;  %v6547_v26 = vld [vmem:[%s8355_s5 + $0x7c] sm:$0xf] }
  0x53   : > { %7527 = vmatmul.mubr.bf16.vlgmr.msra.gmra.mrb[0].mxu0 %v6600_v45  ;;  %v3522_v24 = vsel %vm8478_vm5, %v6573_v19, %v3521_v20  ;;  %v3523_v25 = vrot.slane %v3521_v20, 4  ;;  %v749_v45 = vshll.u32 %v662_v39, 16  ;;  %7366 = vmatprep.subr.bf16.mxu1 %v8579_v47  ;;  %v6546_v20 = vld [vmem:[%s8355_s5 + $0x78] sm:$0xe] }
  0x54   : > { %7559 = vmatpush3.bf16.msra.mxu0 %v8060_v13  ;;  %7530 = vmatprep.mubr.bf16.mxu0 %v6601_v52  ;;  %v6603_v13 = vcombine.low %v3508_v1, %v3511_v10  ;;  %v6575_v52 = vrot.slane %v6543_v46, 9  ;;  %v779_v10 = vshll.u32 %v666_v5, 16  ;;  %v803_v46 = vshll.u32 %v669_v41, 16 }
  0x55   : > { %7560 = vmatprep.subr.bf16.mxu0 %v8064_v48  ;;  %v3525_v32 = vsel %vm8478_vm5, %v3523_v25, %v3524_v21  ;;  %v751_v55 = vrot.slane %v749_v45, 5  ;;  %v8078_v21 = vld [vmem:[%s9516_s1 + $0x1b0] sm:$0xff]   ;;  %v797_v45 = vshll.u32 %v668_v36, 16 }
  0x56   : > { %v6605_v38 = vcombine.low %v3522_v24, %v3525_v32  ;;  %v3536_v1 = vsel %vm8478_vm5, %v6575_v52, %v3535_v57  ;;  %v781_v23 = vrot.slane %v779_v10, 5  ;;  %v785_v24 = vrot.slane %v783_v14, 4 }
  0x58   : > { %7307 = vmatmul.mubr.bf16.gmra.mrb[20].mxu1 %v8062_v42  ;;  %7561 = vmatpush3.bf16.msra.mxu0 %v8064_v48  ;;  %v8573_v42 = vsel %vm8478_vm5, %v6574_v30, %v3528_v35  ;;  %v755_v48 = vshll.u32 %v663_v40, 16  ;;  %v6576_v30 = vrot.slane %v6546_v20, 9  ;;  %v3545_v35 = vrot.slane %v6548_v29, 5 }
  0x59   : > { %7310 = vmatprep.mubr.bf16.mxu1 %v8065_v54  ;;  %7562 = vmatprep.subr.bf16.mxu0 %v8068_v12  ;;  %v748_v54 = vrot.slane %v746_v44, 4  ;;  %v6606_v59 = vcombine.low %v8573_v42, %v3532_v53  ;;  %v670_v42 = vld [vmem:[%s8355_s5 + $0x20] sm:$0x1]  ;;  %v794_v44 = vshrl.u32 %v668_v36, 16  ;;  %v6550_v53 = vld [vmem:[%s8355_s5 + $0x88] sm:$0xf] }
  0x5a   : > { %v757_v60 = vrot.slane %v755_v48, 5  ;;  %v6549_v48 = vld [vmem:[%s8355_s5 + $0x84] sm:$0xe]  ;;  %v813_v52 = vshll.u32 %v670_v42, 16 }
  0x5b   : > { %7531 = vmatmul.mubr.bf16.gmra.mrb[4].mxu0 %v6602_v9  ;;  %v752_v0 = vor.u32 %v751_v55, %v748_v54  ;;  %v773_v9 = vshll.u32 %v665_v63, 16  ;;  %v6551_v54 = vld [vmem:[%s8355_s5 + $0x8c] sm:$0x1]  ;;  %v796_v57 = vrot.slane %v794_v44, 4  ;;  %v809_v63 = vrot.slane %v807_v51, 4 }
  0x5c   : > { %7534 = vmatprep.mubr.bf16.mxu0 %v6603_v13  ;;  %7563 = vmatpush3.bf16.msra.mxu0 %v8068_v12  ;;  %v762_v7 = vor.u32 %v761_v61, %v757_v60  ;;  %v6577_v5 = vrot.slane %v6549_v48, 9  ;;  %v6556_v51 = vld [vmem:[%s8355_s5 + $0xa0] sm:$0xf] }
  0x5d   : > { %7564 = vmatprep.subr.bf16.mxu0 %v8072_v31  ;;  %v753_v12 = vrot.slane %v752_v0, 4  ;;  %v775_v19 = vrot.slane %v773_v9, 5  ;;  %v815_v0 = vrot.slane %v813_v52, 5 }
  0x5e   : > { %v763_v16 = vrot.slane %v762_v7, 4  ;;  %v3552_v7 = vrot.slane %v6551_v54, 5 }
  0x5f   : > { %v758_v22 = vsel %vm8378_vm2, %v753_v12, %v757_v60  ;;  %v776_v28 = vor.u32 %v775_v19, %v772_v18  ;;  %v672_v60 = vld [vmem:[%s8355_s5 + $0x28] sm:$0xf]  ;;  %v8077_v12 = vld [vmem:[%s9516_s1 + $0x90] sm:$0xff]   ;;  %v8643_v18 = vld [vmem:[%s9516_s1 + $0x1c0] sm:$0xff]  }
  0x60   : > { %7311 = vmatmul.mubr.bf16.gmra.mrb[24].mxu1 %v8066_v3  ;;  %7565 = vmatpush3.bf16.msra.mxu0 %v8072_v31  ;;  %v3538_v3 = vrot.slane %v6545_v56, 5  ;;  %v768_v27 = vsel %vm8378_vm2, %v763_v16, %v767_v62  ;;  %v3542_v31 = vrot.slane %v6547_v26, 5  ;;  %v805_v62 = vrot.slane %v803_v46, 5 }
  0x61   : > { %7314 = vmatprep.mubr.bf16.mxu1 %v8069_v15  ;;  %7566 = vmatprep.subr.bf16.mxu0 %v8074_v58  ;;  %v789_v15 = vshll.u32 %v667_v6, 16  ;;  %v6279_v32 = vcombine.low %v758_v22, %v768_v27  ;;  %v3549_v6 = vrot.slane %v6550_v53, 5  ;;  %v831_v16 = vshrl.u32 %v672_v60, 16  ;;  %v6554_v27 = vld [vmem:[%s8355_s5 + $0x98] sm:$0x1] }
  0x62   : > { %v3539_v13 = vsel %vm8478_vm5, %v3537_v2, %v3538_v3  ;;  %v3543_v39 = vsel %vm8478_vm5, %v6576_v30, %v3542_v31  ;;  %v3544_v40 = vrot.slane %v3542_v31, 4  ;;  %v8075_v2 = vld [vmem:[%s9516_s1 + $0x88] sm:$0xff]   ;;  %v810_v8 = vor.u32 %v809_v63, %v805_v62 }
  0x63   : > { %7535 = vmatmul.mubr.bf16.gmra.mrb[8].mxu0 %v6604_v37  ;;  %v6607_v17 = vcombine.low %v3536_v1, %v3539_v13  ;;  %v791_v25 = vrot.slane %v789_v15, 5  ;;  %v8080_v37 = vld [vmem:[%s9516_s1 + $0x1b8] sm:$0xff]   ;;  %v673_v1 = vld [vmem:[%s8355_s5 + $0x2c] sm:$0x1]  ;;  %v3550_v14 = vsel %vm8478_vm5, %v6577_v5, %v3549_v6  ;;  %v3551_v15 = vrot.slane %v3549_v6, 4  ;;  %v8082_v5 = vld [vmem:[%s9516_s1 + $0xa0] sm:$0xff]  }
  0x64   : > { %7538 = vmatprep.mubr.bf16.mxu0 %v6605_v38  ;;  %7567 = vmatpush3.bf16.msra.mxu0 %v8074_v58  ;;  %v777_v38 = vrot.slane %v776_v28, 4  ;;  %v3546_v50 = vsel %vm8478_vm5, %v3544_v40, %v3545_v35  ;;  %v799_v58 = vrot.slane %v797_v45, 5  ;;  %v811_v19 = vrot.slane %v810_v8, 4  ;;  %v676_v40 = vld [vmem:[%s8355_s5 + $0x38] sm:$0x1] }
  0x65   : > { %7568 = vmatprep.subr.bf16.mxu0 %v8076_v11  ;;  %v6608_v56 = vcombine.low %v3543_v39, %v3546_v50  ;;  %v837_v26 = vshll.u32 %v673_v1, 16  ;;  %v675_v39 = vld [vmem:[%s8355_s5 + $0x34] sm:$0xf]  ;;  %v3559_v42 = vrot.slane %v6554_v27, 5  ;;  %v6555_v45 = vld [vmem:[%s8355_s5 + $0x9c] sm:$0xe] }
  0x66   : > { %v782_v49 = vsel %vm8378_vm2, %v777_v38, %v781_v23  ;;  %v800_v3 = vor.u32 %v799_v58, %v796_v57  ;;  %v816_v28 = vsel %vm8378_vm2, %v811_v19, %v815_v0  ;;  %v851_v50 = vshll.u32 %v675_v39, 16 }
  0x67   : > { %v3563_v8 = vrot.slane %v6556_v51, 5 }
  0x68   : > { %7315 = vmatmul.mubr.bf16.gmra.mrb[28].mxu1 %v8070_v34  ;;  %v786_v34 = vor.u32 %v785_v24, %v781_v23  ;;  %7569 = vmatpush3.bf16.msra.mxu0 %v8076_v11  ;;  %v827_v11 = vshll.u32 %v672_v60, 16  ;;  %v801_v13 = vrot.slane %v800_v3, 4  ;;  %v3553_v24 = vsel %vm8478_vm5, %v3551_v15, %v3552_v7  ;;  %v679_v3 = vld [vmem:[%s8355_s5 + $0x44] sm:$0x1] }
  0x69   : > { %7570 = vmatprep.subr.bf16.mxu0 %v8078_v21  ;;  %7334 = vmatprep.mubr.bf16.mxu1 %v6279_v32  ;;  %v6609_v29 = vcombine.low %v3550_v14, %v3553_v24  ;;  %v674_v32 = vld [vmem:[%s8355_s5 + $0x30] sm:$0xf]  ;;  %v861_v60 = vshll.u32 %v676_v40, 16  ;;  %v6579_v7 = vrot.slane %v6555_v45, 9  ;;  %v6558_v14 = vld [vmem:[%s8355_s5 + $0xa8] sm:$0xe] }
  0x6a   : > { %v787_v43 = vrot.slane %v786_v34, 4  ;;  %v829_v22 = vrot.slane %v827_v11, 5  ;;  %v806_v23 = vsel %vm8378_vm2, %v801_v13, %v805_v62  ;;  %v8079_v34 = vld [vmem:[%s9516_s1 + $0x98] sm:$0xff]   ;;  %v845_v44 = vshll.u32 %v674_v32, 16  ;;  %v678_v62 = vld [vmem:[%s8355_s5 + $0x40] sm:$0xf] }
  0x6b   : > { %7539 = vmatmul.mubr.bf16.gmra.mrb[12].mxu0 %v6606_v59  ;;  %v671_v59 = vld [vmem:[%s8355_s5 + $0x24] sm:$0xf]  ;;  %v6281_v35 = vcombine.low %v806_v23, %v816_v28  ;;  %v863_v6 = vrot.slane %v861_v60, 5  ;;  %v3564_v15 = vsel %vm8478_vm5, %v6579_v7, %v3563_v8  ;;  %v879_v19 = vshrl.u32 %v678_v62, 16  ;;  %v6560_v24 = vld [vmem:[%s8355_s5 + $0xb0] sm:$0x1] }
  0x6c   : > { %7542 = vmatprep.mubr.bf16.mxu0 %v6607_v17  ;;  %v792_v55 = vsel %vm8378_vm2, %v787_v43, %v791_v25  ;;  %7571 = vmatpush3.bf16.msra.mxu0 %v8078_v21  ;;  %v818_v9 = vshrl.u32 %v671_v59, 16  ;;  %v821_v10 = vshll.u32 %v671_v59, 16  ;;  %v6552_v17 = vld [vmem:[%s8355_s5 + $0x90] sm:$0xe]  ;;  %v833_v25 = vrot.slane %v831_v16, 4  ;;  %v8094_v7 = vld [vmem:[%s9516_s1 + $0xb8] sm:$0xff]  }
  0x6d   : > { %v6280_v61 = vcombine.low %v782_v49, %v792_v55  ;;  %7572 = vmatprep.subr.bf16.mxu0 %v8080_v37  ;;  %v6578_v31 = vrot.slane %v6552_v17, 9  ;;  %v842_v43 = vshrl.u32 %v674_v32, 16  ;;  %v847_v54 = vrot.slane %v845_v44, 5 }
  0x6e   : > { %v820_v20 = vrot.slane %v818_v9, 4  ;;  %v823_v21 = vrot.slane %v821_v10, 5  ;;  %v834_v36 = vor.u32 %v833_v25, %v829_v22  ;;  %v855_v55 = vshrl.u32 %v675_v39, 16  ;;  %v8086_v25 = vld [vmem:[%s9516_s1 + $0xa8] sm:$0xff]  }
  0x6f   : > { %v844_v53 = vrot.slane %v842_v43, 4  ;;  %v853_v59 = vrot.slane %v851_v50, 5  ;;  %v3565_v16 = vrot.slane %v3563_v8, 4  ;;  %v875_v17 = vshll.u32 %v678_v62, 16 }
  0x70   : > { %7335 = vmatmul.mubr.bf16.vlgmr.msra.gmra.mrb[0].mxu1 %v6280_v61  ;;  %7573 = vmatpush3.bf16.msra.mxu0 %v8080_v37  ;;  %v824_v30 = vor.u32 %v823_v21, %v820_v20  ;;  %v839_v37 = vrot.slane %v837_v26, 5  ;;  %v835_v46 = vrot.slane %v834_v36, 4  ;;  %v677_v61 = vld [vmem:[%s8355_s5 + $0x3c] sm:$0xf]  ;;  %v6559_v20 = vld [vmem:[%s8355_s5 + $0xac] sm:$0xf] }
  0x71   : > { %7367 = vmatpush3.bf16.msra.mxu1 %v8579_v47  ;;  %v6553_v47 = vld [vmem:[%s8355_s5 + $0x94] sm:$0xf]  ;;  %7606 = vmatprep.subr.bf16.mxu0 %v8643_v18  ;;  %v848_v1 = vor.u32 %v847_v54, %v844_v53  ;;  %v869_v13 = vshll.u32 %v677_v61, 16  ;;  %v877_v27 = vrot.slane %v875_v17, 5  ;;  %v881_v28 = vrot.slane %v879_v19, 4 }
  0x72   : > { %7368 = vmatprep.subr.bf16.mxu1 %v8075_v2  ;;  %v3556_v38 = vrot.slane %v6553_v47, 5  ;;  %v825_v41 = vrot.slane %v824_v30, 4  ;;  %7338 = vmatprep.mubr.bf16.mxu1 %v6281_v35  ;;  %v840_v57 = vsel %vm8378_vm2, %v835_v46, %v839_v37  ;;  %v680_v35 = vld [vmem:[%s8355_s5 + $0x48] sm:$0xf]  ;;  %v8090_v36 = vld [vmem:[%s9516_s1 + $0xb0] sm:$0xff]   ;;  %v3570_v40 = vrot.slane %v6559_v20, 5 }
  0x73   : > { %7543 = vmatmul.mubr.bf16.gmra.mrb[16].mxu0 %v6608_v56  ;;  %v6557_v56 = vld [vmem:[%s8355_s5 + $0xa4] sm:$0x1]  ;;  %v849_v10 = vrot.slane %v848_v1, 4  ;;  %v871_v23 = vrot.slane %v869_v13, 5  ;;  %v3573_v44 = vrot.slane %v6560_v24, 5  ;;  %v890_v45 = vshrl.u32 %v680_v35, 16 }
  0x74   : > { %7546 = vmatprep.mubr.bf16.mxu0 %v6609_v29  ;;  %v3557_v48 = vsel %vm8478_vm5, %v6578_v31, %v3556_v38  ;;  %v3558_v49 = vrot.slane %v3556_v38, 4  ;;  %v830_v52 = vsel %vm8378_vm2, %v825_v41, %v829_v22  ;;  %v3566_v9 = vrot.slane %v6557_v56, 5  ;;  %v681_v41 = vld [vmem:[%s8355_s5 + $0x4c] sm:$0xf]  ;;  %v6562_v53 = vld [vmem:[%s8355_s5 + $0xb8] sm:$0xf] }
  0x75   : > { %7369 = vmatpush3.bf16.msra.mxu1 %v8075_v2  ;;  %v6282_v63 = vcombine.low %v830_v52, %v840_v57  ;;  %v857_v2 = vrot.slane %v855_v55, 4  ;;  %v854_v21 = vsel %vm8378_vm2, %v849_v10, %v853_v59  ;;  %v885_v29 = vshll.u32 %v679_v3, 16 }
  0x76   : > { %7370 = vmatprep.subr.bf16.mxu1 %v8077_v12  ;;  %v3560_v58 = vsel %vm8478_vm5, %v3558_v49, %v3559_v42  ;;  %v3567_v26 = vsel %vm8478_vm5, %v3565_v16, %v3566_v9  ;;  %v882_v38 = vor.u32 %v881_v28, %v877_v27  ;;  %v682_v42 = vld [vmem:[%s8355_s5 + $0x50] sm:$0x1]  ;;  %v893_v46 = vshll.u32 %v680_v35, 16  ;;  %v6564_v16 = vld [vmem:[%s8355_s5 + $0xc0] sm:$0xe] }
  0x77   : > { %v6610_v0 = vcombine.low %v3557_v48, %v3560_v58  ;;  %v858_v11 = vor.u32 %v857_v2, %v853_v59  ;;  %v6611_v31 = vcombine.low %v3564_v15, %v3567_v26  ;;  %v887_v39 = vrot.slane %v885_v29, 5  ;;  %v6561_v48 = vld [vmem:[%s8355_s5 + $0xb4] sm:$0xe]  ;;  %v6563_v58 = vld [vmem:[%s8355_s5 + $0xbc] sm:$0x1] }
  0x78   : > { %7339 = vmatmul.mubr.bf16.gmra.mrb[4].mxu1 %v6282_v63  ;;  %v883_v49 = vrot.slane %v882_v38, 4  ;;  %v3572_v51 = vrot.slane %v3570_v40, 4  ;;  %v899_v52 = vshll.u32 %v681_v41, 16  ;;  %v892_v55 = vrot.slane %v890_v45, 4  ;;  %v683_v63 = vld [vmem:[%s8355_s5 + $0x54] sm:$0xf] }
  0x79   : > { %7371 = vmatpush3.bf16.msra.mxu1 %v8077_v12  ;;  %v866_v12 = vshrl.u32 %v677_v61, 16  ;;  %v859_v22 = vrot.slane %v858_v11, 4  ;;  %v895_v56 = vrot.slane %v893_v46, 5  ;;  %v903_v57 = vshrl.u32 %v681_v41, 16  ;;  %v6566_v26 = vld [vmem:[%s8355_s5 + $0xc8] sm:$0x1] }
  0x7a   : > { %7372 = vmatprep.subr.bf16.mxu1 %v8079_v34  ;;  %v888_v59 = vsel %vm8378_vm2, %v883_v49, %v887_v39  ;;  %v3574_v60 = vsel %vm8478_vm5, %v3572_v51, %v3573_v44  ;;  %v901_v61 = vrot.slane %v899_v52, 5  ;;  %v909_v62 = vshll.u32 %v682_v42, 16  ;;  %v687_v42 = vld [vmem:[%s8355_s5 + $0x64] sm:$0xf] }
  0x7b   : > { %7547 = vmatmul.mubr.bf16.gmra.mrb[20].mxu0 %v6610_v0  ;;  %v868_v47 = vrot.slane %v866_v12, 4  ;;  %v864_v30 = vsel %vm8378_vm2, %v859_v22, %v863_v6  ;;  %v684_v0 = vld [vmem:[%s8355_s5 + $0x58] sm:$0xf]  ;;  %v896_v3 = vor.u32 %v895_v56, %v892_v55  ;;  %v685_v6 = vld [vmem:[%s8355_s5 + $0x5c] sm:$0x1]  ;;  %v6581_v9 = vrot.slane %v6561_v48, 9 }
  0x7c   : > { %v6283_v37 = vcombine.low %v854_v21, %v864_v30  ;;  %7550 = vmatprep.mubr.bf16.mxu0 %v6611_v31  ;;  %v911_v8 = vrot.slane %v909_v62, 5  ;;  %v3577_v10 = vrot.slane %v6562_v53, 5  ;;  %v3580_v11 = vrot.slane %v6563_v58, 5  ;;  %v6565_v22 = vld [vmem:[%s8355_s5 + $0xc4] sm:$0xf] }
  0x7d   : > { %7373 = vmatpush3.bf16.msra.mxu1 %v8079_v34  ;;  %v872_v32 = vor.u32 %v871_v23, %v868_v47  ;;  %v6580_v34 = vrot.slane %v6558_v14, 9  ;;  %v897_v12 = vrot.slane %v896_v3, 4  ;;  %v914_v14 = vshrl.u32 %v683_v63, 16  ;;  %v689_v58 = vld [vmem:[%s8355_s5 + $0x6c] sm:$0xf] }
  0x7e   : > { %7374 = vmatprep.subr.bf16.mxu1 %v8082_v5  ;;  %7342 = vmatprep.mubr.bf16.mxu1 %v6283_v37  ;;  %v917_v15 = vshll.u32 %v683_v63, 16  ;;  %v3578_v17 = vsel %vm8478_vm5, %v6581_v9, %v3577_v10  ;;  %v3579_v19 = vrot.slane %v3577_v10, 4  ;;  %v923_v20 = vshll.u32 %v684_v0, 16  ;;  %v686_v37 = vld [vmem:[%s8355_s5 + $0x60] sm:$0xf] }
  0x7f   : > { %v873_v43 = vrot.slane %v872_v32, 4  ;;  %v3571_v50 = vsel %vm8478_vm5, %v6580_v34, %v3570_v40  ;;  %v927_v21 = vshrl.u32 %v684_v0, 16  ;;  %v902_v47 = vsel %vm8378_vm2, %v897_v12, %v901_v61  ;;  %v690_v63 = vld [vmem:[%s8355_s5 + $0x70] sm:$0xf]  ;;  %v691_v0 = vld [vmem:[%s8355_s5 + $0x74] sm:$0x1] }
  0x80   : > { %v6612_v2 = vcombine.low %v3571_v50, %v3574_v60  ;;  %v916_v24 = vrot.slane %v914_v14, 4  ;;  %v3581_v28 = vsel %vm8478_vm5, %v3579_v19, %v3580_v11  ;;  %v925_v29 = vrot.slane %v923_v20, 5 }
  0x81   : > { %7375 = vmatpush3.bf16.msra.mxu1 %v8082_v5  ;;  %v878_v54 = vsel %vm8378_vm2, %v873_v43, %v877_v27  ;;  %v905_v5 = vrot.slane %v903_v57, 4  ;;  %v8724_v27 = vld [vmem:[%s9516_s1 + $0xc0] sm:$0xff]   ;;  %v929_v30 = vrot.slane %v927_v21, 4  ;;  %v933_v31 = vshll.u32 %v685_v6, 16  ;;  %v688_v43 = vld [vmem:[%s8355_s5 + $0x68] sm:$0x1] }
  0x82   : > { %7376 = vmatprep.subr.bf16.mxu1 %v8086_v25  ;;  %v6284_v1 = vcombine.low %v878_v54, %v888_v59  ;;  %v6613_v34 = vcombine.low %v3578_v17, %v3581_v28  ;;  %v3584_v41 = vrot.slane %v6565_v22, 5  ;;  %v3587_v45 = vrot.slane %v6566_v26, 5  ;;  %v8081_v57 = vld [vmem:[%s8355_s5 + $0x18] sm:$0xff]   ;;  %v8083_v22 = vld [vmem:[%s8355_s5 + $0x24] sm:$0xff]   ;;  %v8085_v26 = vld [vmem:[%s8355_s5 + $0x30] sm:$0xff]  }
  0x83   : > { %7551 = vmatmul.mubr.bf16.gmra.mrb[24].mxu0 %v6612_v2  ;;  %v906_v13 = vor.u32 %v905_v5, %v901_v61  ;;  %v930_v39 = vor.u32 %v929_v30, %v925_v29  ;;  %v935_v40 = vrot.slane %v933_v31, 5  ;;  %v938_v46 = vshrl.u32 %v686_v37, 16 }
  0x84   : > { %7343 = vmatmul.mubr.bf16.gmra.mrb[8].mxu1 %v6284_v1  ;;  %7554 = vmatprep.mubr.bf16.mxu0 %v6613_v34  ;;  %v941_v48 = vshll.u32 %v686_v37, 16  ;;  %v3586_v51 = vrot.slane %v3584_v41, 4  ;;  %v947_v52 = vshll.u32 %v687_v42, 16  ;;  %v951_v56 = vshrl.u32 %v687_v42, 16  ;;  %v695_v37 = vld [vmem:[%s8355_s5 + $0x84] sm:$0xf] }
  0x85   : > { %7377 = vmatpush3.bf16.msra.mxu1 %v8086_v25  ;;  %v907_v23 = vrot.slane %v906_v13, 4  ;;  %v919_v25 = vrot.slane %v917_v15, 5  ;;  %v931_v49 = vrot.slane %v930_v39, 4  ;;  %v940_v54 = vrot.slane %v938_v46, 4 }
  0x86   : > { %7378 = vmatprep.subr.bf16.mxu1 %v8090_v36  ;;  %v943_v55 = vrot.slane %v941_v48, 5  ;;  %v3588_v60 = vsel %vm8478_vm5, %v3586_v51, %v3587_v45  ;;  %v949_v61 = vrot.slane %v947_v52, 5  ;;  %v957_v62 = vshll.u32 %v688_v43, 16  ;;  %v696_v43 = vld [vmem:[%s8355_s5 + $0x88] sm:$0xf] }
  0x87   : > { %v912_v32 = vsel %vm8378_vm2, %v907_v23, %v911_v8  ;;  %v920_v35 = vor.u32 %v919_v25, %v916_v24  ;;  %v936_v59 = vsel %vm8378_vm2, %v931_v49, %v935_v40  ;;  %v953_v5 = vrot.slane %v951_v56, 4  ;;  %v692_v23 = vld [vmem:[%s8355_s5 + $0x78] sm:$0xf]  ;;  %v693_v24 = vld [vmem:[%s8355_s5 + $0x7c] sm:$0xf] }
  0x88   : > { %v6285_v38 = vcombine.low %v902_v47, %v912_v32  ;;  %v944_v3 = vor.u32 %v943_v55, %v940_v54  ;;  %v959_v6 = vrot.slane %v957_v62, 5  ;;  %v965_v8 = vshll.u32 %v689_v58, 16  ;;  %v694_v25 = vld [vmem:[%s8355_s5 + $0x80] sm:$0x1]  ;;  %v697_v48 = vld [vmem:[%s8355_s5 + $0x8c] sm:$0x1] }
  0x89   : > { %7379 = vmatpush3.bf16.msra.mxu1 %v8090_v36  ;;  %v6582_v36 = vrot.slane %v6564_v16, 9  ;;  %v921_v44 = vrot.slane %v920_v35, 4  ;;  %v971_v9 = vshll.u32 %v690_v63, 16  ;;  %v954_v11 = vor.u32 %v953_v5, %v949_v61  ;;  %v8092_v54 = vld [vmem:[%s9516_s1 + $0x1d0] sm:$0xff]  }
  0x8a   : > { %7380 = vmatprep.subr.bf16.mxu1 %v8094_v7  ;;  %7346 = vmatprep.mubr.bf16.mxu1 %v6285_v38  ;;  %v945_v10 = vrot.slane %v944_v3, 4  ;;  %v975_v12 = vshrl.u32 %v690_v63, 16  ;;  %v981_v13 = vshll.u32 %v691_v0, 16  ;;  %v967_v15 = vrot.slane %v965_v8, 5  ;;  %v8088_v38 = vld [vmem:[%s9516_s1 + $0x1c8] sm:$0xff]   ;;  %v8087_v63 = vld [vmem:[%s8355_s5 + $0x3c] sm:$0xff]  }
  0x8b   : > { %v3585_v50 = vsel %vm8478_vm5, %v6582_v36, %v3584_v41  ;;  %v926_v53 = vsel %vm8378_vm2, %v921_v44, %v925_v29  ;;  %v973_v16 = vrot.slane %v971_v9, 5  ;;  %v955_v19 = vrot.slane %v954_v11, 4  ;;  %v8089_v3 = vld [vmem:[%s8355_s5 + $0x48] sm:$0xff]   ;;  %v699_v8 = vld [vmem:[%s8355_s5 + $0x94] sm:$0xf] }
  0x8c   : > { %v6286_v1 = vcombine.low %v926_v53, %v936_v59  ;;  %v6614_v2 = vcombine.low %v3585_v50, %v3588_v60  ;;  %v950_v17 = vsel %vm8378_vm2, %v945_v10, %v949_v61  ;;  %v977_v20 = vrot.slane %v975_v12, 4  ;;  %v700_v9 = vld [vmem:[%s8355_s5 + $0x98] sm:$0x1] }
  0x8d   : > { %7381 = vmatpush3.bf16.msra.mxu1 %v8094_v7  ;;  %v962_v7 = vshrl.u32 %v689_v58, 16  ;;  %v983_v21 = vrot.slane %v981_v13, 5  ;;  %v960_v28 = vsel %vm8378_vm2, %v955_v19, %v959_v6  ;;  %v986_v30 = vshrl.u32 %v692_v23, 16 }
  0x8e   : > { %7414 = vmatprep.subr.bf16.mxu1 %v8724_v27  ;;  %7347 = vmatmul.mubr.bf16.gmra.mrb[12].mxu1 %v6286_v1  ;;  %v978_v29 = vor.u32 %v977_v20, %v973_v16  ;;  %v989_v31 = vshll.u32 %v692_v23, 16  ;;  %v6287_v32 = vcombine.low %v950_v17, %v960_v28  ;;  %v995_v35 = vshll.u32 %v693_v24, 16  ;;  %v701_v20 = vld [vmem:[%s8355_s5 + $0x9c] sm:$0xf] }
  0x8f   : > { %7555 = vmatmul.mubr.bf16.gmra.mrb[28].mxu0 %v6614_v2  ;;  %v964_v14 = vrot.slane %v962_v7, 4  ;;  %v999_v36 = vshrl.u32 %v693_v24, 16  ;;  %v988_v40 = vrot.slane %v986_v30, 4  ;;  %v1005_v42 = vshll.u32 %v694_v25, 16  ;;  %v698_v2 = vld [vmem:[%s8355_s5 + $0x90] sm:$0xf] }
  0x90   : > { %7574 = vmatprep.mubr.bf16.mxu0 %v8081_v57  ;;  %v979_v39 = vrot.slane %v978_v29, 4  ;;  %v991_v41 = vrot.slane %v989_v31, 5  ;;  %7350 = vmatprep.mubr.bf16.mxu1 %v6287_v32  ;;  %v997_v45 = vrot.slane %v995_v35, 5  ;;  %v1010_v49 = vshrl.u32 %v695_v37, 16  ;;  %v702_v24 = vld [vmem:[%s8355_s5 + $0xa0] sm:$0xf] }
  0x91   : > { %v968_v47 = vor.u32 %v967_v15, %v964_v14  ;;  %v1001_v46 = vrot.slane %v999_v36, 4  ;;  %v1007_v52 = vrot.slane %v1005_v42, 5  ;;  %v1013_v53 = vshll.u32 %v695_v37, 16  ;;  %v8096_v14 = vld [vmem:[%s9516_s1 + $0x1d8] sm:$0xff]   ;;  %v703_v29 = vld [vmem:[%s8355_s5 + $0xa4] sm:$0x1] }
  0x92   : > { %v984_v50 = vsel %vm8378_vm2, %v979_v39, %v983_v21  ;;  %v992_v51 = vor.u32 %v991_v41, %v988_v40  ;;  %v1012_v57 = vrot.slane %v1010_v49, 4  ;;  %v1019_v58 = vshll.u32 %v696_v43, 16  ;;  %v8100_v36 = vld [vmem:[%s9516_s1 + $0x1e0] sm:$0xff]  }
  0x93   : > { %v969_v34 = vrot.slane %v968_v47, 4  ;;  %v1002_v56 = vor.u32 %v1001_v46, %v997_v45  ;;  %v1015_v60 = vrot.slane %v1013_v53, 5  ;;  %v1023_v61 = vshrl.u32 %v696_v43, 16  ;;  %v704_v53 = vld [vmem:[%s8355_s5 + $0xa8] sm:$0xf] }
  0x94   : > { %v993_v59 = vrot.slane %v992_v51, 4  ;;  %v1029_v62 = vshll.u32 %v697_v48, 16  ;;  %v1021_v1 = vrot.slane %v1019_v58, 5  ;;  %v1034_v11 = vshrl.u32 %v698_v2, 16  ;;  %v706_v58 = vld [vmem:[%s8355_s5 + $0xb0] sm:$0x1] }
  0x95   : > { %v974_v44 = vsel %vm8378_vm2, %v969_v34, %v973_v16  ;;  %v1003_v0 = vrot.slane %v1002_v56, 4  ;;  %v1016_v5 = vor.u32 %v1015_v60, %v1012_v57  ;;  %v1025_v6 = vrot.slane %v1023_v61, 4 }
  0x96   : > { %v6288_v55 = vcombine.low %v974_v44, %v984_v50  ;;  %v1031_v7 = vrot.slane %v1029_v62, 5  ;;  %v1037_v12 = vshll.u32 %v698_v2, 16  ;;  %v1043_v13 = vshll.u32 %v699_v8, 16  ;;  %v8093_v50 = vld [vmem:[%s8355_s5 + $0x60] sm:$0xff]  }
  0x97   : > { %7575 = vmatmul.mubr.bf16.vlgmr.msra.gmra.mrb[0].mxu0 %v8083_v22  ;;  %v1008_v10 = vsel %vm8378_vm2, %v1003_v0, %v1007_v52  ;;  %v1017_v16 = vrot.slane %v1016_v5, 4  ;;  %v1026_v17 = vor.u32 %v1025_v6, %v1021_v1  ;;  %v1047_v19 = vshrl.u32 %v699_v8, 16  ;;  %v8104_v0 = vld [vmem:[%s9516_s1 + $0x1e8] sm:$0xff]   ;;  %v707_v5 = vld [vmem:[%s8355_s5 + $0xb4] sm:$0xf] }
  0x98   : > { %7607 = vmatpush3.bf16.msra.mxu0 %v8643_v18  ;;  %7578 = vmatprep.mubr.bf16.mxu0 %v8085_v26  ;;  %v998_v18 = vsel %vm8378_vm2, %v993_v59, %v997_v45  ;;  %v1036_v21 = vrot.slane %v1034_v11, 4  ;;  %v1039_v22 = vrot.slane %v1037_v12, 5  ;;  %v1045_v47 = vrot.slane %v1043_v13, 5  ;;  %v8091_v45 = vld [vmem:[%s8355_s5 + $0x54] sm:$0xff]  }
  0x99   : > { %7608 = vmatprep.subr.bf16.mxu0 %v8088_v38  ;;  %7351 = vmatmul.mubr.bf16.gmra.mrb[16].mxu1 %v6288_v55  ;;  %v6289_v15 = vcombine.low %v998_v18, %v1008_v10  ;;  %v1053_v23 = vshll.u32 %v700_v9, 16  ;;  %v1022_v25 = vsel %vm8378_vm2, %v1017_v16, %v1021_v1  ;;  %v1027_v26 = vrot.slane %v1026_v17, 4  ;;  %v708_v9 = vld [vmem:[%s8355_s5 + $0xb8] sm:$0xf]  ;;  %v709_v10 = vld [vmem:[%s8355_s5 + $0xbc] sm:$0x1] }
  0x9a   : > { %v1049_v28 = vrot.slane %v1047_v19, 4  ;;  %v1058_v30 = vshrl.u32 %v701_v20, 16  ;;  %v1040_v31 = vor.u32 %v1039_v22, %v1036_v21  ;;  %v1061_v34 = vshll.u32 %v701_v20, 16 }
  0x9b   : > { %7354 = vmatprep.mubr.bf16.mxu1 %v6289_v15  ;;  %v1055_v32 = vrot.slane %v1053_v23, 5  ;;  %v1067_v35 = vshll.u32 %v702_v24, 16  ;;  %v1032_v37 = vsel %vm8378_vm2, %v1027_v26, %v1031_v7  ;;  %v1071_v40 = vshrl.u32 %v702_v24, 16  ;;  %v8108_v15 = vld [vmem:[%s9516_s1 + $0x1f0] sm:$0xff]  }
  0x9c   : > { %7609 = vmatpush3.bf16.msra.mxu0 %v8088_v38  ;;  %v1050_v38 = vor.u32 %v1049_v28, %v1045_v47  ;;  %v1060_v39 = vrot.slane %v1058_v30, 4  ;;  %v6290_v41 = vcombine.low %v1022_v25, %v1032_v37  ;;  %v1041_v42 = vrot.slane %v1040_v31, 4  ;;  %v8095_v24 = vld [vmem:[%s8355_s5 + $0x6c] sm:$0xff]   ;;  %v1483_v37 = vld [vmem:[%s8355_s5] sm:$0xe] }
  0x9d   : > { %7610 = vmatprep.subr.bf16.mxu0 %v8092_v54  ;;  %v1063_v43 = vrot.slane %v1061_v34, 5  ;;  %v1069_v44 = vrot.slane %v1067_v35, 5  ;;  %v1073_v48 = vrot.slane %v1071_v40, 4  ;;  %v1077_v49 = vshll.u32 %v703_v29, 16  ;;  %v8097_v29 = vld [vmem:[%s8355_s5 + $0x78] sm:$0xff]  }
  0x9e   : > { %v1051_v46 = vrot.slane %v1050_v38, 4  ;;  %v1046_v51 = vsel %vm8378_vm2, %v1041_v42, %v1045_v47  ;;  %v1082_v59 = vshrl.u32 %v704_v53, 16  ;;  %v1085_v62 = vshll.u32 %v704_v53, 16  ;;  %v8112_v34 = vld [vmem:[%s9516_s1 + $0x1f8] sm:$0xff]   ;;  %v1484_v38 = vld [vmem:[%s8355_s5 + $0x4] sm:$0xf] }
  0x9f   : > { %7579 = vmatmul.mubr.bf16.gmra.mrb[4].mxu0 %v8087_v63  ;;  %v1064_v52 = vor.u32 %v1063_v43, %v1060_v39  ;;  %v1074_v56 = vor.u32 %v1073_v48, %v1069_v44  ;;  %v1079_v57 = vrot.slane %v1077_v49, 5  ;;  %v1101_v18 = vshll.u32 %v706_v58, 16  ;;  %v1485_v39 = vld [vmem:[%s8355_s5 + $0x8] sm:$0x1]  ;;  %v1486_v48 = vld [vmem:[%s8355_s5 + $0xc] sm:$0xe] }
  0xa0   : > { %7582 = vmatprep.mubr.bf16.mxu0 %v8089_v3  ;;  %7611 = vmatpush3.bf16.msra.mxu0 %v8092_v54  ;;  %v705_v54 = vld [vmem:[%s8355_s5 + $0xac] sm:$0xf]  ;;  %v1056_v55 = vsel %vm8378_vm2, %v1051_v46, %v1055_v32  ;;  %v1084_v2 = vrot.slane %v1082_v59, 4  ;;  %v1087_v7 = vrot.slane %v1085_v62, 5  ;;  %v1109_v19 = vshll.u32 %v707_v5, 16 }
  0xa1   : > { %7612 = vmatprep.subr.bf16.mxu0 %v8096_v14  ;;  %7355 = vmatmul.mubr.bf16.gmra.mrb[20].mxu1 %v6290_v41  ;;  %v6291_v60 = vcombine.low %v1046_v51, %v1056_v55  ;;  %v1065_v61 = vrot.slane %v1064_v52, 4  ;;  %v1091_v63 = vshll.u32 %v705_v54, 16  ;;  %v1075_v1 = vrot.slane %v1074_v56, 4  ;;  %v1487_v49 = vld [vmem:[%s8355_s5 + $0x10] sm:$0xf]  ;;  %v8099_v55 = vld [vmem:[%s8355_s5 + $0x84] sm:$0xff]  }
  0xa2   : > { %v1095_v3 = vshrl.u32 %v705_v54, 16  ;;  %v1103_v13 = vrot.slane %v1101_v18, 5  ;;  %v1088_v17 = vor.u32 %v1087_v7, %v1084_v2  ;;  %v1115_v20 = vshll.u32 %v708_v9, 16  ;;  %v1488_v53 = vld [vmem:[%s8355_s5 + $0x14] sm:$0x1]  ;;  %v8834_v56 = vld [vmem:[%s9516_s1 + $0x200] sm:$0xff]  }
  0xa3   : > { %7358 = vmatprep.mubr.bf16.mxu1 %v6291_v60  ;;  %v1070_v6 = vsel %vm8378_vm2, %v1065_v61, %v1069_v44  ;;  %v1093_v8 = vrot.slane %v1091_v63, 5  ;;  %v1080_v11 = vsel %vm8378_vm2, %v1075_v1, %v1079_v57  ;;  %v1119_v47 = vshrl.u32 %v708_v9, 16  ;;  %v1489_v1 = vld [vmem:[%s8355_s5 + $0x18] sm:$0xe]  ;;  %v8101_v2 = vld [vmem:[%s8355_s5 + $0x90] sm:$0xff]  }
  0xa4   : > { %7613 = vmatpush3.bf16.msra.mxu0 %v8096_v14  ;;  %v1097_v12 = vrot.slane %v1095_v3, 4  ;;  %v1106_v14 = vshrl.u32 %v707_v5, 16  ;;  %v6292_v16 = vcombine.low %v1070_v6, %v1080_v11  ;;  %v1125_v23 = vshll.u32 %v709_v10, 16  ;;  %v1490_v3 = vld [vmem:[%s8355_s5 + $0x1c] sm:$0xf] }
  0xa5   : > { %7614 = vmatprep.subr.bf16.mxu0 %v8100_v36  ;;  %v1089_v25 = vrot.slane %v1088_v17, 4  ;;  %v1111_v26 = vrot.slane %v1109_v19, 5  ;;  %v1117_v28 = vrot.slane %v1115_v20, 5  ;;  %v1121_v31 = vrot.slane %v1119_v47, 4  ;;  %v1491_v18 = vld [vmem:[%s8355_s5 + $0x20] sm:$0x1] }
  0xa6   : > { %v1098_v21 = vor.u32 %v1097_v12, %v1093_v8  ;;  %v1108_v22 = vrot.slane %v1106_v14, 4  ;;  %v1127_v32 = vrot.slane %v1125_v23, 5  ;;  %v6303_v42 = vrot.slane %v1483_v37, 9  ;;  %v1492_v10 = vld [vmem:[%s8355_s5 + $0x24] sm:$0xe]  ;;  %v8103_v47 = vld [vmem:[%s8355_s5 + $0x9c] sm:$0xff]  }
  0xa7   : > { %7583 = vmatmul.mubr.bf16.gmra.mrb[8].mxu0 %v8091_v45  ;;  %v1094_v35 = vsel %vm8378_vm2, %v1089_v25, %v1093_v8  ;;  %v1122_v41 = vor.u32 %v1121_v31, %v1117_v28  ;;  %v1616_v43 = vrot.slane %v1484_v38, 5  ;;  %v1619_v46 = vrot.slane %v1485_v39, 5  ;;  %v1493_v11 = vld [vmem:[%s8355_s5 + $0x28] sm:$0xf]  ;;  %v1494_v12 = vld [vmem:[%s8355_s5 + $0x2c] sm:$0x1] }
  0xa8   : > { %7586 = vmatprep.mubr.bf16.mxu0 %v8093_v50  ;;  %7615 = vmatpush3.bf16.msra.mxu0 %v8100_v36  ;;  %v1099_v30 = vrot.slane %v1098_v21, 4  ;;  %v1112_v36 = vor.u32 %v1111_v26, %v1108_v22  ;;  %v6304_v54 = vrot.slane %v1486_v48, 9  ;;  %v1623_v58 = vrot.slane %v1487_v49, 5  ;;  %v8102_v22 = vld [vmem:[%s9516_s1 + $0xc8] sm:$0xff]   ;;  %v1496_v25 = vld [vmem:[%s8355_s5 + $0x34] sm:$0xf] }
  0xa9   : > { %7616 = vmatprep.subr.bf16.mxu0 %v8104_v0  ;;  %7359 = vmatmul.mubr.bf16.gmra.mrb[24].mxu1 %v6292_v16  ;;  %v1123_v50 = vrot.slane %v1122_v41, 4  ;;  %v1617_v51 = vsel %vm8478_vm5, %v6303_v42, %v1616_v43  ;;  %v1618_v52 = vrot.slane %v1616_v43, 4  ;;  %v1626_v59 = vrot.slane %v1488_v53, 5  ;;  %v1497_v26 = vld [vmem:[%s8355_s5 + $0x38] sm:$0x1]  ;;  %v8105_v31 = vld [vmem:[%s8355_s5 + $0xa8] sm:$0xff]  }
  0xaa   : > { %v1104_v40 = vsel %vm8378_vm2, %v1099_v30, %v1103_v13  ;;  %v1113_v45 = vrot.slane %v1112_v36, 4  ;;  %v6305_v5 = vrot.slane %v1489_v1, 9  ;;  %v1630_v6 = vrot.slane %v1490_v3, 5  ;;  %v1500_v36 = vld [vmem:[%s8355_s5 + $0x44] sm:$0x1]  ;;  %v8107_v48 = vld [vmem:[%s8355_s5 + $0xb4] sm:$0xff]  }
  0xab   : > { %v6293_v44 = vcombine.low %v1094_v35, %v1104_v40  ;;  %v1128_v60 = vsel %vm8378_vm2, %v1123_v50, %v1127_v32  ;;  %v1620_v61 = vsel %vm8478_vm5, %v1618_v52, %v1619_v46  ;;  %v1633_v7 = vrot.slane %v1491_v18, 5  ;;  %v1498_v32 = vld [vmem:[%s8355_s5 + $0x3c] sm:$0xe]  ;;  %v1499_v35 = vld [vmem:[%s8355_s5 + $0x40] sm:$0xf]  ;;  %v8106_v40 = vld [vmem:[%s9516_s1 + $0xd0] sm:$0xff]  }
  0xac   : > { %7617 = vmatpush3.bf16.msra.mxu0 %v8104_v0  ;;  %v1118_v57 = vsel %vm8378_vm2, %v1113_v45, %v1117_v28  ;;  %v6335_v63 = vcombine.low %v1617_v51, %v1620_v61  ;;  %v1625_v0 = vrot.slane %v1623_v58, 4  ;;  %v1624_v8 = vsel %vm8478_vm5, %v6304_v54, %v1623_v58  ;;  %v1502_v49 = vld [vmem:[%s8355_s5 + $0x4c] sm:$0xf]  ;;  %v1503_v50 = vld [vmem:[%s8355_s5 + $0x50] sm:$0x1]  ;;  %v8110_v52 = vld [vmem:[%s9516_s1 + $0xd8] sm:$0xff]  }
  0xad   : > { %7618 = vmatprep.subr.bf16.mxu0 %v8108_v15  ;;  %7362 = vmatprep.mubr.bf16.mxu1 %v6293_v44  ;;  %v6294_v62 = vcombine.low %v1118_v57, %v1128_v60  ;;  %v1631_v13 = vsel %vm8478_vm5, %v6305_v5, %v1630_v6  ;;  %v1632_v14 = vrot.slane %v1630_v6, 4  ;;  %v6306_v16 = vrot.slane %v1492_v10, 9  ;;  %v1501_v44 = vld [vmem:[%s8355_s5 + $0x48] sm:$0xe]  ;;  %v1504_v57 = vld [vmem:[%s8355_s5 + $0x54] sm:$0xe] }
  0xae   : > { %v1627_v9 = vsel %vm8478_vm5, %v1625_v0, %v1626_v59  ;;  %v1640_v21 = vrot.slane %v1494_v12, 5  ;;  %v1647_v30 = vrot.slane %v1497_v26, 5  ;;  %v1651_v39 = vrot.slane %v1499_v35, 5  ;;  %v1505_v58 = vld [vmem:[%s8355_s5 + $0x58] sm:$0xf]  ;;  %v8109_v61 = vld [vmem:[%s8355_s5 + $0xc0] sm:$0xff]  }
  0xaf   : > { %7587 = vmatmul.mubr.bf16.gmra.mrb[12].mxu0 %v8095_v24  ;;  %v6336_v17 = vcombine.low %v1624_v8, %v1627_v9  ;;  %v1634_v19 = vsel %vm8478_vm5, %v1632_v14, %v1633_v7  ;;  %v1495_v24 = vld [vmem:[%s8355_s5 + $0x30] sm:$0xe]  ;;  %v6308_v42 = vrot.slane %v1498_v32, 9  ;;  %v1654_v43 = vrot.slane %v1500_v36, 5  ;;  %v1506_v59 = vld [vmem:[%s8355_s5 + $0x5c] sm:$0x1] }
  0xb0   : > { %7590 = vmatprep.mubr.bf16.mxu0 %v8097_v29  ;;  %7619 = vmatpush3.bf16.msra.mxu0 %v8108_v15  ;;  %v1637_v15 = vrot.slane %v1493_v11, 5  ;;  %v6337_v23 = vcombine.low %v1631_v13, %v1634_v19  ;;  %v6307_v28 = vrot.slane %v1495_v24, 9  ;;  %v1644_v29 = vrot.slane %v1496_v25, 5  ;;  %v8113_v6 = vld [vmem:[%s9516_s1 + $0xe0] sm:$0xff]   ;;  %v1509_v11 = vld [vmem:[%s8355_s5 + $0x68] sm:$0x1] }
  0xb1   : > { %7620 = vmatprep.subr.bf16.mxu0 %v8112_v34  ;;  %7363 = vmatmul.mubr.bf16.gmra.mrb[28].mxu1 %v6294_v62  ;;  %v1653_v46 = vrot.slane %v1651_v39, 4  ;;  %v6309_v51 = vrot.slane %v1501_v44, 9  ;;  %v1658_v54 = vrot.slane %v1502_v49, 5  ;;  %v6310_v62 = vrot.slane %v1504_v57, 9  ;;  %v1507_v7 = vld [vmem:[%s8355_s5 + $0x60] sm:$0xe] }
  0xb2   : > { %7382 = vmatprep.mubr.bf16.mxu1 %v6335_v63  ;;  %v1639_v20 = vrot.slane %v1637_v15, 4  ;;  %v1638_v37 = vsel %vm8478_vm5, %v6306_v16, %v1637_v15  ;;  %v1665_v63 = vrot.slane %v1505_v58, 5  ;;  %v1652_v0 = vsel %vm8478_vm5, %v6308_v42, %v1651_v39  ;;  %v1508_v8 = vld [vmem:[%s8355_s5 + $0x64] sm:$0xf]  ;;  %v6695_v13 = vld [vmem:[%s8355_s5 + $0x18] sm:$0xf] }
  0xb3   : > { %v1660_v60 = vrot.slane %v1658_v54, 4  ;;  %v1655_v1 = vsel %vm8478_vm5, %v1653_v46, %v1654_v43  ;;  %v1659_v3 = vsel %vm8478_vm5, %v6309_v51, %v1658_v54  ;;  %v1672_v12 = vrot.slane %v1508_v8, 5  ;;  %v8111_v16 = vld [vmem:[%s8355_s5 + $0xcc] sm:$0xff]   ;;  %v6696_v19 = vld [vmem:[%s8355_s5 + $0x1c] sm:$0xf] }
  0xb4   : > { %7621 = vmatpush3.bf16.msra.mxu0 %v8112_v34  ;;  %v1646_v34 = vrot.slane %v1644_v29, 4  ;;  %v1641_v38 = vsel %vm8478_vm5, %v1639_v20, %v1640_v21  ;;  %v1667_v5 = vrot.slane %v1665_v63, 4  ;;  %v6340_v9 = vcombine.low %v1652_v0, %v1655_v1  ;;  %v6697_v20 = vld [vmem:[%s8355_s5 + $0x20] sm:$0x1]  ;;  %v1510_v26 = vld [vmem:[%s8355_s5 + $0x6c] sm:$0xe] }
  0xb5   : > { %7654 = vmatprep.subr.bf16.mxu0 %v8834_v56  ;;  %v6338_v45 = vcombine.low %v1638_v37, %v1641_v38  ;;  %v8907_v10 = vsel %vm8478_vm5, %v6310_v62, %v1665_v63  ;;  %v4475_v21 = vshrl.u32 %v6695_v13, 16  ;;  %v4478_v24 = vshll.u32 %v6695_v13, 16  ;;  %v1512_v36 = vld [vmem:[%s8355_s5 + $0x74] sm:$0x1]  ;;  %v6698_v46 = vld [vmem:[%s8355_s5 + $0x24] sm:$0xf] }
  0xb6   : > { %v1648_v41 = vsel %vm8478_vm5, %v1646_v34, %v1647_v30  ;;  %v4484_v25 = vshll.u32 %v6696_v19, 16  ;;  %v4494_v30 = vshll.u32 %v6697_v20, 16  ;;  %v6312_v32 = vrot.slane %v1510_v26, 9  ;;  %v6700_v51 = vld [vmem:[%s8355_s5 + $0x2c] sm:$0x1] }
  0xb7   : > { %7591 = vmatmul.mubr.bf16.gmra.mrb[16].mxu0 %v8099_v55  ;;  %v1661_v55 = vrot.slane %v1503_v50, 5  ;;  %v4480_v34 = vrot.slane %v4478_v24, 5  ;;  %v6699_v50 = vld [vmem:[%s8355_s5 + $0x28] sm:$0xf]  ;;  %v1515_v8 = vld [vmem:[%s8355_s5 + $0x80] sm:$0x1] }
  0xb8   : > { %7594 = vmatprep.mubr.bf16.mxu0 %v8101_v2  ;;  %v1668_v2 = vrot.slane %v1506_v59, 5  ;;  %v4486_v35 = vrot.slane %v4484_v25, 5  ;;  %v4496_v44 = vrot.slane %v4494_v30, 5  ;;  %v4508_v57 = vshll.u32 %v6699_v50, 16  ;;  %v6703_v20 = vld [vmem:[%s8355_s5 + $0x38] sm:$0x1] }
  0xb9   : > { %7383 = vmatmul.mubr.bf16.vlgmr.msra.gmra.mrb[0].mxu1 %v6336_v17  ;;  %v1662_v18 = vsel %vm8478_vm5, %v1660_v60, %v1661_v55  ;;  %v6311_v17 = vrot.slane %v1507_v7, 9  ;;  %v4512_v58 = vshrl.u32 %v6699_v50, 16  ;;  %v1514_v7 = vld [vmem:[%s8355_s5 + $0x7c] sm:$0xf]  ;;  %v1516_v26 = vld [vmem:[%s8355_s5 + $0x84] sm:$0xe] }
  0xba   : > { %7415 = vmatpush3.bf16.msra.mxu1 %v8724_v27  ;;  %7386 = vmatprep.mubr.bf16.mxu1 %v6337_v23  ;;  %v1645_v27 = vsel %vm8478_vm5, %v6307_v28, %v1644_v29  ;;  %v6341_v14 = vcombine.low %v1659_v3, %v1662_v18  ;;  %v8913_v15 = vsel %vm8478_vm5, %v1667_v5, %v1668_v2  ;;  %v1675_v23 = vrot.slane %v1509_v11, 5  ;;  %v1513_v3 = vld [vmem:[%s8355_s5 + $0x78] sm:$0xe] }
  0xbb   : > { %7416 = vmatprep.subr.bf16.mxu1 %v8102_v22  ;;  %v6339_v53 = vcombine.low %v1645_v27, %v1648_v41  ;;  %v4477_v28 = vrot.slane %v4475_v21, 4  ;;  %v4488_v29 = vshrl.u32 %v6696_v19, 16  ;;  %v6342_v38 = vcombine.low %v8907_v10, %v8913_v15  ;;  %v8117_v41 = vld [vmem:[%s9516_s1 + $0xf0] sm:$0xff]   ;;  %v8119_v10 = vld [vmem:[%s9516_s1 + $0xf8] sm:$0xff]  }
  0xbc   : > { %v1673_v39 = vsel %vm8478_vm5, %v6311_v17, %v1672_v12  ;;  %v1682_v27 = vrot.slane %v1512_v36, 5  ;;  %v4510_v0 = vrot.slane %v4508_v57, 5  ;;  %v4514_v1 = vrot.slane %v4512_v58, 4  ;;  %v6701_v15 = vld [vmem:[%s8355_s5 + $0x30] sm:$0xf] }
  0xbd   : > { %v4481_v43 = vor.u32 %v4480_v34, %v4477_v28  ;;  %v4518_v2 = vshll.u32 %v6700_v51, 16  ;;  %v1689_v19 = vrot.slane %v1515_v8, 5  ;;  %v4523_v21 = vshrl.u32 %v6701_v15, 16 }
  0xbe   : > { %7417 = vmatpush3.bf16.msra.mxu1 %v8102_v22  ;;  %v8115_v22 = vld [vmem:[%s9516_s1 + $0xe8] sm:$0xff]  }
  0xbf   : > { %7595 = vmatmul.mubr.bf16.gmra.mrb[20].mxu0 %v8103_v47  ;;  %7418 = vmatprep.subr.bf16.mxu1 %v8106_v40  ;;  %v1674_v47 = vrot.slane %v1672_v12, 4  ;;  %v4482_v54 = vrot.slane %v4481_v43, 4  ;;  %v4515_v12 = vor.u32 %v4514_v1, %v4510_v0  ;;  %v4520_v13 = vrot.slane %v4518_v2, 5  ;;  %v6704_v43 = vld [vmem:[%s8355_s5 + $0x3c] sm:$0xf] }
  0xc0   : > { %7598 = vmatprep.mubr.bf16.mxu0 %v8105_v31  ;;  %v1511_v31 = vld [vmem:[%s8355_s5 + $0x70] sm:$0xf] }
  0xc1   : > { %7387 = vmatmul.mubr.bf16.gmra.mrb[4].mxu1 %v6338_v45  ;;  %v1679_v37 = vrot.slane %v1511_v31, 5  ;;  %v1676_v42 = vsel %vm8478_vm5, %v1674_v47, %v1675_v23  ;;  %v4487_v63 = vsel %vm8378_vm2, %v4482_v54, %v4486_v35  ;;  %v4516_v47 = vrot.slane %v4515_v12, 4  ;;  %v8120_v12 = vld [vmem:[%s9516_s1 + $0x218] sm:$0xff]  }
  0xc2   : > { %7390 = vmatprep.mubr.bf16.mxu1 %v6339_v53  ;;  %7419 = vmatpush3.bf16.msra.mxu1 %v8106_v40  ;;  %v4490_v40 = vrot.slane %v4488_v29, 4  ;;  %v4502_v53 = vshll.u32 %v6698_v46, 16  ;;  %v6343_v59 = vcombine.low %v1673_v39, %v1676_v42  ;;  %v4525_v29 = vrot.slane %v4523_v21, 4 }
  0xc3   : > { %7420 = vmatprep.subr.bf16.mxu1 %v8110_v52  ;;  %v1681_v45 = vrot.slane %v1679_v37, 4  ;;  %v8936_v49 = vsel %vm8478_vm5, %v6312_v32, %v1679_v37  ;;  %v1517_v32 = vld [vmem:[%s8355_s5 + $0x88] sm:$0xf]  ;;  %v4521_v34 = vsel %vm8378_vm2, %v4516_v47, %v4520_v13  ;;  %v4542_v37 = vshll.u32 %v6703_v20, 16 }
  0xc4   : > { %v4504_v62 = vrot.slane %v4502_v53, 5  ;;  %v4547_v53 = vshrl.u32 %v6704_v43, 16  ;;  %v4550_v54 = vshll.u32 %v6704_v43, 16 }
  0xc5   : > { %v8942_v55 = vsel %vm8478_vm5, %v1681_v45, %v1682_v27  ;;  %v6314_v45 = vrot.slane %v1516_v26, 9 }
  0xc6   : > { %7421 = vmatpush3.bf16.msra.mxu1 %v8110_v52  ;;  %v4499_v52 = vshrl.u32 %v6698_v46, 16  ;;  %v6344_v5 = vcombine.low %v8936_v49, %v8942_v55  ;;  %v1693_v46 = vrot.slane %v1517_v32, 5  ;;  %v6705_v49 = vld [vmem:[%s8355_s5 + $0x40] sm:$0xf] }
  0xc7   : > { %7599 = vmatmul.mubr.bf16.gmra.mrb[24].mxu0 %v8107_v48  ;;  %7422 = vmatprep.subr.bf16.mxu1 %v8113_v6  ;;  %v4491_v48 = vor.u32 %v4490_v40, %v4486_v35  ;;  %v4556_v58 = vshll.u32 %v6705_v49, 16 }
  0xc8   : > { %7602 = vmatprep.mubr.bf16.mxu0 %v8109_v61  ;;  %v4501_v61 = vrot.slane %v4499_v52, 4  ;;  %v6706_v52 = vld [vmem:[%s8355_s5 + $0x44] sm:$0x1]  ;;  %v1694_v55 = vsel %vm8478_vm5, %v6314_v45, %v1693_v46  ;;  %v1695_v57 = vrot.slane %v1693_v46, 4 }
  0xc9   : > { %7391 = vmatmul.mubr.bf16.gmra.mrb[8].mxu1 %v6340_v9  ;;  %v4492_v60 = vrot.slane %v4491_v48, 4  ;;  %v6313_v9 = vrot.slane %v1513_v3, 9  ;;  %v4558_v2 = vrot.slane %v4556_v58, 5  ;;  %v8123_v45 = vld [vmem:[%s9516_s1 + $0x220] sm:$0xff]  }
  0xca   : > { %7394 = vmatprep.mubr.bf16.mxu1 %v6341_v14  ;;  %7423 = vmatpush3.bf16.msra.mxu1 %v8113_v6  ;;  %v4505_v6 = vor.u32 %v4504_v62, %v4501_v61  ;;  %v1686_v14 = vrot.slane %v1514_v7, 5  ;;  %v4549_v62 = vrot.slane %v4547_v53, 4 }
  0xcb   : > { %7424 = vmatprep.subr.bf16.mxu1 %v8115_v22  ;;  %v4497_v18 = vsel %vm8378_vm2, %v4492_v60, %v4496_v44  ;;  %v4544_v44 = vrot.slane %v4542_v37, 5  ;;  %v8982_v60 = vld [vmem:[%s9516_s1 + $0x100] sm:$0xff]  }
  0xcc   : > { %v6759_v11 = vcombine.low %v4487_v63, %v4497_v18  ;;  %v4506_v17 = vrot.slane %v4505_v6, 4  ;;  %v1687_v23 = vsel %vm8478_vm5, %v6313_v9, %v1686_v14  ;;  %v1688_v24 = vrot.slane %v1686_v14, 4  ;;  %v1520_v9 = vld [vmem:[%s8355_s5 + $0x94] sm:$0xf] }
  0xcd   : > { %v4552_v63 = vrot.slane %v4550_v54, 5  ;;  %v4566_v18 = vshll.u32 %v6706_v52, 16  ;;  %v6712_v54 = vld [vmem:[%s8355_s5 + $0x5c] sm:$0x1] }
  0xce   : > { %7425 = vmatpush3.bf16.msra.mxu1 %v8115_v22  ;;  %v4526_v22 = vshll.u32 %v6701_v15, 16  ;;  %v4511_v28 = vsel %vm8378_vm2, %v4506_v17, %v4510_v0  ;;  %v1690_v35 = vsel %vm8478_vm5, %v1688_v24, %v1689_v19  ;;  %v8118_v0 = vld [vmem:[%s9516_s1 + $0x210] sm:$0xff]   ;;  %v6707_v17 = vld [vmem:[%s8355_s5 + $0x48] sm:$0xf]  ;;  %v6708_v19 = vld [vmem:[%s8355_s5 + $0x4c] sm:$0xf] }
  0xcf   : > { %7603 = vmatmul.mubr.bf16.gmra.mrb[28].mxu0 %v8111_v16  ;;  %7426 = vmatprep.subr.bf16.mxu1 %v8117_v41  ;;  %v6702_v16 = vld [vmem:[%s8355_s5 + $0x34] sm:$0xf]  ;;  %v6760_v39 = vcombine.low %v4511_v28, %v4521_v34  ;;  %v6345_v40 = vcombine.low %v1687_v23, %v1690_v35  ;;  %v4553_v8 = vor.u32 %v4552_v63, %v4549_v62  ;;  %v4568_v15 = vrot.slane %v4566_v18, 5  ;;  %v1523_v35 = vld [vmem:[%s8355_s5 + $0xa0] sm:$0xf] }
  0xd0   : > { %7622 = vmatprep.mubr.bf16.mxu0 %v6759_v11  ;;  %v4532_v25 = vshll.u32 %v6702_v16, 16  ;;  %v4528_v30 = vrot.slane %v4526_v22, 5  ;;  %v4536_v31 = vshrl.u32 %v6702_v16, 16  ;;  %v1700_v16 = vrot.slane %v1520_v9, 5  ;;  %v6709_v22 = vld [vmem:[%s8355_s5 + $0x50] sm:$0x1] }
  0xd1   : > { %7395 = vmatmul.mubr.bf16.gmra.mrb[12].mxu1 %v6342_v38  ;;  %v1518_v38 = vld [vmem:[%s8355_s5 + $0x8c] sm:$0x1]  ;;  %v4554_v20 = vrot.slane %v4553_v8, 4  ;;  %v4571_v47 = vshrl.u32 %v6707_v17, 16  ;;  %v4574_v23 = vshll.u32 %v6707_v17, 16  ;;  %v4580_v28 = vshll.u32 %v6708_v19, 16 }
  0xd2   : > { %7398 = vmatprep.mubr.bf16.mxu1 %v6343_v59  ;;  %7427 = vmatpush3.bf16.msra.mxu1 %v8117_v41  ;;  %v4534_v36 = vrot.slane %v4532_v25, 5  ;;  %v4529_v27 = vor.u32 %v4528_v30, %v4525_v29  ;;  %v4538_v42 = vrot.slane %v4536_v31, 4  ;;  %v8116_v41 = vld [vmem:[%s9516_s1 + $0x208] sm:$0xff]   ;;  %v1696_v48 = vrot.slane %v1518_v38, 5  ;;  %v1522_v29 = vld [vmem:[%s8355_s5 + $0x9c] sm:$0xe] }
  0xd3   : > { %7428 = vmatprep.subr.bf16.mxu1 %v8119_v10  ;;  %v4560_v59 = vshrl.u32 %v6705_v49, 16  ;;  %v1702_v26 = vrot.slane %v1700_v16, 4  ;;  %v4559_v30 = vsel %vm8378_vm2, %v4554_v20, %v4558_v2  ;;  %v4573_v31 = vrot.slane %v4571_v47, 4  ;;  %v6713_v20 = vld [vmem:[%s8355_s5 + $0x60] sm:$0xf] }
  0xd4   : > { %v4530_v50 = vrot.slane %v4529_v27, 4  ;;  %v4539_v51 = vor.u32 %v4538_v42, %v4534_v36  ;;  %v1697_v1 = vsel %vm8478_vm5, %v1695_v57, %v1696_v48  ;;  %v4576_v32 = vrot.slane %v4574_v23, 5  ;;  %v6715_v23 = vld [vmem:[%s8355_s5 + $0x68] sm:$0x1] }
  0xd5   : > { %v4562_v3 = vrot.slane %v4560_v59, 4  ;;  %v6346_v7 = vcombine.low %v1694_v55, %v1697_v1  ;;  %v4584_v34 = vshrl.u32 %v6708_v19, 16  ;;  %v4582_v38 = vrot.slane %v4580_v28, 5 }
  0xd6   : > { %7429 = vmatpush3.bf16.msra.mxu1 %v8119_v10  ;;  %v4535_v61 = vsel %vm8378_vm2, %v4530_v50, %v4534_v36  ;;  %v1521_v10 = vld [vmem:[%s8355_s5 + $0x98] sm:$0x1]  ;;  %v4577_v43 = vor.u32 %v4576_v32, %v4573_v31  ;;  %v6316_v48 = vrot.slane %v1522_v29, 9  ;;  %v1707_v49 = vrot.slane %v1523_v35, 5  ;;  %v1528_v31 = vld [vmem:[%s8355_s5 + $0xb4] sm:$0xe] }
  0xd7   : > { %7623 = vmatmul.mubr.bf16.vlgmr.msra.gmra.mrb[0].mxu0 %v6760_v39  ;;  %7702 = vmatprep.subr.bf16.mxu1 %v8982_v60  ;;  %v4563_v14 = vor.u32 %v4562_v3, %v4558_v2  ;;  %v1703_v21 = vrot.slane %v1521_v10, 5  ;;  %v4590_v39 = vshll.u32 %v6709_v22, 16  ;;  %v8126_v2 = vld [vmem:[%s9516_s1 + $0x228] sm:$0xff]  }
  0xd8   : > { %7655 = vmatpush3.bf16.msra.mxu0 %v8834_v56  ;;  %v4540_v56 = vrot.slane %v4539_v51, 4  ;;  %v6711_v51 = vld [vmem:[%s8355_s5 + $0x58] sm:$0xf]  ;;  %v4578_v52 = vrot.slane %v4577_v43, 4  ;;  %v1708_v58 = vsel %vm8478_vm5, %v6316_v48, %v1707_v49  ;;  %v1709_v59 = vrot.slane %v1707_v49, 4 }
  0xd9   : > { %7399 = vmatmul.mubr.bf16.gmra.mrb[16].mxu1 %v6344_v5  ;;  %7656 = vmatprep.subr.bf16.mxu0 %v8116_v41  ;;  %v1519_v5 = vld [vmem:[%s8355_s5 + $0x90] sm:$0xe]  ;;  %v4564_v24 = vrot.slane %v4563_v14, 4  ;;  %v1704_v37 = vsel %vm8478_vm5, %v1702_v26, %v1703_v21  ;;  %v4592_v46 = vrot.slane %v4590_v39, 5  ;;  %v6714_v21 = vld [vmem:[%s8355_s5 + $0x64] sm:$0xf] }
  0xda   : > { %7402 = vmatprep.mubr.bf16.mxu1 %v6345_v40  ;;  %v4545_v6 = vsel %vm8378_vm2, %v4540_v56, %v4544_v44  ;;  %v6315_v11 = vrot.slane %v1519_v5, 9  ;;  %v1524_v40 = vld [vmem:[%s8355_s5 + $0xa4] sm:$0x1]  ;;  %v6710_v44 = vld [vmem:[%s8355_s5 + $0x54] sm:$0xf]  ;;  %v4608_v56 = vshrl.u32 %v6711_v51, 16  ;;  %v4583_v62 = vsel %vm8378_vm2, %v4578_v52, %v4582_v38 }
  0xdb   : > { %v6761_v13 = vcombine.low %v4535_v61, %v4545_v6  ;;  %v4569_v36 = vsel %vm8378_vm2, %v4564_v24, %v4568_v15  ;;  %v1710_v50 = vrot.slane %v1524_v40, 5  ;;  %v4595_v55 = vshrl.u32 %v6710_v44, 16  ;;  %v8129_v14 = vld [vmem:[%s9516_s1 + $0x230] sm:$0xff]   ;;  %v8132_v48 = vld [vmem:[%s9516_s1 + $0x238] sm:$0xff]  }
  0xdc   : > { %7657 = vmatpush3.bf16.msra.mxu0 %v8116_v41  ;;  %v1701_v25 = vsel %vm8478_vm5, %v6315_v11, %v1700_v16  ;;  %v6762_v27 = vcombine.low %v4559_v30, %v4569_v36  ;;  %v4586_v41 = vrot.slane %v4584_v34, 4  ;;  %v4598_v57 = vshll.u32 %v6710_v44, 16  ;;  %v1526_v11 = vld [vmem:[%s8355_s5 + $0xac] sm:$0xf] }
  0xdd   : > { %7658 = vmatprep.subr.bf16.mxu0 %v8118_v0  ;;  %7626 = vmatprep.mubr.bf16.mxu0 %v6761_v13  ;;  %v6347_v42 = vcombine.low %v1701_v25, %v1704_v37  ;;  %v4604_v61 = vshll.u32 %v6711_v51, 16  ;;  %v1711_v3 = vsel %vm8478_vm5, %v1709_v59, %v1710_v50  ;;  %v4610_v5 = vrot.slane %v4608_v56, 4  ;;  %v1529_v37 = vld [vmem:[%s8355_s5 + $0xb8] sm:$0xf] }
  0xde   : > { %v4587_v53 = vor.u32 %v4586_v41, %v4582_v38  ;;  %v4600_v1 = vrot.slane %v4598_v57, 5  ;;  %v4614_v6 = vshll.u32 %v6712_v54, 16  ;;  %v6348_v9 = vcombine.low %v1708_v58, %v1711_v3  ;;  %v6718_v57 = vld [vmem:[%s8355_s5 + $0x74] sm:$0x1] }
  0xdf   : > { %7627 = vmatmul.mubr.bf16.gmra.mrb[4].mxu0 %v6762_v27  ;;  %v4606_v18 = vrot.slane %v4604_v61, 5  ;;  %v1714_v19 = vrot.slane %v1526_v11, 5  ;;  %v4619_v24 = vshrl.u32 %v6713_v20, 16  ;;  %v4622_v25 = vshll.u32 %v6713_v20, 16 }
  0xe0   : > { %7659 = vmatpush3.bf16.msra.mxu0 %v8118_v0  ;;  %v4588_v63 = vrot.slane %v4587_v53, 4  ;;  %v4597_v0 = vrot.slane %v4595_v55, 4  ;;  %v4616_v17 = vrot.slane %v4614_v6, 5  ;;  %v4628_v30 = vshll.u32 %v6714_v21, 16  ;;  %v6717_v53 = vld [vmem:[%s8355_s5 + $0x70] sm:$0xf] }
  0xe1   : > { %7403 = vmatmul.mubr.bf16.gmra.mrb[20].mxu1 %v6346_v7  ;;  %7660 = vmatprep.subr.bf16.mxu0 %v8120_v12  ;;  %v1525_v7 = vld [vmem:[%s8355_s5 + $0xa8] sm:$0xe]  ;;  %v4611_v16 = vor.u32 %v4610_v5, %v4606_v18  ;;  %v1716_v29 = vrot.slane %v1714_v19, 4  ;;  %v4621_v34 = vrot.slane %v4619_v24, 4  ;;  %v4624_v35 = vrot.slane %v4622_v25, 5 }
  0xe2   : > { %7406 = vmatprep.mubr.bf16.mxu1 %v6347_v42  ;;  %v4593_v8 = vsel %vm8378_vm2, %v4588_v63, %v4592_v46  ;;  %v4601_v10 = vor.u32 %v4600_v1, %v4597_v0  ;;  %v6317_v13 = vrot.slane %v1525_v7, 9  ;;  %v4632_v36 = vshrl.u32 %v6714_v21, 16  ;;  %v1530_v42 = vld [vmem:[%s8355_s5 + $0xbc] sm:$0x1]  ;;  %v6716_v46 = vld [vmem:[%s8355_s5 + $0x6c] sm:$0xf] }
  0xe3   : > { %v6763_v15 = vcombine.low %v4583_v62, %v4593_v8  ;;  %v4612_v26 = vrot.slane %v4611_v16, 4  ;;  %v4630_v40 = vrot.slane %v4628_v30, 5  ;;  %v4638_v27 = vshll.u32 %v6715_v23, 16  ;;  %v8121_v8 = vld [vmem:[%s8355_s5 + $0xc] sm:$0xff]  }
  0xe4   : > { %7661 = vmatpush3.bf16.msra.mxu0 %v8120_v12  ;;  %v1527_v12 = vld [vmem:[%s8355_s5 + $0xb0] sm:$0x1]  ;;  %v4602_v22 = vrot.slane %v4601_v10, 4  ;;  %v1715_v28 = vsel %vm8478_vm5, %v6317_v13, %v1714_v19  ;;  %v4625_v44 = vor.u32 %v4624_v35, %v4621_v34  ;;  %v6318_v50 = vrot.slane %v1528_v31, 9  ;;  %v6720_v13 = vld [vmem:[%s8355_s5 + $0x7c] sm:$0xf] }
  0xe5   : > { %7662 = vmatprep.subr.bf16.mxu0 %v8123_v45  ;;  %v1717_v47 = vrot.slane %v1527_v12, 5  ;;  %7630 = vmatprep.mubr.bf16.mxu0 %v6763_v15  ;;  %v4617_v38 = vsel %vm8378_vm2, %v4612_v26, %v4616_v17  ;;  %v4640_v49 = vrot.slane %v4638_v27, 5  ;;  %v1721_v51 = vrot.slane %v1529_v37, 5  ;;  %v6719_v12 = vld [vmem:[%s8355_s5 + $0x78] sm:$0xf] }
  0xe6   : > { %v4607_v32 = vsel %vm8378_vm2, %v4602_v22, %v4606_v18  ;;  %v1724_v52 = vrot.slane %v1530_v42, 5  ;;  %v4626_v54 = vrot.slane %v4625_v44, 4  ;;  %v4643_v58 = vshrl.u32 %v6716_v46, 16  ;;  %v6721_v17 = vld [vmem:[%s8355_s5 + $0x80] sm:$0x1] }
  0xe7   : > { %v1718_v39 = vsel %vm8478_vm5, %v1716_v29, %v1717_v47  ;;  %v6764_v43 = vcombine.low %v4607_v32, %v4617_v38  ;;  %v4646_v59 = vshll.u32 %v6716_v46, 16  ;;  %v1722_v61 = vsel %vm8478_vm5, %v6318_v50, %v1721_v51  ;;  %v6722_v26 = vld [vmem:[%s8355_s5 + $0x84] sm:$0xf]  ;;  %v6723_v32 = vld [vmem:[%s8355_s5 + $0x88] sm:$0xf] }
  0xe8   : > { %7663 = vmatpush3.bf16.msra.mxu0 %v8123_v45  ;;  %v6349_v41 = vcombine.low %v1715_v28, %v1718_v39  ;;  %v4634_v45 = vrot.slane %v4632_v36, 4  ;;  %v1723_v56 = vrot.slane %v1721_v51, 4  ;;  %v4652_v62 = vshll.u32 %v6717_v53, 16  ;;  %v8122_v36 = vld [vmem:[%s8355_s5 + $0x18] sm:$0xff]   ;;  %v6724_v37 = vld [vmem:[%s8355_s5 + $0x8c] sm:$0x1] }
  0xe9   : > { %7407 = vmatmul.mubr.bf16.gmra.mrb[24].mxu1 %v6348_v9  ;;  %7664 = vmatprep.subr.bf16.mxu0 %v8126_v2  ;;  %v4656_v63 = vshrl.u32 %v6717_v53, 16  ;;  %v4631_v0 = vsel %vm8378_vm2, %v4626_v54, %v4630_v40  ;;  %v4648_v3 = vrot.slane %v4646_v59, 5  ;;  %v4662_v7 = vshll.u32 %v6718_v57, 16  ;;  %v6726_v57 = vld [vmem:[%s8355_s5 + $0x94] sm:$0xf] }
  0xea   : > { %7631 = vmatmul.mubr.bf16.gmra.mrb[8].mxu0 %v6764_v43  ;;  %7410 = vmatprep.mubr.bf16.mxu1 %v6349_v41  ;;  %v4635_v55 = vor.u32 %v4634_v45, %v4630_v40  ;;  %v1725_v18 = vsel %vm8478_vm5, %v1723_v56, %v1724_v52  ;;  %v4654_v5 = vrot.slane %v4652_v62, 5  ;;  %v4667_v19 = vshrl.u32 %v6719_v12, 16  ;;  %v8124_v41 = vld [vmem:[%s8355_s5 + $0x24] sm:$0xff]  }
  0xeb   : > { %v4658_v6 = vrot.slane %v4656_v63, 4  ;;  %v6350_v10 = vcombine.low %v1722_v61, %v1725_v18  ;;  %v4664_v16 = vrot.slane %v4662_v7, 5  ;;  %v4670_v21 = vshll.u32 %v6719_v12, 16  ;;  %v6727_v61 = vld [vmem:[%s8355_s5 + $0x98] sm:$0x1] }
  0xec   : > { %7665 = vmatpush3.bf16.msra.mxu0 %v8126_v2  ;;  %v4636_v1 = vrot.slane %v4635_v55, 4  ;;  %v4645_v2 = vrot.slane %v4643_v58, 4  ;;  %v4676_v22 = vshll.u32 %v6720_v13, 16  ;;  %v4680_v47 = vshrl.u32 %v6720_v13, 16  ;;  %v6725_v55 = vld [vmem:[%s8355_s5 + $0x90] sm:$0xf] }
  0xed   : > { %7666 = vmatprep.subr.bf16.mxu0 %v8129_v14  ;;  %v4659_v15 = vor.u32 %v4658_v6, %v4654_v5  ;;  %v4669_v24 = vrot.slane %v4667_v19, 4  ;;  %v4686_v25 = vshll.u32 %v6721_v17, 16  ;;  %v4672_v29 = vrot.slane %v4670_v21, 5  ;;  %v6730_v12 = vld [vmem:[%s8355_s5 + $0xa4] sm:$0x1]  ;;  %v8125_v17 = vld [vmem:[%s8355_s5 + $0x30] sm:$0xff]  }
  0xee   : > { %v4641_v9 = vsel %vm8378_vm2, %v4636_v1, %v4640_v49  ;;  %v4649_v11 = vor.u32 %v4648_v3, %v4645_v2  ;;  %v4678_v30 = vrot.slane %v4676_v22, 5  ;;  %v4682_v31 = vrot.slane %v4680_v47, 4  ;;  %v6728_v3 = vld [vmem:[%s8355_s5 + $0x9c] sm:$0xf] }
  0xef   : > { %v4660_v23 = vrot.slane %v4659_v15, 4  ;;  %v4688_v35 = vrot.slane %v4686_v25, 5  ;;  %v4691_v38 = vshrl.u32 %v6722_v26, 16  ;;  %v4694_v39 = vshll.u32 %v6722_v26, 16 }
  0xf0   : > { %7667 = vmatpush3.bf16.msra.mxu0 %v8129_v14  ;;  %v6765_v14 = vcombine.low %v4631_v0, %v4641_v9  ;;  %v4650_v20 = vrot.slane %v4649_v11, 4  ;;  %v4673_v27 = vor.u32 %v4672_v29, %v4669_v24  ;;  %v4683_v42 = vor.u32 %v4682_v31, %v4678_v30  ;;  %v6729_v9 = vld [vmem:[%s8355_s5 + $0xa0] sm:$0xf]  ;;  %v8143_v29 = vld [vmem:[%s9516_s1 + $0x110] sm:$0xff]  }
  0xf1   : > { %7668 = vmatprep.subr.bf16.mxu0 %v8132_v48  ;;  %7411 = vmatmul.mubr.bf16.gmra.mrb[28].mxu1 %v6350_v10  ;;  %v4665_v34 = vsel %vm8378_vm2, %v4660_v23, %v4664_v16  ;;  %v4700_v43 = vshll.u32 %v6723_v32, 16  ;;  %v4693_v44 = vrot.slane %v4691_v38, 4  ;;  %v4696_v45 = vrot.slane %v4694_v39, 5  ;;  %v8127_v23 = vld [vmem:[%s8355_s5 + $0x3c] sm:$0xff]   ;;  %v6732_v38 = vld [vmem:[%s8355_s5 + $0xac] sm:$0xf] }
  0xf2   : > { %7634 = vmatprep.mubr.bf16.mxu0 %v6765_v14  ;;  %7430 = vmatprep.mubr.bf16.mxu1 %v8121_v8  ;;  %v4655_v28 = vsel %vm8378_vm2, %v4650_v20, %v4654_v5  ;;  %v4704_v46 = vshrl.u32 %v6723_v32, 16  ;;  %v4674_v49 = vrot.slane %v4673_v27, 4  ;;  %v4684_v50 = vrot.slane %v4683_v42, 4  ;;  %v8142_v8 = vld [vmem:[%s9516_s1 + $0x108] sm:$0xff]   ;;  %v6733_v39 = vld [vmem:[%s8355_s5 + $0xb0] sm:$0x1] }
  0xf3   : > { %v6766_v40 = vcombine.low %v4655_v28, %v4665_v34  ;;  %v4702_v51 = vrot.slane %v4700_v43, 5  ;;  %v4697_v52 = vor.u32 %v4696_v45, %v4693_v44  ;;  %v4715_v56 = vshrl.u32 %v6725_v55, 16  ;;  %v6731_v34 = vld [vmem:[%s8355_s5 + $0xa8] sm:$0xf] }
  0xf4   : > { %7669 = vmatpush3.bf16.msra.mxu0 %v8132_v48  ;;  %v4710_v48 = vshll.u32 %v6724_v37, 16  ;;  %v4706_v53 = vrot.slane %v4704_v46, 4  ;;  %v4679_v58 = vsel %vm8378_vm2, %v4674_v49, %v4678_v30  ;;  %v4689_v59 = vsel %vm8378_vm2, %v4684_v50, %v4688_v35  ;;  %v8128_v49 = vld [vmem:[%s8355_s5 + $0x48] sm:$0xff]   ;;  %v8144_v50 = vld [vmem:[%s9516_s1 + $0x118] sm:$0xff]  }
  0xf5   : > { %7635 = vmatmul.mubr.bf16.gmra.mrb[12].mxu0 %v6766_v40  ;;  %v4718_v62 = vshll.u32 %v6725_v55, 16  ;;  %v6767_v63 = vcombine.low %v4679_v58, %v4689_v59  ;;  %v4698_v0 = vrot.slane %v4697_v52, 4  ;;  %v4724_v2 = vshll.u32 %v6726_v57, 16  ;;  %v6734_v55 = vld [vmem:[%s8355_s5 + $0xb4] sm:$0xf] }
  0xf6   : > { %v4712_v54 = vrot.slane %v4710_v48, 5  ;;  %v4707_v1 = vor.u32 %v4706_v53, %v4702_v51  ;;  %v4717_v18 = vrot.slane %v4715_v56, 4  ;;  %v4728_v6 = vshrl.u32 %v6726_v57, 16  ;;  %v8130_v57 = vld [vmem:[%s8355_s5 + $0x54] sm:$0xff]  }
  0xf7   : > { %v4720_v5 = vrot.slane %v4718_v62, 5  ;;  %v4734_v7 = vshll.u32 %v6727_v61, 16  ;;  %7638 = vmatprep.mubr.bf16.mxu0 %v6767_v63  ;;  %v4703_v10 = vsel %vm8378_vm2, %v4698_v0, %v4702_v51  ;;  %v4726_v11 = vrot.slane %v4724_v2, 5  ;;  %v6735_v56 = vld [vmem:[%s8355_s5 + $0xb8] sm:$0xf] }
  0xf8   : > { %v4739_v13 = vshrl.u32 %v6728_v3, 16  ;;  %v4730_v15 = vrot.slane %v4728_v6, 4  ;;  %v4742_v19 = vshll.u32 %v6728_v3, 16  ;;  %v4748_v22 = vshll.u32 %v6729_v9, 16  ;;  %v6736_v62 = vld [vmem:[%s8355_s5 + $0xbc] sm:$0x1] }
  0xf9   : > { %7431 = vmatmul.mubr.bf16.vlgmr.msra.gmra.mrb[0].mxu1 %v8122_v36  ;;  %v4721_v14 = vor.u32 %v4720_v5, %v4717_v18  ;;  %v4736_v16 = vrot.slane %v4734_v7, 5  ;;  %v4752_v47 = vshrl.u32 %v6729_v9, 16  ;;  %v4758_v32 = vshll.u32 %v6730_v12, 16  ;;  %v8145_v7 = vld [vmem:[%s9516_s1 + $0x120] sm:$0xff]  }
  0xfa   : > { %7710 = vmatpush3.bf16.msra.mxu1 %v8982_v60  ;;  %7434 = vmatprep.mubr.bf16.mxu1 %v8124_v41  ;;  %v4708_v60 = vrot.slane %v4707_v1, 4  ;;  %v4741_v21 = vrot.slane %v4739_v13, 4  ;;  %v4731_v26 = vor.u32 %v4730_v15, %v4726_v11  ;;  %v4744_v28 = vrot.slane %v4742_v19, 5  ;;  %v6738_v15 = vld [vmem:[%s8355_s5 + $0xc4] sm:$0xf] }
  0xfb   : > { %7703 = vmatprep.subr.bf16.mxu1 %v8142_v8  ;;  %v4722_v25 = vrot.slane %v4721_v14, 4  ;;  %v4750_v30 = vrot.slane %v4748_v22, 5  ;;  %v4754_v31 = vrot.slane %v4752_v47, 4  ;;  %v4763_v40 = vshrl.u32 %v6731_v34, 16 }
  0xfc   : > { %v4713_v20 = vsel %vm8378_vm2, %v4708_v60, %v4712_v54  ;;  %v4732_v36 = vrot.slane %v4731_v26, 4  ;;  %v4745_v37 = vor.u32 %v4744_v28, %v4741_v21  ;;  %v4760_v42 = vrot.slane %v4758_v32, 5  ;;  %v6739_v21 = vld [vmem:[%s8355_s5 + $0xc8] sm:$0x1]  ;;  %v8131_v26 = vld [vmem:[%s8355_s5 + $0x60] sm:$0xff]  }
  0xfd   : > { %v6768_v24 = vcombine.low %v4703_v10, %v4713_v20  ;;  %v4727_v35 = vsel %vm8378_vm2, %v4722_v25, %v4726_v11  ;;  %v4755_v27 = vor.u32 %v4754_v31, %v4750_v30  ;;  %v4766_v43 = vshll.u32 %v6731_v34, 16  ;;  %v6737_v11 = vld [vmem:[%s8355_s5 + $0xc0] sm:$0xf]  ;;  %v8146_v28 = vld [vmem:[%s9516_s1 + $0x128] sm:$0xff]  }
  0xfe   : > { %7711 = vmatpush3.bf16.msra.mxu1 %v8142_v8  ;;  %v4772_v41 = vshll.u32 %v6732_v38, 16  ;;  %v4737_v44 = vsel %vm8378_vm2, %v4732_v36, %v4736_v16  ;;  %v4746_v45 = vrot.slane %v4745_v37, 4  ;;  %v4765_v46 = vrot.slane %v4763_v40, 4  ;;  %v6740_v34 = vld [vmem:[%s8355_s5 + $0xcc] sm:$0xf] }
  0xff   : > { %7704 = vmatprep.subr.bf16.mxu1 %v8143_v29  ;;  %7639 = vmatmul.mubr.bf16.gmra.mrb[16].mxu0 %v6768_v24  ;;  %v4776_v48 = vshrl.u32 %v6732_v38, 16  ;;  %v6769_v51 = vcombine.low %v4727_v35, %v4737_v44  ;;  %v4756_v52 = vrot.slane %v4755_v27, 4  ;;  %v4768_v53 = vrot.slane %v4766_v43, 5  ;;  %v6741_v35 = vld [vmem:[%s8355_s5 + $0xd0] sm:$0xf] }
 0x100   : > { %v4774_v54 = vrot.slane %v4772_v41, 5  ;;  %v4751_v58 = vsel %vm8378_vm2, %v4746_v45, %v4750_v30  ;;  %v4782_v61 = vshll.u32 %v6733_v39, 16  ;;  %v4787_v1 = vshrl.u32 %v6734_v55, 16  ;;  %v8133_v36 = vld [vmem:[%s8355_s5 + $0x6c] sm:$0xff]   ;;  %v6742_v40 = vld [vmem:[%s8355_s5 + $0xd4] sm:$0x1] }
 0x101   : > { %7435 = vmatmul.mubr.bf16.gmra.mrb[4].mxu1 %v8125_v17  ;;  %v4778_v59 = vrot.slane %v4776_v48, 4  ;;  %7642 = vmatprep.mubr.bf16.mxu0 %v6769_v51  ;;  %v4761_v63 = vsel %vm8378_vm2, %v4756_v52, %v4760_v42  ;;  %v4769_v0 = vor.u32 %v4768_v53, %v4765_v46  ;;  %v4790_v2 = vshll.u32 %v6734_v55, 16 }
 0x102   : > { %7438 = vmatprep.mubr.bf16.mxu1 %v8127_v23  ;;  %7712 = vmatpush3.bf16.msra.mxu1 %v8143_v29  ;;  %v6770_v3 = vcombine.low %v4751_v58, %v4761_v63  ;;  %v4784_v5 = vrot.slane %v4782_v61, 5  ;;  %v4796_v6 = vshll.u32 %v6735_v56, 16  ;;  %v4789_v9 = vrot.slane %v4787_v1, 4  ;;  %v6783_v61 = vld [vmem:[%s8355_s5 + $0x18] sm:$0xe] }
 0x103   : > { %7705 = vmatprep.subr.bf16.mxu1 %v8144_v50  ;;  %v4779_v18 = vor.u32 %v4778_v59, %v4774_v54  ;;  %v4770_v8 = vrot.slane %v4769_v0, 4  ;;  %v4792_v10 = vrot.slane %v4790_v2, 5  ;;  %v4800_v60 = vshrl.u32 %v6735_v56, 16  ;;  %v6784_v56 = vld [vmem:[%s8355_s5 + $0x1c] sm:$0xf] }
 0x104   : > { %v4798_v13 = vrot.slane %v4796_v6, 5  ;;  %v4806_v14 = vshll.u32 %v6736_v62, 16  ;;  %v4811_v16 = vshrl.u32 %v6737_v11, 16  ;;  %v4814_v22 = vshll.u32 %v6737_v11, 16  ;;  %v6785_v0 = vld [vmem:[%s8355_s5 + $0x20] sm:$0x1] }
 0x105   : > { %v4780_v12 = vrot.slane %v4779_v18, 4  ;;  %v4775_v17 = vsel %vm8378_vm2, %v4770_v8, %v4774_v54  ;;  %v4793_v19 = vor.u32 %v4792_v10, %v4789_v9  ;;  %v4802_v20 = vrot.slane %v4800_v60, 4  ;;  %v8134_v6 = vld [vmem:[%s8355_s5 + $0x78] sm:$0xff]   ;;  %v6786_v60 = vld [vmem:[%s8355_s5 + $0x24] sm:$0xe] }
 0x106   : > { %7713 = vmatpush3.bf16.msra.mxu1 %v8144_v50  ;;  %v4808_v23 = vrot.slane %v4806_v14, 5  ;;  %v4813_v24 = vrot.slane %v4811_v16, 4  ;;  %v4820_v25 = vshll.u32 %v6738_v15, 16  ;;  %v4816_v32 = vrot.slane %v4814_v22, 5  ;;  %v8147_v50 = vld [vmem:[%s9516_s1 + $0x130] sm:$0xff]   ;;  %v8135_v16 = vld [vmem:[%s8355_s5 + $0x84] sm:$0xff]  }
 0x107   : > { %7706 = vmatprep.subr.bf16.mxu1 %v8145_v7  ;;  %7643 = vmatmul.mubr.bf16.gmra.mrb[20].mxu0 %v6770_v3  ;;  %v4785_v47 = vsel %vm8378_vm2, %v4780_v12, %v4784_v5  ;;  %v4794_v30 = vrot.slane %v4793_v19, 4  ;;  %v4803_v31 = vor.u32 %v4802_v20, %v4798_v13  ;;  %v4824_v38 = vshrl.u32 %v6738_v15, 16  ;;  %v6787_v11 = vld [vmem:[%s8355_s5 + $0x28] sm:$0xf]  ;;  %v6788_v15 = vld [vmem:[%s8355_s5 + $0x2c] sm:$0x1] }
 0x108   : > { %v6771_v29 = vcombine.low %v4775_v17, %v4785_v47  ;;  %v4822_v37 = vrot.slane %v4820_v25, 5  ;;  %v4830_v39 = vshll.u32 %v6739_v21, 16  ;;  %v4835_v27 = vshrl.u32 %v6740_v34, 16  ;;  %v6789_v22 = vld [vmem:[%s8355_s5 + $0x30] sm:$0xe] }
 0x109   : > { %7439 = vmatmul.mubr.bf16.gmra.mrb[8].mxu1 %v8128_v49  ;;  %v4799_v42 = vsel %vm8378_vm2, %v4794_v30, %v4798_v13  ;;  %v4804_v43 = vrot.slane %v4803_v31, 4  ;;  %v4817_v41 = vor.u32 %v4816_v32, %v4813_v24  ;;  %v4838_v44 = vshll.u32 %v6740_v34, 16  ;;  %v6790_v25 = vld [vmem:[%s8355_s5 + $0x34] sm:$0xf] }
 0x10a   : > { %7442 = vmatprep.mubr.bf16.mxu1 %v8130_v57  ;;  %7714 = vmatpush3.bf16.msra.mxu1 %v8145_v7  ;;  %v4826_v45 = vrot.slane %v4824_v38, 4  ;;  %v4832_v46 = vrot.slane %v4830_v39, 5  ;;  %v4837_v48 = vrot.slane %v4835_v27, 4  ;;  %v4844_v49 = vshll.u32 %v6741_v35, 16  ;;  %v8148_v7 = vld [vmem:[%s9516_s1 + $0x138] sm:$0xff]  }
 0x10b   : > { %7707 = vmatprep.subr.bf16.mxu1 %v8146_v28  ;;  %7646 = vmatprep.mubr.bf16.mxu0 %v6771_v29  ;;  %v4809_v51 = vsel %vm8378_vm2, %v4804_v43, %v4808_v23  ;;  %v4818_v52 = vrot.slane %v4817_v41, 4  ;;  %v4840_v53 = vrot.slane %v4838_v44, 5  ;;  %v4848_v54 = vshrl.u32 %v6741_v35, 16  ;;  %v6794_v38 = vld [vmem:[%s8355_s5 + $0x44] sm:$0x1] }
 0x10c   : > { %v6772_v55 = vcombine.low %v4799_v42, %v4809_v51  ;;  %v4827_v57 = vor.u32 %v4826_v45, %v4822_v37  ;;  %v4846_v58 = vrot.slane %v4844_v49, 5  ;;  %v4854_v59 = vshll.u32 %v6742_v40, 16  ;;  %v8136_v42 = vld [vmem:[%s8355_s5 + $0x90] sm:$0xff]   ;;  %v6795_v41 = vld [vmem:[%s8355_s5 + $0x48] sm:$0xe] }
 0x10d   : > { %v4841_v62 = vor.u32 %v4840_v53, %v4837_v48  ;;  %v4850_v63 = vrot.slane %v4848_v54, 4  ;;  %v6831_v1 = vrot.slane %v6783_v61, 9  ;;  %v4823_v2 = vsel %vm8378_vm2, %v4818_v52, %v4822_v37  ;;  %v6793_v37 = vld [vmem:[%s8355_s5 + $0x40] sm:$0xf]  ;;  %v6796_v49 = vld [vmem:[%s8355_s5 + $0x4c] sm:$0xf] }
 0x10e   : > { %7715 = vmatpush3.bf16.msra.mxu1 %v8146_v28  ;;  %v4828_v3 = vrot.slane %v4827_v57, 4  ;;  %v5342_v18 = vrot.slane %v6784_v56, 5  ;;  %v5345_v5 = vrot.slane %v6785_v0, 5  ;;  %v4856_v10 = vrot.slane %v4854_v59, 5  ;;  %v8137_v48 = vld [vmem:[%s8355_s5 + $0x9c] sm:$0xff]  }
 0x10f   : > { %7708 = vmatprep.subr.bf16.mxu1 %v8147_v50  ;;  %7647 = vmatmul.mubr.bf16.gmra.mrb[24].mxu0 %v6772_v55  ;;  %v4842_v8 = vrot.slane %v4841_v62, 4  ;;  %v4851_v9 = vor.u32 %v4850_v63, %v4846_v58  ;;  %v5349_v21 = vrot.slane %v6787_v11, 5  ;;  %v6832_v23 = vrot.slane %v6786_v60, 9  ;;  %v6798_v57 = vld [vmem:[%s8355_s5 + $0x54] sm:$0xe] }
 0x110   : > { %v4833_v12 = vsel %vm8378_vm2, %v4828_v3, %v4832_v46  ;;  %v5343_v13 = vsel %vm8478_vm5, %v6831_v1, %v5342_v18  ;;  %v5344_v14 = vrot.slane %v5342_v18, 4  ;;  %v5352_v24 = vrot.slane %v6788_v15, 5  ;;  %v6800_v59 = vld [vmem:[%s8355_s5 + $0x5c] sm:$0x1]  ;;  %v6801_v18 = vld [vmem:[%s8355_s5 + $0x60] sm:$0xe] }
 0x111   : > { %7443 = vmatmul.mubr.bf16.gmra.mrb[12].mxu1 %v8131_v26  ;;  %v6773_v17 = vcombine.low %v4823_v2, %v4833_v12  ;;  %v4847_v19 = vsel %vm8378_vm2, %v4842_v8, %v4846_v58  ;;  %v4852_v20 = vrot.slane %v4851_v9, 4  ;;  %v6791_v26 = vld [vmem:[%s8355_s5 + $0x38] sm:$0x1]  ;;  %v5351_v30 = vrot.slane %v5349_v21, 4  ;;  %v6803_v8 = vld [vmem:[%s8355_s5 + $0x68] sm:$0x1] }
 0x112   : > { %7446 = vmatprep.mubr.bf16.mxu1 %v8133_v36  ;;  %7716 = vmatpush3.bf16.msra.mxu1 %v8147_v50  ;;  %v5346_v47 = vsel %vm8478_vm5, %v5344_v14, %v5345_v5  ;;  %v6833_v31 = vrot.slane %v6789_v22, 9  ;;  %v5356_v34 = vrot.slane %v6790_v25, 5  ;;  %v5359_v35 = vrot.slane %v6791_v26, 5  ;;  %v6792_v36 = vld [vmem:[%s8355_s5 + $0x3c] sm:$0xe]  ;;  %v8138_v15 = vld [vmem:[%s8355_s5 + $0xa8] sm:$0xff]  }
 0x113   : > { %7709 = vmatprep.subr.bf16.mxu1 %v8148_v7  ;;  %7650 = vmatprep.mubr.bf16.mxu0 %v6773_v17  ;;  %v4857_v28 = vsel %vm8378_vm2, %v4852_v20, %v4856_v10  ;;  %v6863_v29 = vcombine.low %v5343_v13, %v5346_v47  ;;  %v6834_v39 = vrot.slane %v6792_v36, 9  ;;  %v5363_v40 = vrot.slane %v6793_v37, 5  ;;  %v6797_v50 = vld [vmem:[%s8355_s5 + $0x50] sm:$0x1]  ;;  %v6799_v58 = vld [vmem:[%s8355_s5 + $0x58] sm:$0xf] }
 0x114   : > { %v6774_v32 = vcombine.low %v4847_v19, %v4857_v28  ;;  %v5358_v27 = vrot.slane %v5356_v34, 4  ;;  %v5366_v43 = vrot.slane %v6794_v38, 5  ;;  %v5350_v44 = vsel %vm8478_vm5, %v6832_v23, %v5349_v21  ;;  %v6802_v5 = vld [vmem:[%s8355_s5 + $0x64] sm:$0xf]  ;;  %v6804_v13 = vld [vmem:[%s8355_s5 + $0x6c] sm:$0xe] }
 0x115   : > { %v5353_v45 = vsel %vm8478_vm5, %v5351_v30, %v5352_v24  ;;  %v5365_v46 = vrot.slane %v5363_v40, 4  ;;  %v6835_v51 = vrot.slane %v6795_v41, 9  ;;  %v5357_v52 = vsel %vm8478_vm5, %v6833_v31, %v5356_v34  ;;  %v6805_v19 = vld [vmem:[%s8355_s5 + $0x70] sm:$0xf]  ;;  %v6806_v20 = vld [vmem:[%s8355_s5 + $0x74] sm:$0x1] }
 0x116   : > { %7717 = vmatpush3.bf16.msra.mxu1 %v8148_v7  ;;  %v5360_v53 = vsel %vm8478_vm5, %v5358_v27, %v5359_v35  ;;  %v5370_v54 = vrot.slane %v6796_v49, 5  ;;  %v5373_v55 = vrot.slane %v6797_v50, 5  ;;  %v6864_v61 = vcombine.low %v5350_v44, %v5353_v45  ;;  %v8139_v23 = vld [vmem:[%s8355_s5 + $0xb4] sm:$0xff]   ;;  %v6455_v26 = vld [vmem:[%s8355_s5 + $0x6c] sm:$0xf] }
 0x117   : > { %7651 = vmatmul.mubr.bf16.gmra.mrb[28].mxu0 %v6774_v32  ;;  %v9192_v56 = vsel %vm8478_vm5, %v6834_v39, %v5363_v40  ;;  %v6836_v63 = vrot.slane %v6798_v57, 9  ;;  %v6865_v0 = vcombine.low %v5357_v52, %v5360_v53  ;;  %v9196_v1 = vsel %vm8478_vm5, %v5365_v46, %v5366_v43  ;;  %v6456_v28 = vld [vmem:[%s8355_s5 + $0x70] sm:$0xf]  ;;  %v6457_v31 = vld [vmem:[%s8355_s5 + $0x74] sm:$0x1] }
 0x118   : > { %7670 = vmatprep.mubr.bf16.mxu0 %v6863_v29  ;;  %v5372_v62 = vrot.slane %v5370_v54, 4  ;;  %v5377_v2 = vrot.slane %v6799_v58, 5  ;;  %v5380_v3 = vrot.slane %v6800_v59, 5  ;;  %v6837_v9 = vrot.slane %v6801_v18, 9  ;;  %v6807_v35 = vld [vmem:[%s8355_s5 + $0x78] sm:$0xe] }
 0x119   : > { %7447 = vmatmul.mubr.bf16.gmra.mrb[16].mxu1 %v8134_v6  ;;  %v9202_v6 = vsel %vm8478_vm5, %v6835_v51, %v5370_v54  ;;  %v5384_v10 = vrot.slane %v6802_v5, 5  ;;  %v5387_v12 = vrot.slane %v6803_v8, 5  ;;  %v6866_v14 = vcombine.low %v9192_v56, %v9196_v1  ;;  %v6808_v40 = vld [vmem:[%s8355_s5 + $0x7c] sm:$0xf]  ;;  %v6809_v27 = vld [vmem:[%s8355_s5 + $0x80] sm:$0x1] }
 0x11a   : > { %7450 = vmatprep.mubr.bf16.mxu1 %v8135_v16  ;;  %v9206_v7 = vsel %vm8478_vm5, %v5372_v62, %v5373_v55  ;;  %v9211_v60 = vsel %vm8478_vm5, %v6836_v63, %v5377_v2  ;;  %v5379_v11 = vrot.slane %v5377_v2, 4  ;;  %v6838_v21 = vrot.slane %v6804_v13, 9  ;;  %v6458_v45 = vld [vmem:[%s8355_s5 + $0x78] sm:$0xf]  ;;  %v6459_v51 = vld [vmem:[%s8355_s5 + $0x7c] sm:$0xf] }
 0x11b   : > { %v9219_v16 = vsel %vm8478_vm5, %v6837_v9, %v5384_v10  ;;  %v5386_v17 = vrot.slane %v5384_v10, 4  ;;  %v6867_v22 = vcombine.low %v9202_v6, %v9206_v7  ;;  %v5391_v24 = vrot.slane %v6805_v19, 5  ;;  %v6460_v57 = vld [vmem:[%s8355_s5 + $0x80] sm:$0x1]  ;;  %v6810_v62 = vld [vmem:[%s8355_s5 + $0x84] sm:$0xe] }
 0x11c   : > { %v9227_v47 = vsel %vm8478_vm5, %v5379_v11, %v5380_v3  ;;  %v5394_v25 = vrot.slane %v6806_v20, 5  ;;  %v2804_v32 = vshrl.u32 %v6455_v26, 16  ;;  %v2807_v34 = vshll.u32 %v6455_v26, 16  ;;  %v6811_v3 = vld [vmem:[%s8355_s5 + $0x88] sm:$0xf]  ;;  %v8140_v9 = vld [vmem:[%s8355_s5 + $0xc0] sm:$0xff]  }
 0x11d   : > { %v6868_v29 = vcombine.low %v9211_v60, %v9227_v47  ;;  %v9236_v30 = vsel %vm8478_vm5, %v5386_v17, %v5387_v12  ;;  %v9244_v37 = vsel %vm8478_vm5, %v6838_v21, %v5391_v24  ;;  %v5393_v38 = vrot.slane %v5391_v24, 4  ;;  %v6812_v8 = vld [vmem:[%s8355_s5 + $0x8c] sm:$0x1]  ;;  %v6462_v21 = vld [vmem:[%s8355_s5 + $0x88] sm:$0xf] }
 0x11e   : > { %v6869_v36 = vcombine.low %v9219_v16, %v9236_v30  ;;  %v2813_v39 = vshll.u32 %v6456_v28, 16  ;;  %v2809_v43 = vrot.slane %v2807_v34, 5  ;;  %v2817_v41 = vshrl.u32 %v6456_v28, 16 }
 0x11f   : > { %7671 = vmatmul.mubr.bf16.vlgmr.msra.gmra.mrb[0].mxu0 %v6864_v61  ;;  %v2823_v44 = vshll.u32 %v6457_v31, 16  ;;  %v9251_v46 = vsel %vm8478_vm5, %v5393_v38, %v5394_v25  ;;  %v6839_v49 = vrot.slane %v6807_v35, 9  ;;  %v5398_v50 = vrot.slane %v6808_v40, 5  ;;  %v6463_v31 = vld [vmem:[%s8355_s5 + $0x8c] sm:$0x1] }
 0x120   : > { %7674 = vmatprep.mubr.bf16.mxu0 %v6865_v0  ;;  %v6870_v52 = vcombine.low %v9244_v37, %v9251_v46  ;;  %v2819_v54 = vrot.slane %v2817_v41, 4  ;;  %v5401_v61 = vrot.slane %v6809_v27, 5  ;;  %v2828_v56 = vshrl.u32 %v6458_v45, 16  ;;  %v6813_v27 = vld [vmem:[%s8355_s5 + $0x90] sm:$0xe] }
 0x121   : > { %7451 = vmatmul.mubr.bf16.gmra.mrb[20].mxu1 %v8136_v42  ;;  %v2806_v42 = vrot.slane %v2804_v32, 4  ;;  %v2825_v55 = vrot.slane %v2823_v44, 5  ;;  %v9259_v58 = vsel %vm8478_vm5, %v6839_v49, %v5398_v50  ;;  %v5400_v59 = vrot.slane %v5398_v50, 4 }
 0x122   : > { %7454 = vmatprep.mubr.bf16.mxu1 %v8137_v48  ;;  %v2815_v48 = vrot.slane %v2813_v39, 5  ;;  %v2831_v1 = vshll.u32 %v6458_v45, 16  ;;  %v2837_v2 = vshll.u32 %v6459_v51, 16  ;;  %v2830_v5 = vrot.slane %v2828_v56, 4  ;;  %v6814_v45 = vld [vmem:[%s8355_s5 + $0x94] sm:$0xf] }
 0x123   : > { %v2810_v53 = vor.u32 %v2809_v43, %v2806_v42  ;;  %v9265_v18 = vsel %vm8478_vm5, %v5400_v59, %v5401_v61  ;;  %v2841_v6 = vshrl.u32 %v6459_v51, 16  ;;  %v2847_v7 = vshll.u32 %v6460_v57, 16  ;;  %v6465_v57 = vld [vmem:[%s8355_s5 + $0x94] sm:$0xf] }
 0x124   : > { %v2820_v0 = vor.u32 %v2819_v54, %v2815_v48  ;;  %v6871_v12 = vcombine.low %v9259_v58, %v9265_v18  ;;  %v2833_v13 = vrot.slane %v2831_v1, 5  ;;  %v6840_v20 = vrot.slane %v6810_v62, 9  ;;  %v6464_v54 = vld [vmem:[%s8355_s5 + $0x90] sm:$0xf]  ;;  %v6816_v1 = vld [vmem:[%s8355_s5 + $0x9c] sm:$0xe] }
 0x125   : > { %v2811_v63 = vrot.slane %v2810_v53, 4  ;;  %v2843_v17 = vrot.slane %v2841_v6, 4  ;;  %v2849_v19 = vrot.slane %v2847_v7, 5  ;;  %v5405_v24 = vrot.slane %v6811_v3, 5  ;;  %v6815_v53 = vld [vmem:[%s8355_s5 + $0x98] sm:$0x1] }
 0x126   : > { %v2821_v11 = vrot.slane %v2820_v0, 4  ;;  %v5408_v25 = vrot.slane %v6812_v8, 5  ;;  %v2861_v40 = vshll.u32 %v6462_v21, 16  ;;  %v2865_v44 = vshrl.u32 %v6462_v21, 16  ;;  %v6817_v7 = vld [vmem:[%s8355_s5 + $0xa0] sm:$0xf] }
 0x127   : > { %7675 = vmatmul.mubr.bf16.gmra.mrb[4].mxu0 %v6866_v14  ;;  %v2816_v10 = vsel %vm8378_vm2, %v2811_v63, %v2815_v48  ;;  %v6461_v14 = vld [vmem:[%s8355_s5 + $0x84] sm:$0xf]  ;;  %v9280_v38 = vsel %vm8478_vm5, %v6840_v20, %v5405_v24  ;;  %v5407_v39 = vrot.slane %v5405_v24, 4  ;;  %v2871_v51 = vshll.u32 %v6463_v31, 16  ;;  %v6466_v63 = vld [vmem:[%s8355_s5 + $0x98] sm:$0x1] }
 0x128   : > { %7678 = vmatprep.mubr.bf16.mxu0 %v6867_v22  ;;  %v2826_v22 = vsel %vm8378_vm2, %v2821_v11, %v2825_v55  ;;  %v2852_v32 = vshrl.u32 %v6461_v14, 16  ;;  %v2855_v34 = vshll.u32 %v6461_v14, 16  ;;  %v2863_v50 = vrot.slane %v2861_v40, 5  ;;  %v6467_v20 = vld [vmem:[%s8355_s5 + $0x9c] sm:$0xf] }
 0x129   : > { %7455 = vmatmul.mubr.bf16.gmra.mrb[24].mxu1 %v8138_v15  ;;  %v2839_v15 = vrot.slane %v2837_v2, 5  ;;  %v6503_v26 = vcombine.low %v2816_v10, %v2826_v22  ;;  %v9291_v49 = vsel %vm8478_vm5, %v5407_v39, %v5408_v25  ;;  %v2867_v55 = vrot.slane %v2865_v44, 4  ;;  %v6468_v25 = vld [vmem:[%s8355_s5 + $0xa0] sm:$0xf]  ;;  %v6469_v39 = vld [vmem:[%s8355_s5 + $0xa4] sm:$0x1] }
 0x12a   : > { %7458 = vmatprep.mubr.bf16.mxu1 %v8139_v23  ;;  %v2834_v23 = vor.u32 %v2833_v13, %v2830_v5  ;;  %v2854_v43 = vrot.slane %v2852_v32, 4  ;;  %v2857_v41 = vrot.slane %v2855_v34, 5  ;;  %v6872_v47 = vcombine.low %v9280_v38, %v9291_v49  ;;  %v6818_v13 = vld [vmem:[%s8355_s5 + $0xa4] sm:$0x1]  ;;  %v6820_v44 = vld [vmem:[%s8355_s5 + $0xac] sm:$0xf] }
 0x12b   : > { %v2844_v28 = vor.u32 %v2843_v17, %v2839_v15  ;;  %v2873_v61 = vrot.slane %v2871_v51, 5  ;;  %v6841_v56 = vrot.slane %v6813_v27, 9  ;;  %v5412_v62 = vrot.slane %v6814_v45, 5 }
 0x12c   : > { %v2835_v35 = vrot.slane %v2834_v23, 4  ;;  %v2868_v16 = vor.u32 %v2867_v55, %v2863_v50  ;;  %v5415_v30 = vrot.slane %v6815_v53, 5  ;;  %v2879_v5 = vshll.u32 %v6464_v54, 16  ;;  %v6821_v53 = vld [vmem:[%s8355_s5 + $0xb0] sm:$0x1] }
 0x12d   : > { %v2845_v42 = vrot.slane %v2844_v28, 4  ;;  %v9307_v2 = vsel %vm8478_vm5, %v6841_v56, %v5412_v62  ;;  %v5414_v3 = vrot.slane %v5412_v62, 4  ;;  %v2885_v6 = vshll.u32 %v6465_v57, 16 }
 0x12e   : > { %v2840_v48 = vsel %vm8378_vm2, %v2835_v35, %v2839_v15  ;;  %v2889_v11 = vshrl.u32 %v6465_v57, 16  ;;  %v2881_v15 = vrot.slane %v2879_v5, 5  ;;  %v6842_v24 = vrot.slane %v6816_v1, 9 }
 0x12f   : > { %7679 = vmatmul.mubr.bf16.gmra.mrb[8].mxu0 %v6868_v29  ;;  %v2850_v60 = vsel %vm8378_vm2, %v2845_v42, %v2849_v19  ;;  %v2858_v29 = vor.u32 %v2857_v41, %v2854_v43  ;;  %v5416_v14 = vsel %vm8478_vm5, %v5414_v3, %v5415_v30  ;;  %v2887_v17 = vrot.slane %v2885_v6, 5  ;;  %v6819_v43 = vld [vmem:[%s8355_s5 + $0xa8] sm:$0xe] }
 0x130   : > { %7682 = vmatprep.mubr.bf16.mxu0 %v6869_v36  ;;  %v6504_v59 = vcombine.low %v2840_v48, %v2850_v60  ;;  %v2876_v36 = vshrl.u32 %v6464_v54, 16  ;;  %v2895_v19 = vshll.u32 %v6466_v63, 16  ;;  %v6873_v22 = vcombine.low %v9307_v2, %v5416_v14  ;;  %v6470_v54 = vld [vmem:[%s8355_s5 + $0xa8] sm:$0xf]  ;;  %v6822_v2 = vld [vmem:[%s8355_s5 + $0xb4] sm:$0xe] }
 0x131   : > { %7459 = vmatmul.mubr.bf16.gmra.mrb[28].mxu1 %v8140_v9  ;;  %v2859_v0 = vrot.slane %v2858_v29, 4  ;;  %v2869_v9 = vrot.slane %v2868_v16, 4  ;;  %v2891_v23 = vrot.slane %v2889_v11, 4  ;;  %v5419_v32 = vrot.slane %v6817_v7, 5  ;;  %v6824_v14 = vld [vmem:[%s8355_s5 + $0xbc] sm:$0x1] }
 0x132   : > { %7494 = vmatprep.mubr.bf16.mxu1 %v6503_v26  ;;  %v2878_v10 = vrot.slane %v2876_v36, 4  ;;  %v2897_v31 = vrot.slane %v2895_v19, 5  ;;  %v5422_v35 = vrot.slane %v6818_v13, 5  ;;  %v2900_v40 = vshrl.u32 %v6467_v20, 16 }
 0x133   : > { %v2864_v8 = vsel %vm8378_vm2, %v2859_v0, %v2863_v50  ;;  %v2874_v21 = vsel %vm8378_vm2, %v2869_v9, %v2873_v61  ;;  %v2892_v34 = vor.u32 %v2891_v23, %v2887_v17  ;;  %v2903_v27 = vshll.u32 %v6467_v20, 16  ;;  %v6472_v0 = vld [vmem:[%s8355_s5 + $0xb0] sm:$0x1]  ;;  %v6474_v23 = vld [vmem:[%s8355_s5 + $0xb8] sm:$0xf] }
 0x134   : > { %v6505_v26 = vcombine.low %v2864_v8, %v2874_v21  ;;  %v2882_v28 = vor.u32 %v2881_v15, %v2878_v10  ;;  %v9329_v46 = vsel %vm8478_vm5, %v6842_v24, %v5419_v32  ;;  %v2909_v42 = vshll.u32 %v6468_v25, 16  ;;  %v6823_v8 = vld [vmem:[%s8355_s5 + $0xb8] sm:$0xf] }
 0x135   : > { %v2893_v58 = vrot.slane %v2892_v34, 4  ;;  %v2902_v18 = vrot.slane %v2900_v40, 4  ;;  %v2913_v41 = vshrl.u32 %v6468_v25, 16  ;;  %v2919_v51 = vshll.u32 %v6469_v39, 16  ;;  %v6475_v34 = vld [vmem:[%s8355_s5 + $0xbc] sm:$0x1] }
 0x136   : > { %v2883_v37 = vrot.slane %v2882_v28, 4  ;;  %v2911_v50 = vrot.slane %v2909_v42, 5  ;;  %v6843_v62 = vrot.slane %v6819_v43, 9  ;;  %v5426_v63 = vrot.slane %v6820_v44, 5 }
 0x137   : > { %7683 = vmatmul.mubr.bf16.gmra.mrb[12].mxu0 %v6870_v52  ;;  %v5421_v52 = vrot.slane %v5419_v32, 4  ;;  %v2898_v60 = vsel %vm8378_vm2, %v2893_v58, %v2897_v31  ;;  %v2915_v57 = vrot.slane %v2913_v41, 4  ;;  %v2921_v56 = vrot.slane %v2919_v51, 5  ;;  %v6476_v51 = vld [vmem:[%s8355_s5 + $0xc0] sm:$0xf] }
 0x138   : > { %7686 = vmatprep.mubr.bf16.mxu0 %v6871_v12  ;;  %v2905_v12 = vrot.slane %v2903_v27, 5  ;;  %v2888_v45 = vsel %vm8378_vm2, %v2883_v37, %v2887_v17  ;;  %v5429_v36 = vrot.slane %v6821_v53, 5  ;;  %v2924_v1 = vshrl.u32 %v6470_v54, 16  ;;  %v6473_v17 = vld [vmem:[%s8355_s5 + $0xb4] sm:$0xf] }
 0x139   : > { %7495 = vmatmul.mubr.bf16.vlgmr.msra.gmra.mrb[16].mxu1 %v6504_v59  ;;  %v9337_v48 = vsel %vm8478_vm5, %v5421_v52, %v5422_v35  ;;  %v6471_v59 = vld [vmem:[%s8355_s5 + $0xac] sm:$0xf]  ;;  %v6506_v61 = vcombine.low %v2888_v45, %v2898_v60  ;;  %v2916_v30 = vor.u32 %v2915_v57, %v2911_v50  ;;  %v5427_v3 = vsel %vm8478_vm5, %v6843_v62, %v5426_v63  ;;  %v6825_v52 = vld [vmem:[%s8355_s5 + $0xc0] sm:$0xe] }
 0x13a   : > { %7498 = vmatprep.mubr.bf16.mxu1 %v6505_v26  ;;  %v6874_v29 = vcombine.low %v9329_v46, %v9337_v48  ;;  %v2906_v55 = vor.u32 %v2905_v12, %v2902_v18  ;;  %v5428_v5 = vrot.slane %v5426_v63, 4  ;;  %v2927_v6 = vshll.u32 %v6470_v54, 16  ;;  %v6826_v12 = vld [vmem:[%s8355_s5 + $0xc4] sm:$0xf] }
 0x13b   : > { %v2933_v7 = vshll.u32 %v6471_v59, 16  ;;  %v2917_v10 = vrot.slane %v2916_v30, 4  ;;  %v2926_v11 = vrot.slane %v2924_v1, 4  ;;  %v2937_v13 = vshrl.u32 %v6471_v59, 16 }
 0x13c   : > { %v2907_v16 = vrot.slane %v2906_v55, 4  ;;  %v5430_v38 = vsel %vm8478_vm5, %v5428_v5, %v5429_v36  ;;  %v2929_v49 = vrot.slane %v2927_v6, 5  ;;  %v2943_v15 = vshll.u32 %v6472_v0, 16  ;;  %v6828_v5 = vld [vmem:[%s8355_s5 + $0xcc] sm:$0xe] }
 0x13d   : > { %v2922_v19 = vsel %vm8378_vm2, %v2917_v10, %v2921_v56  ;;  %v6875_v20 = vcombine.low %v5427_v3, %v5430_v38  ;;  %v2939_v21 = vrot.slane %v2937_v13, 4  ;;  %v5433_v28 = vrot.slane %v6823_v8, 5  ;;  %v6829_v10 = vld [vmem:[%s8355_s5 + $0xd0] sm:$0xf] }
 0x13e   : > { %v2912_v9 = vsel %vm8378_vm2, %v2907_v16, %v2911_v50  ;;  %v2930_v25 = vor.u32 %v2929_v49, %v2926_v11  ;;  %v2945_v26 = vrot.slane %v2943_v15, 5  ;;  %v5436_v32 = vrot.slane %v6824_v14, 5  ;;  %v6827_v50 = vld [vmem:[%s8355_s5 + $0xc8] sm:$0x1]  ;;  %v6830_v49 = vld [vmem:[%s8355_s5 + $0xd4] sm:$0x1] }
 0x13f   : > { %7687 = vmatmul.mubr.bf16.gmra.mrb[16].mxu0 %v6872_v47  ;;  %v2935_v47 = vrot.slane %v2933_v7, 5  ;;  %v6507_v24 = vcombine.low %v2912_v9, %v2922_v19  ;;  %v2948_v35 = vshrl.u32 %v6473_v17, 16  ;;  %v2951_v39 = vshll.u32 %v6473_v17, 16  ;;  %v6478_v16 = vld [vmem:[%s8355_s5 + $0xc8] sm:$0x1] }
 0x140   : > { %7690 = vmatprep.mubr.bf16.mxu0 %v6873_v22  ;;  %v6844_v22 = vrot.slane %v6822_v2, 9  ;;  %v2931_v40 = vrot.slane %v2930_v25, 4  ;;  %v5435_v37 = vrot.slane %v5433_v28, 4  ;;  %v2957_v46 = vshll.u32 %v6474_v23, 16 }
 0x141   : > { %7499 = vmatmul.mubr.bf16.gmra.mrb[20].mxu1 %v6506_v61  ;;  %v2940_v31 = vor.u32 %v2939_v21, %v2935_v47  ;;  %v2950_v43 = vrot.slane %v2948_v35, 4  ;;  %v2953_v58 = vrot.slane %v2951_v39, 5  ;;  %v2961_v18 = vshrl.u32 %v6474_v23, 16 }
 0x142   : > { %7502 = vmatprep.mubr.bf16.mxu1 %v6507_v24  ;;  %v5434_v27 = vsel %vm8478_vm5, %v6844_v22, %v5433_v28  ;;  %v2936_v41 = vsel %vm8378_vm2, %v2931_v40, %v2935_v47  ;;  %v5437_v44 = vsel %vm8478_vm5, %v5435_v37, %v5436_v32  ;;  %v2959_v45 = vrot.slane %v2957_v46, 5 }
 0x143   : > { %v2941_v42 = vrot.slane %v2940_v31, 4  ;;  %v2967_v48 = vshll.u32 %v6475_v34, 16  ;;  %v6876_v54 = vcombine.low %v5434_v27, %v5437_v44  ;;  %v2954_v60 = vor.u32 %v2953_v58, %v2950_v43 }
 0x144   : > { %v2963_v55 = vrot.slane %v2961_v18, 4  ;;  %v6845_v61 = vrot.slane %v6825_v52, 9  ;;  %v5440_v56 = vrot.slane %v6826_v12, 5  ;;  %v5443_v0 = vrot.slane %v6827_v50, 5 }
 0x145   : > { %v2946_v53 = vsel %vm8378_vm2, %v2941_v42, %v2945_v26  ;;  %v2969_v59 = vrot.slane %v2967_v48, 5  ;;  %v2955_v62 = vrot.slane %v2954_v60, 4  ;;  %v2972_v30 = vshrl.u32 %v6476_v51, 16 }
 0x146   : > { %v6508_v57 = vcombine.low %v2936_v41, %v2946_v53  ;;  %v2964_v63 = vor.u32 %v2963_v55, %v2959_v45  ;;  %v5441_v36 = vsel %vm8478_vm5, %v6845_v61, %v5440_v56  ;;  %v5442_v1 = vrot.slane %v5440_v56, 4 }
 0x147   : > { %7691 = vmatmul.mubr.bf16.gmra.mrb[20].mxu0 %v6874_v29  ;;  %v6477_v29 = vld [vmem:[%s8355_s5 + $0xc4] sm:$0xf]  ;;  %v2975_v2 = vshll.u32 %v6476_v51, 16  ;;  %v2960_v6 = vsel %vm8378_vm2, %v2955_v62, %v2959_v45  ;;  %v2974_v8 = vrot.slane %v2972_v30, 4  ;;  %v2991_v38 = vshll.u32 %v6478_v16, 16  ;;  %s9408_s5 = sand.u32 1, %s8235_s13  }
 0x148   : > { %7694 = vmatprep.mubr.bf16.mxu0 %v6875_v20  ;;  %v2981_v3 = vshll.u32 %v6477_v29, 16  ;;  %v2965_v7 = vrot.slane %v2964_v63, 4  ;;  %v2985_v9 = vshrl.u32 %v6477_v29, 16  ;;  %v5444_v11 = vsel %vm8478_vm5, %v5442_v1, %v5443_v0  ;;  %s6236_s8 = sshll.u32 %s9408_s5, 7  ;;  %s6107_s24 = scalar_lea.sflag [#allocation4], %s9408_s5 }
 0x149   : > { %7503 = vmatmul.mubr.bf16.gmra.mrb[24].mxu1 %v6508_v57  ;;  %v2977_v13 = vrot.slane %v2975_v2, 5  ;;  %v6877_v15 = vcombine.low %v5441_v36, %v5444_v11  ;;  %v6846_v19 = vrot.slane %v6828_v5, 9  ;;  %v5447_v22 = vrot.slane %v6829_v10, 5  ;;  %s9411_s9 = scalar_lea.vmem [#allocation3], %s6236_s8 }
 0x14a   : > { %v2983_v14 = vrot.slane %v2981_v3, 5  ;;  %v2970_v47 = vsel %vm8378_vm2, %v2965_v7, %v2969_v59  ;;  %v2987_v17 = vrot.slane %v2985_v9, 4  ;;  %v2993_v24 = vrot.slane %v2991_v38, 5  ;;  %s6125_s11 = sshll.u32 %s9411_s9, 4  ;;  %s9439_s11 = int_to_ptr.vmem [resolvable:$true] %s6125_s11 }
 0x14b   : > { %v6509_v20 = vcombine.low %v2960_v6, %v2970_v47  ;;  %v2978_v21 = vor.u32 %v2977_v13, %v2974_v8  ;;  %v5450_v25 = vrot.slane %v6830_v49, 5  ;;  %v5448_v28 = vsel %vm8478_vm5, %v6846_v19, %v5447_v22  ;;  %s8149_s25 = scalar_lea.vmem %s9439_s11, 2048  ;;  %p8156_p0 = scmp.lt.s32.totalorder %s9439_s11, %s8154_s27 }
 0x14c   : > { %v2988_v23 = vor.u32 %v2987_v17, %v2983_v14  ;;  %v5449_v31 = vrot.slane %v5447_v22, 4  ;;  %p8150_p11 = scmp.ne.s32.totalorder %s9439_s11, %s8149_s25  ;;  %p8157_p1 = scmp.lt.s32.totalorder %s8155_s28, %s8149_s25 }
 0x14d   : > { %7506 = vmatprep.mubr.bf16.mxu1 %v6509_v20  ;;  %v2979_v26 = vrot.slane %v2978_v21, 4 }
 0x14e   : > { %v2989_v32 = vrot.slane %v2988_v23, 4  ;;  %v5451_v35 = vsel %vm8478_vm5, %v5449_v31, %v5450_v25  ;;  %p8151_p12 = pnand %p8150_p11, %p8307_p5  ;;  %p8158_p2 = por %p8157_p1, %p8156_p0 }
 0x14f   : > { %7695 = vmatmul.mubr.bf16.gmra.mrb[24].mxu0 %v6876_v54  ;;  %v2984_v34 = vsel %vm8378_vm2, %v2979_v26, %v2983_v14  ;;  %v6878_v40 = vcombine.low %v5448_v28, %v5451_v35 }
 0x150   : > { %7698 = vmatprep.mubr.bf16.mxu0 %v6877_v15  ;;  %v2994_v39 = vsel %vm8378_vm2, %v2989_v32, %v2993_v24  ;;  %p8152_p13 = pneg %p8151_p12 }
 0x151   : > { %v6510_v27 = vcombine.low %v2984_v34, %v2994_v39 }
 0x152   : > { %p8159_p3 = pnand %p8158_p2, %p8152_p13 }
 0x153   : > { %7507 = vmatmul.mubr.bf16.gmra.mrb[28].mxu1 %v6510_v27 }
 0x157   : > { %7699 = vmatmul.mubr.bf16.gmra.mrb[28].mxu0 %v6878_v40 }
 0x1cc   : > { %v7432_v37 = vpop.f32.mrb[0].mxu1 }
 0x1cd   : > { %v2340_v46 = vpop.f32.mrb[1].mxu1 }
 0x1ce   : > { %v7433_v52 = vpop.f32.mrb[2].mxu1 }
 0x1cf   : > { %v2343_v42 = vpop.f32.mrb[3].mxu1 }
 0x1d4   : > { %v7436_v43 = vpop.f32.mrb[4].mxu1 }
 0x1d5   : > { %v2356_v58 = vpop.f32.mrb[5].mxu1 }
 0x1d6   : > { %v7437_v18 = vpop.f32.mrb[6].mxu1 }
 0x1d7   : > { %v2359_v12 = vpop.f32.mrb[7].mxu1 }
 0x1dc   : > { %v7440_v41 = vpop.f32.mrb[8].mxu1 }
 0x1dd   : > { %v2372_v44 = vpop.f32.mrb[9].mxu1 }
 0x1de   : > { %v7441_v4 = vpop.f32.mrb[10].mxu1 }
 0x1df   : > { %v9397_v45 = vpop.f32.mrb[11].mxu1 }
 0x1e4   : > { %v9399_v33 = vpop.f32.mrb[12].mxu1 }
 0x1e5   : > { %v9401_v48 = vpop.f32.mrb[13].mxu1 }
 0x1e6   : > { %v9403_v50 = vpop.f32.mrb[14].mxu1 }
 0x1e7   : > { %v9405_v51 = vpop.f32.mrb[15].mxu1 }
 0x1f2   : > { %v7672_v53 = vpop.f32.mrb[0].mxu0 }
 0x1f3   : > { %v7718_v54 = vadd.f32 %v7672_v53, %v7432_v37  ;;  %v5615_v60 = vpop.f32.mrb[1].mxu0 }
 0x1f4   : > { %v7719_v55 = vadd.f32 %v5615_v60, %v2340_v46  ;;  %v7673_v29 = vpop.f32.mrb[2].mxu0 }
 0x1f5   : > { %v7720_v57 = vadd.f32 %v7673_v29, %v7433_v52  ;;  %v5618_v59 = vpop.f32.mrb[3].mxu0  ;;  %v6038_v30 = vmul.f32 %v7718_v54, %v7718_v54 }
 0x1f6   : > { %v7721_v61 = vadd.f32 %v5618_v59, %v2343_v42  ;;  %v6036_v62 = vmul.f32 %v7719_v55, %v7719_v55 }
 0x1f7   : > { %v6967_v56 = vpack.c.bf16 %v7720_v57, %v7718_v54  ;;  %v6039_v6 = vmul.f32 %v7720_v57, %v7720_v57 }
 0x1f8   : > { %v6962_v63 = vpack.c.bf16 %v7721_v61, %v7719_v55  ;;  %v5998_v0 = vadd.f32 %v7721_v61, %v7719_v55  ;;  %v6037_v16 = vmul.f32 %v7721_v61, %v7721_v61 }
 0x1f9   : > { %7039 = vst [vmem:[%s9411_s9 + $0x8] sm:$0xff] %v6967_v56  }
 0x1fa   : > { %6963 = vst [vmem:[%s9411_s9] sm:$0xff] %v6962_v63   ;;  %v5999_v36 = vadd.f32 %v7718_v54, %v5998_v0  ;;  %v6068_v1 = vadd.f32 %v6037_v16, %v6036_v62  ;;  %v7676_v2 = vpop.f32.mrb[4].mxu0 }
 0x1fb   : > { %v7722_v3 = vadd.f32 %v7676_v2, %v7436_v43  ;;  %v5631_v5 = vpop.f32.mrb[5].mxu0 }
 0x1fc   : > { %v6069_v7 = vadd.f32 %v6068_v1, %v6038_v30  ;;  %v7723_v8 = vadd.f32 %v5631_v5, %v2356_v58  ;;  %v6000_v9 = vadd.f32 %v7720_v57, %v5999_v36  ;;  %v7677_v10 = vpop.f32.mrb[6].mxu0 }
 0x1fd   : > { %v7724_v11 = vadd.f32 %v7677_v10, %v7437_v18  ;;  %v5634_v13 = vpop.f32.mrb[7].mxu0  ;;  %v6042_v22 = vmul.f32 %v7722_v3, %v7722_v3 }
 0x1fe   : > { %v6001_v14 = vadd.f32 %v7723_v8, %v6000_v9  ;;  %v6040_v38 = vmul.f32 %v7723_v8, %v7723_v8  ;;  %v6070_v49 = vadd.f32 %v6069_v7, %v6039_v6  ;;  %v7725_v47 = vadd.f32 %v5634_v13, %v2359_v12 }
 0x1ff   : > { %v6977_v15 = vpack.c.bf16 %v7724_v11, %v7722_v3  ;;  %v6043_v31 = vmul.f32 %v7724_v11, %v7724_v11 }
 0x200   : > { %v6071_v17 = vadd.f32 %v6070_v49, %v6040_v38  ;;  %v6972_v19 = vpack.c.bf16 %v7725_v47, %v7723_v8  ;;  %v6002_v20 = vadd.f32 %v7725_v47, %v6001_v14  ;;  %v6041_v21 = vmul.f32 %v7725_v47, %v7725_v47 }
 0x201   : > { %7041 = vst [vmem:[%s9411_s9 + $0x18] sm:$0xff] %v6977_v15  }
 0x202   : > { %7040 = vst [vmem:[%s9411_s9 + $0x10] sm:$0xff] %v6972_v19   ;;  %v6003_v23 = vadd.f32 %v7722_v3, %v6002_v20  ;;  %v6072_v24 = vadd.f32 %v6071_v17, %v6041_v21  ;;  %v7680_v25 = vpop.f32.mrb[8].mxu0 }
 0x203   : > { %v7726_v26 = vadd.f32 %v7680_v25, %v7440_v41  ;;  %v5647_v28 = vpop.f32.mrb[9].mxu0 }
 0x204   : > { %v6073_v32 = vadd.f32 %v6072_v24, %v6042_v22  ;;  %v7727_v34 = vadd.f32 %v5647_v28, %v2372_v44  ;;  %v6004_v35 = vadd.f32 %v7724_v11, %v6003_v23  ;;  %v7681_v39 = vpop.f32.mrb[10].mxu0 }
 0x205   : > { %v7728_v40 = vadd.f32 %v7681_v39, %v7441_v4  ;;  %v5650_v27 = vpop.f32.mrb[11].mxu0  ;;  %v6046_v60 = vmul.f32 %v7726_v26, %v7726_v26 }
 0x206   : > { %v6005_v37 = vadd.f32 %v7727_v34, %v6004_v35  ;;  %v6044_v46 = vmul.f32 %v7727_v34, %v7727_v34  ;;  %v6074_v52 = vadd.f32 %v6073_v32, %v6043_v31  ;;  %v7729_v42 = vadd.f32 %v5650_v27, %v9397_v45 }
 0x207   : > { %v6987_v43 = vpack.c.bf16 %v7728_v40, %v7726_v26  ;;  %v6047_v56 = vmul.f32 %v7728_v40, %v7728_v40 }
 0x208   : > { %v6075_v58 = vadd.f32 %v6074_v52, %v6044_v46  ;;  %v6982_v18 = vpack.c.bf16 %v7729_v42, %v7727_v34  ;;  %v6006_v12 = vadd.f32 %v7729_v42, %v6005_v37  ;;  %v6045_v41 = vmul.f32 %v7729_v42, %v7729_v42 }
 0x209   : > { %7043 = vst [vmem:[%s9411_s9 + $0x28] sm:$0xff] %v6987_v43  }
 0x20a   : > { %7042 = vst [vmem:[%s9411_s9 + $0x20] sm:$0xff] %v6982_v18   ;;  %v6007_v44 = vadd.f32 %v7726_v26, %v6006_v12  ;;  %v6076_v55 = vadd.f32 %v6075_v58, %v6045_v41  ;;  %v7684_v29 = vpop.f32.mrb[12].mxu0 }
 0x20b   : > { %v7730_v57 = vadd.f32 %v7684_v29, %v9399_v33  ;;  %v5663_v59 = vpop.f32.mrb[13].mxu0 }
 0x20c   : > { %v7496_v53 = vpop.f32.mrb[16].mxu1  ;;  %v6077_v45 = vadd.f32 %v6076_v55, %v6046_v60  ;;  %v7731_v62 = vadd.f32 %v5663_v59, %v9401_v48  ;;  %v6008_v63 = vadd.f32 %v7728_v40, %v6007_v44  ;;  %v7685_v0 = vpop.f32.mrb[14].mxu0 }
 0x20d   : > { %v3222_v54 = vpop.f32.mrb[17].mxu1  ;;  %v7732_v16 = vadd.f32 %v7685_v0, %v9403_v50  ;;  %v5666_v30 = vpop.f32.mrb[15].mxu0  ;;  %v6050_v9 = vmul.f32 %v7730_v57, %v7730_v57 }
 0x20e   : > { %v7497_v4 = vpop.f32.mrb[18].mxu1  ;;  %v6009_v36 = vadd.f32 %v7731_v62, %v6008_v63  ;;  %v6048_v1 = vmul.f32 %v7731_v62, %v7731_v62  ;;  %v6078_v2 = vadd.f32 %v6077_v45, %v6047_v56  ;;  %v7733_v3 = vadd.f32 %v5666_v30, %v9405_v51 }
 0x20f   : > { %v3225_v61 = vpop.f32.mrb[19].mxu1  ;;  %v6997_v5 = vpack.c.bf16 %v7732_v16, %v7730_v57  ;;  %v6051_v49 = vmul.f32 %v7732_v16, %v7732_v16 }
 0x210   : > { %v6079_v33 = vadd.f32 %v6078_v2, %v6048_v1  ;;  %v6992_v6 = vpack.c.bf16 %v7733_v3, %v7731_v62  ;;  %v6010_v7 = vadd.f32 %v7733_v3, %v6009_v36  ;;  %v6049_v8 = vmul.f32 %v7733_v3, %v7733_v3 }
 0x211   : > { %7045 = vst [vmem:[%s9411_s9 + $0x38] sm:$0xff] %v6997_v5  }
 0x212   : > { %7044 = vst [vmem:[%s9411_s9 + $0x30] sm:$0xff] %v6992_v6   ;;  %v6011_v48 = vadd.f32 %v7730_v57, %v6010_v7  ;;  %v6080_v10 = vadd.f32 %v6079_v33, %v6049_v8  ;;  %v7688_v11 = vpop.f32.mrb[16].mxu0 }
 0x213   : > { %v7734_v14 = vadd.f32 %v7688_v11, %v7496_v53  ;;  %v5679_v50 = vpop.f32.mrb[17].mxu0 }
 0x214   : > { %v7500_v13 = vpop.f32.mrb[20].mxu1  ;;  %v6081_v47 = vadd.f32 %v6080_v10, %v6050_v9  ;;  %v7735_v15 = vadd.f32 %v5679_v50, %v3222_v54  ;;  %v6012_v51 = vadd.f32 %v7732_v16, %v6011_v48  ;;  %v7689_v17 = vpop.f32.mrb[18].mxu0 }
 0x215   : > { %v3238_v38 = vpop.f32.mrb[21].mxu1  ;;  %v7736_v20 = vadd.f32 %v7689_v17, %v7497_v4  ;;  %v5682_v21 = vpop.f32.mrb[19].mxu0  ;;  %v6054_v39 = vmul.f32 %v7734_v14, %v7734_v14 }
 0x216   : > { %v7501_v19 = vpop.f32.mrb[22].mxu1  ;;  %v6013_v23 = vadd.f32 %v7735_v15, %v6012_v51  ;;  %v6052_v24 = vmul.f32 %v7735_v15, %v7735_v15  ;;  %v6082_v25 = vadd.f32 %v6081_v47, %v6051_v49  ;;  %v7737_v26 = vadd.f32 %v5682_v21, %v3225_v61 }
 0x217   : > { %v3241_v22 = vpop.f32.mrb[23].mxu1  ;;  %v7007_v28 = vpack.c.bf16 %v7736_v20, %v7734_v14  ;;  %v6055_v42 = vmul.f32 %v7736_v20, %v7736_v20 }
 0x218   : > { %v6083_v31 = vadd.f32 %v6082_v25, %v6052_v24  ;;  %v7002_v32 = vpack.c.bf16 %v7737_v26, %v7735_v15  ;;  %v6014_v34 = vadd.f32 %v7737_v26, %v6013_v23  ;;  %v6053_v35 = vmul.f32 %v7737_v26, %v7737_v26 }
 0x219   : > { %7047 = vst [vmem:[%s9411_s9 + $0x48] sm:$0xff] %v7007_v28  }
 0x21a   : > { %7046 = vst [vmem:[%s9411_s9 + $0x40] sm:$0xff] %v7002_v32   ;;  %v6015_v40 = vadd.f32 %v7734_v14, %v6014_v34  ;;  %v6084_v27 = vadd.f32 %v6083_v31, %v6053_v35  ;;  %v7692_v37 = vpop.f32.mrb[20].mxu0 }
 0x21b   : > { %v7738_v46 = vadd.f32 %v7692_v37, %v7500_v13  ;;  %v5695_v52 = vpop.f32.mrb[21].mxu0 }
 0x21c   : > { %v6085_v43 = vadd.f32 %v6084_v27, %v6054_v39  ;;  %v7739_v58 = vadd.f32 %v5695_v52, %v3238_v38  ;;  %v6016_v18 = vadd.f32 %v7736_v20, %v6015_v40  ;;  %v7693_v12 = vpop.f32.mrb[22].mxu0  ;;  %v7504_v29 = vpop.f32.mrb[24].mxu1 }
 0x21d   : > { %v7740_v41 = vadd.f32 %v7693_v12, %v7501_v19  ;;  %v5698_v53 = vpop.f32.mrb[23].mxu0  ;;  %v3254_v57 = vpop.f32.mrb[25].mxu1  ;;  %v6058_v0 = vmul.f32 %v7738_v46, %v7738_v46 }
 0x21e   : > { %v6017_v54 = vadd.f32 %v7739_v58, %v6016_v18  ;;  %v6056_v60 = vmul.f32 %v7739_v58, %v7739_v58  ;;  %v6086_v44 = vadd.f32 %v6085_v43, %v6055_v42  ;;  %v7741_v55 = vadd.f32 %v5698_v53, %v3241_v22  ;;  %v7505_v62 = vpop.f32.mrb[26].mxu1 }
 0x21f   : > { %v7017_v4 = vpack.c.bf16 %v7740_v41, %v7738_v46  ;;  %v3257_v63 = vpop.f32.mrb[27].mxu1  ;;  %v6059_v3 = vmul.f32 %v7740_v41, %v7740_v41 }
 0x220   : > { %v6087_v59 = vadd.f32 %v6086_v44, %v6056_v60  ;;  %v7012_v61 = vpack.c.bf16 %v7741_v55, %v7739_v58  ;;  %v6018_v56 = vadd.f32 %v7741_v55, %v6017_v54  ;;  %v6057_v45 = vmul.f32 %v7741_v55, %v7741_v55 }
 0x221   : > { %7049 = vst [vmem:[%s9411_s9 + $0x58] sm:$0xff] %v7017_v4  }
 0x222   : > { %7048 = vst [vmem:[%s9411_s9 + $0x50] sm:$0xff] %v7012_v61   ;;  %v6019_v16 = vadd.f32 %v7738_v46, %v6018_v56  ;;  %v6088_v30 = vadd.f32 %v6087_v59, %v6057_v45  ;;  %v7696_v36 = vpop.f32.mrb[24].mxu0 }
 0x223   : > { %v7742_v1 = vadd.f32 %v7696_v36, %v7504_v29  ;;  %v5711_v2 = vpop.f32.mrb[25].mxu0 }
 0x224   : > { %v6089_v5 = vadd.f32 %v6088_v30, %v6058_v0  ;;  %v7743_v33 = vadd.f32 %v5711_v2, %v3254_v57  ;;  %v6020_v6 = vadd.f32 %v7740_v41, %v6019_v16  ;;  %v7697_v7 = vpop.f32.mrb[26].mxu0 }
 0x225   : > { %v7744_v8 = vadd.f32 %v7697_v7, %v7505_v62  ;;  %v5714_v9 = vpop.f32.mrb[27].mxu0  ;;  %v6062_v15 = vmul.f32 %v7742_v1, %v7742_v1 }
 0x226   : > { %v6021_v48 = vadd.f32 %v7743_v33, %v6020_v6  ;;  %v6060_v10 = vmul.f32 %v7743_v33, %v7743_v33  ;;  %v6090_v11 = vadd.f32 %v6089_v5, %v6059_v3  ;;  %v7745_v13 = vadd.f32 %v5714_v9, %v3257_v63  ;;  %v7508_v19 = vpop.f32.mrb[28].mxu1 }
 0x227   : > { %v7027_v14 = vpack.c.bf16 %v7744_v8, %v7742_v1  ;;  %v3270_v22 = vpop.f32.mrb[29].mxu1  ;;  %v6063_v24 = vmul.f32 %v7744_v8, %v7744_v8 }
 0x228   : > { %v6091_v50 = vadd.f32 %v6090_v11, %v6060_v10  ;;  %v7022_v38 = vpack.c.bf16 %v7745_v13, %v7743_v33  ;;  %v6022_v49 = vadd.f32 %v7745_v13, %v6021_v48  ;;  %v6061_v47 = vmul.f32 %v7745_v13, %v7745_v13  ;;  %v7509_v31 = vpop.f32.mrb[30].mxu1 }
 0x229   : > { %7051 = vst [vmem:[%s9411_s9 + $0x68] sm:$0xff] %v7027_v14   ;;  %v3273_v35 = vpop.f32.mrb[31].mxu1 }
 0x22a   : > { %7050 = vst [vmem:[%s9411_s9 + $0x60] sm:$0xff] %v7022_v38   ;;  %v6023_v51 = vadd.f32 %v7742_v1, %v6022_v49  ;;  %v6092_v17 = vadd.f32 %v6091_v50, %v6061_v47  ;;  %v7700_v20 = vpop.f32.mrb[28].mxu0 }
 0x22b   : > { %v7746_v21 = vadd.f32 %v7700_v20, %v7508_v19  ;;  %v5727_v23 = vpop.f32.mrb[29].mxu0 }
 0x22c   : > { %v6093_v25 = vadd.f32 %v6092_v17, %v6062_v15  ;;  %v7747_v26 = vadd.f32 %v5727_v23, %v3270_v22  ;;  %v6024_v28 = vadd.f32 %v7744_v8, %v6023_v51  ;;  %v7701_v32 = vpop.f32.mrb[30].mxu0 }
 0x22d   : > { %v7748_v34 = vadd.f32 %v7701_v32, %v7509_v31  ;;  %v5730_v39 = vpop.f32.mrb[31].mxu0  ;;  %v6066_v12 = vmul.f32 %v7746_v21, %v7746_v21 }
 0x22e   : > { %v6025_v40 = vadd.f32 %v7747_v26, %v6024_v28  ;;  %v6064_v27 = vmul.f32 %v7747_v26, %v7747_v26  ;;  %v6094_v37 = vadd.f32 %v6093_v25, %v6063_v24  ;;  %v7749_v46 = vadd.f32 %v5730_v39, %v3273_v35 }
 0x22f   : > { %v7037_v52 = vpack.c.bf16 %v7748_v34, %v7746_v21 }
 0x230   : > { %v6095_v42 = vadd.f32 %v6094_v37, %v6064_v27  ;;  %v7032_v43 = vpack.c.bf16 %v7749_v46, %v7747_v26  ;;  %v6026_v58 = vadd.f32 %v7749_v46, %v6025_v40  ;;  %v6065_v18 = vmul.f32 %v7749_v46, %v7749_v46 }
 0x231   : > { %7053 = vst [vmem:[%s9411_s9 + $0x78] sm:$0xff] %v7037_v52  }
 0x232   : > { %7052 = vst [vmem:[%s9411_s9 + $0x70] sm:$0xff] %v7032_v43   ;;  %v6027_v41 = vadd.f32 %v7746_v21, %v6026_v58  ;;  %v6096_v53 = vadd.f32 %v6095_v42, %v6065_v18 }
 0x233   : > { %8162 = shalt.err (!%p8159_p3)
}
 0x234   : > { %s8163_s29 = scalar_lea.hbm %s9437_s20, 2048  ;;  %s8167_s6 = scalar_lea.hbm %s9517_s2, 4096 }
 0x235   : > { %p8164_p4 = scmp.ne.s32.totalorder %s9437_s20, %s8163_s29  ;;  %p8168_p9 = scmp.lt.u32.totalorder %s9437_s20, %s9517_s2 }
 0x236   : > { %p8169_p10 = scmp.lt.u32.totalorder %s8167_s6, %s8163_s29  ;;  %p8171_p12 = scmp.lt.u32.totalorder %s8163_s29, %s9437_s20 }
 0x237   : > { %p8165_p7 = pnand %p8164_p4, %p8307_p5 }
 0x238   : > { %p8170_p11 = por %p8169_p10, %p8168_p9 }
 0x239   : > { %p8166_p8 = pneg %p8165_p7 }
 0x23a   : > { %p8172_p13 = por %p8171_p12, %p8170_p11 }
 0x23c   : > { %p8173_p0 = pnand %p8172_p13, %p8166_p8 }
 0x23e   : > { %8176 = shalt.err (!%p8173_p0)
}
 0x23f   : > { %s8246_s9 = smov 64   ;;  %s8247_s10 = smov 4   ;;  %v6067_v54 = vmul.f32 %v7748_v34, %v7748_v34  ;;  %v6028_v60 = vadd.f32 %v7748_v34, %v6027_v41  ;;  %v6097_v44 = vadd.f32 %v6096_v53, %v6066_v12 }
 0x240   : > { %7975 = dma.vmem_to_hbm [thread:$0]  (%p8307_p5), %s9439_s11, 2048, %s9437_s20, %s6107_s24, %s8246_s9, %s8246_s9, %s8247_s10  }
 0x241   : > { %v6029_v55 = vrot.slane %v6028_v60, 4  ;;  %v6098_v29 = vadd.f32 %v6097_v44, %v6067_v54  ;;  %s6237_s17 = sshll.u32 %s9408_s5, 1  ;;  %s6923_s19 = sshll.u32 %s8290_s16, 5 }
 0x242   : > { %s174_s25 = scalar_lea.vmem [#allocation5], %s6237_s17  ;;  %s9472_s24 = scalar_lea.hbm %s9518_s3, %s6923_s19 }
 0x243   : > { %v6030_v4 = vadd.f32 %v6029_v55, %v6028_v60  ;;  %v6099_v57 = vrot.slane %v6098_v29, 4  ;;  %s6141_s26 = sshll.u32 %s174_s25, 4  ;;  %s6112_s27 = scalar_lea.sflag [#allocation6], %s9408_s5  ;;  %s9474_s26 = int_to_ptr.vmem [resolvable:$true] %s6141_s26 }
 0x244   : > { %s8177_s28 = scalar_lea.vmem %s9474_s26, 32  ;;  %s8248_s16 = smov [#allocation5]  }
 0x245   : > { %v6031_v59 = vrot.slane %v6030_v4, 2  ;;  %v6100_v61 = vadd.f32 %v6099_v57, %v6098_v29  ;;  %p8178_p1 = scmp.ne.s32.totalorder %s9474_s26, %s8177_s28  ;;  %s8181_s29 = sshll.u32 %s8248_s16, 4  ;;  %s8182_s29 = int_to_ptr.vmem [resolvable:$false] %s8181_s29 }
 0x246   : > { %s8183_s30 = scalar_lea.vmem %s8182_s29, 64  ;;  %p8184_p4 = scmp.lt.s32.totalorder %s9474_s26, %s8182_s29 }
 0x247   : > { %v6032_v56 = vadd.f32 %v6031_v59, %v6030_v4  ;;  %v6101_v45 = vrot.slane %v6100_v61, 2  ;;  %p8179_p2 = pnand %p8178_p1, %p8307_p5  ;;  %p8185_p7 = scmp.lt.s32.totalorder %s8183_s30, %s8177_s28 }
 0x249   : > { %v6033_v62 = vrot.slane %v6032_v56, 1  ;;  %v6102_v63 = vadd.f32 %v6101_v45, %v6100_v61  ;;  %p8180_p3 = pneg %p8179_p2  ;;  %p8186_p8 = por %p8185_p7, %p8184_p4 }
 0x24b   : > { %v6034_v0 = vadd.f32 %v6033_v62, %v6032_v56  ;;  %v6103_v16 = vrot.slane %v6102_v63, 1  ;;  %p8187_p9 = pnand %p8186_p8, %p8180_p3 }
 0x24d   : > { %6035 = vst [vmem:[%s174_s25] sm:$0x1] %v6034_v0  ;;  %v6104_v30 = vadd.f32 %v6103_v16, %v6102_v63 }
 0x24f   : > { %6105 = vst [vmem:[%s174_s25 + $0x1] sm:$0x1] %v6104_v30 }
 0x250   : > { %8190 = shalt.err (!%p8187_p9)
}
 0x251   : > { %s8191_s5 = scalar_lea.hbm %s9472_s24, 32  ;;  %s8195_s7 = scalar_lea.hbm %s9518_s3, 64 }
 0x252   : > { %p8192_p10 = scmp.ne.s32.totalorder %s9472_s24, %s8191_s5  ;;  %p8196_p13 = scmp.lt.u32.totalorder %s9472_s24, %s9518_s3 }
 0x253   : > { %p8197_p0 = scmp.lt.u32.totalorder %s8195_s7, %s8191_s5  ;;  %p8199_p2 = scmp.lt.u32.totalorder %s8191_s5, %s9472_s24 }
 0x254   : > { %p8193_p11 = pnand %p8192_p10, %p8307_p5 }
 0x255   : > { %p8198_p1 = por %p8197_p0, %p8196_p13 }
 0x256   : > { %p8194_p12 = pneg %p8193_p11 }
 0x257   : > { %p8200_p3 = por %p8199_p2, %p8198_p1 }
 0x259   : > { %p8201_p4 = pnand %p8200_p3, %p8194_p12 }
 0x25b   : > { %8204 = shalt.err (!%p8201_p4)
}
 0x25c   : > { %7976 = dma.vmem_to_hbm [thread:$0]  (%p8307_p5), %s9474_s26, 32, %s9472_s24, %s6112_s27  }
 0x25d PF: > { %p7986_p7 = scmp.ge.s32.totalorder %s8243_s15, 2  ;;  %s6153_s10 = sand.u32 1, %s8231_s12  }
 0x25e   : > { %s6154_s17 = scalar_lea.sflag [#allocation4], %s6153_s10 }
 0x25f   : > { %p7980_p8 = pnand %p7986_p7, %p8311_p6 }
 0x261   : > { %8222 = dma.done.wait (!%p7980_p8), %s6154_s17, 2048  }
 0x262   : > { %8224 = vsyncadd (!%p7980_p8), %s6154_s17, 4294965248  ;;  %s6163_s19 = scalar_lea.sflag [#allocation6], %s6153_s10 }
 0x263   : > { %8226 = dma.done.wait (!%p7980_p8), %s6163_s19, 32  }
 0x264   : > { %8228 = vsyncadd (!%p7980_p8), %s6163_s19, 4294967264  ;;  %p17_p5 = scmp.ge.s32.totalorder %s8294_s18, 4   ;;  %s9525_s12 = smov %s8235_s13 }
 0x265   : > { %s9526_s13 = smov %s8239_s14  ;;  %s9527_s14 = smov %s8305_s21 }
 0x266   : > { %s9528_s15 = smov %s8294_s18  ;;  %19 = sbr.rel (!%p17_p5) target bundleno = 5 (0x5), region = 90 }
 0x26d   :  { %6168 = vsyncpa [#allocation4], 1 }
 0x26e   :  { %6170 = vsyncpa [#allocation4 + $0x1], 1 }
 0x26f   :  { %6171 = vsyncpa [#allocation6], 1 }
 0x270   :  { %6173 = vsyncpa [#allocation6 + $0x1], 1 }

</bundles_post_ra>
